<compile_context>
chip_gen: v5e
topology: v5e:2x2
jax: 0.10.0
libtpu: 0.0.40
codegen_flags: <defaults>
</compile_context>

<pallas_src>
import functools
import math

import jax
import jax.numpy as jnp
from jax.experimental import pallas as pl
from jax.experimental.pallas import tpu as pltpu


# ----------------------------------------------------------------------------
# Pallas kernels
# ----------------------------------------------------------------------------
def _backbone_conv_kernel(x_ref, w_ref, b_ref, o_ref):
    """3x3 'same' conv + ReLU with im2col fused in-kernel.

    x_ref: (1, H+2, W+2, Cin)  bf16 (border pre-filled with channel mean so the
                                     normalization fold is exact)
    w_ref: (9, Cin, Cout)      bf16 (normalization folded in)
    b_ref: (1, Cout)           f32  (normalization folded in)
    o_ref: (1, H, W, Cout)     f32
    """
    H, W, Cout = o_ref.shape[1], o_ref.shape[2], o_ref.shape[3]
    Cin = x_ref.shape[3]
    acc = jnp.zeros((H * W, Cout), jnp.float32)
    for k in range(9):
        di, dj = k // 3, k % 3
        patch = x_ref[0, di:di + H, dj:dj + W, :].reshape(H * W, Cin)
        acc = acc + jnp.dot(patch, w_ref[k], preferred_element_type=jnp.float32)
    acc = jnp.maximum(acc + b_ref[...], 0.0)
    o_ref[...] = acc.reshape(1, H, W, Cout)


def _rpn_head_kernel(x_ref, wc_ref, bc_ref, wh_ref, bh_ref, o_ref):
    """RPN head fused: 3x3 conv + ReLU + (1x1 objectness | 1x1 bbox) GEMM.

    x_ref : (1, H+2, W+2, C)  bf16 padded backbone features
    wc_ref: (9, C, C)         bf16
    bc_ref: (1, C)            f32
    wh_ref: (C, Cout)         bf16 (objectness + bbox cols, zero-padded to 128)
    bh_ref: (1, Cout)         f32
    o_ref : (1, H, W, Cout)   f32
    """
    H, W, Cout = o_ref.shape[1], o_ref.shape[2], o_ref.shape[3]
    Cin, Cmid = x_ref.shape[3], wc_ref.shape[2]
    acc = jnp.zeros((H * W, Cmid), jnp.float32)
    for k in range(9):
        di, dj = k // 3, k % 3
        patch = x_ref[0, di:di + H, dj:dj + W, :].reshape(H * W, Cin)
        acc = acc + jnp.dot(patch, wc_ref[k], preferred_element_type=jnp.float32)
    t = jnp.maximum(acc + bc_ref[...], 0.0)
    head = jnp.dot(t.astype(jnp.bfloat16), wh_ref[...],
                   preferred_element_type=jnp.float32) + bh_ref[...]
    o_ref[...] = head.reshape(1, H, W, Cout)


def _roi_head_kernel(x_ref, w1_ref, b1_ref, w2_ref, b2_ref, wp_ref, bp_ref,
                     probs_ref, head_ref, *, num_classes):
    """ROI box head fused: fc1+ReLU -> fc2+ReLU -> cls/box predictor -> softmax.

    x_ref : (M, Kpool) bf16 pooled features;  all weights bf16, biases f32.
    probs_ref: (M, 128) f32 class probabilities (cols < num_classes valid)
    head_ref : (M, 128) f32 raw predictor output (cols [nc : 5*nc) = box deltas)
    """
    x = x_ref[...]
    h1 = jnp.dot(x, w1_ref[...], preferred_element_type=jnp.float32) + b1_ref[...]
    h1 = jnp.maximum(h1, 0.0)
    h2 = jnp.dot(h1.astype(jnp.bfloat16), w2_ref[...],
                 preferred_element_type=jnp.float32) + b2_ref[...]
    h2 = jnp.maximum(h2, 0.0)
    head = jnp.dot(h2.astype(jnp.bfloat16), wp_ref[...],
                   preferred_element_type=jnp.float32) + bp_ref[...]
    head_ref[...] = head

    # masked softmax over the first `num_classes` lanes (rest are zero padding)
    lane = jax.lax.broadcasted_iota(jnp.int32, head.shape, 1)
    valid = lane < num_classes
    logits = jnp.where(valid, head, -1e30)
    m = jnp.max(logits, axis=-1, keepdims=True)
    e = jnp.where(valid, jnp.exp(logits - m), 0.0)
    denom = jnp.sum(e, axis=-1, keepdims=True)
    probs_ref[...] = e * pl.reciprocal(denom, approx=True)


_COMPILER_PARAMS = pltpu.CompilerParams(
    dimension_semantics=("parallel",),        # v7x: two TCs split the batch
    vmem_limit_bytes=48 * 1024 * 1024,        # stay under v7x's 64 MiB physical VMEM
)


def backbone_conv(xp, wk, bk):
    """xp: (N, H+2, W+2, Cin) bf16 -> (N, H, W, Cout) f32 features (NHWC)."""
    N, Hp, Wp, Cin = xp.shape
    H, W = Hp - 2, Wp - 2
    Cout = wk.shape[2]
    return pl.pallas_call(
        _backbone_conv_kernel,
        out_shape=jax.ShapeDtypeStruct((N, H, W, Cout), jnp.float32),
        grid=(N,),
        in_specs=[
            pl.BlockSpec((1, Hp, Wp, Cin), lambda n: (n, 0, 0, 0)),
            pl.BlockSpec((9, Cin, Cout), lambda n: (0, 0, 0)),
            pl.BlockSpec((1, Cout), lambda n: (0, 0)),
        ],
        out_specs=pl.BlockSpec((1, H, W, Cout), lambda n: (n, 0, 0, 0)),
        compiler_params=_COMPILER_PARAMS,
    )(xp, wk, bk)


def rpn_head(fp, wc, bc, wh, bh):
    """fp: (N, H+2, W+2, C) bf16 padded features -> (N, H, W, 128) f32 head out."""
    N, Hp, Wp, Cin = fp.shape
    H, W = Hp - 2, Wp - 2
    Cmid, Cout = wc.shape[2], wh.shape[1]
    return pl.pallas_call(
        _rpn_head_kernel,
        out_shape=jax.ShapeDtypeStruct((N, H, W, Cout), jnp.float32),
        grid=(N,),
        in_specs=[
            pl.BlockSpec((1, Hp, Wp, Cin), lambda n: (n, 0, 0, 0)),
            pl.BlockSpec((9, Cin, Cmid), lambda n: (0, 0, 0)),
            pl.BlockSpec((1, Cmid), lambda n: (0, 0)),
            pl.BlockSpec((Cmid, Cout), lambda n: (0, 0)),
            pl.BlockSpec((1, Cout), lambda n: (0, 0)),
        ],
        out_specs=pl.BlockSpec((1, H, W, Cout), lambda n: (n, 0, 0, 0)),
        compiler_params=_COMPILER_PARAMS,
    )(fp, wc, bc, wh, bh)


def roi_head(pooled, w1, b1, w2, b2, wp, bp, num_classes):
    """pooled: (M, Kpool) bf16 -> (probs (M,128) f32, head (M,128) f32)."""
    M = pooled.shape[0]
    Cout = wp.shape[1]
    return pl.pallas_call(
        functools.partial(_roi_head_kernel, num_classes=num_classes),
        out_shape=(jax.ShapeDtypeStruct((M, Cout), jnp.float32),
                   jax.ShapeDtypeStruct((M, Cout), jnp.float32)),
    )(pooled, w1, b1, w2, b2, wp, bp)


# ----------------------------------------------------------------------------
# Glue (small, data-dependent ops) in plain JAX
# ----------------------------------------------------------------------------
_BBOX_CLIP = math.log(1000.0 / 16.0)   # torchvision clamp


def decode_boxes(anchors, deltas):
    w = anchors[..., 2] - anchors[..., 0]
    h = anchors[..., 3] - anchors[..., 1]
    cx = anchors[..., 0] + 0.5 * w
    cy = anchors[..., 1] + 0.5 * h
    ncx = cx + deltas[..., 0] * w
    ncy = cy + deltas[..., 1] * h
    nw = w * jnp.exp(jnp.clip(deltas[..., 2], -_BBOX_CLIP, _BBOX_CLIP))
    nh = h * jnp.exp(jnp.clip(deltas[..., 3], -_BBOX_CLIP, _BBOX_CLIP))
    return jnp.stack(
        [ncx - 0.5 * nw, ncy - 0.5 * nh, ncx + 0.5 * nw, ncy + 0.5 * nh], axis=-1)


def clip_boxes(boxes, hs, ws):
    return jnp.stack(
        [jnp.clip(boxes[..., 0], 0.0, ws), jnp.clip(boxes[..., 1], 0.0, hs),
         jnp.clip(boxes[..., 2], 0.0, ws), jnp.clip(boxes[..., 3], 0.0, hs)], axis=-1)


def roi_pool_nhwc(feat_flat, boxes, H, W, s):
    """feat_flat: (H*W, C); boxes: (P,4) xyxy -> (P, s*s, C).

    Single flattened gather per box (ROIAlign-lite, nearest-neighbor).
    """
    # TODO(synk): a PrefetchScalarGridSpec / manual-DMA row gather could keep the
    # pooled features in VMEM feeding the fused FC head directly.
    def pool_one(box):
        x1, y1, x2, y2 = box[0], box[1], box[2], box[3]
        idx = (jnp.arange(s, dtype=jnp.float32) + 0.5) / s
        gy = y1 + (y2 - y1) * idx
        gx = x1 + (x2 - x1) * idx
        iy = jnp.clip(jnp.floor(gy), 0, H - 1).astype(jnp.int32)
        ix = jnp.clip(jnp.floor(gx), 0, W - 1).astype(jnp.int32)
        flat = (iy[:, None] * W + ix[None, :]).reshape(-1)      # (s*s,)
        return jnp.take(feat_flat, flat, axis=0)                # (s*s, C)

    return jax.vmap(pool_one)(boxes)


# ----------------------------------------------------------------------------
# GeneralizedRCNN (eval mode)
# ----------------------------------------------------------------------------
class GeneralizedRCNN:
    CPAD = 128       # lane-dense channel / hidden padding
    CIN_PAD = 8      # padded image channels (sublane friendly)

    def __init__(self, key, *, in_channels=3, backbone_channels=32,
                 anchor_sizes=(4.0, 8.0, 16.0), pre_nms_top_n=8,
                 roi_output_size=4, representation_size=64, num_classes=5,
                 n_testtime_augmentations=0):
        self.anchor_sizes = anchor_sizes
        self.pre_nms_top_n = pre_nms_top_n
        self.roi_output_size = roi_output_size
        self.num_classes = num_classes
        self.n_testtime_augmentations = n_testtime_augmentations
        self.training = False  # eval-mode forward (returns detections)
        self.in_channels = in_channels
        self.backbone_channels = backbone_channels

        ks = jax.random.split(key, 8)

        def w(k, shape, scale=0.05):
            return scale * jax.random.normal(k, shape, jnp.float32)

        # transform params (GeneralizedRCNNTransform)
        self.image_mean = jnp.array([0.485, 0.456, 0.406], jnp.float32)
        self.image_std = jnp.array([0.229, 0.224, 0.225], jnp.float32)

        C, A, P128 = backbone_channels, len(anchor_sizes), self.CPAD
        s, rep = roi_output_size, representation_size
        self.num_anchors = A

        # --- backbone: 3x3 conv + ReLU, normalization folded in -------------
        bw = w(ks[0], (C, in_channels, 3, 3))                  # (Cout,Cin,3,3)
        bb = jnp.zeros((C,), jnp.float32)
        inv_std = 1.0 / self.image_std
        bw_fold = bw * inv_std[None, :, None, None]
        bb_fold = bb - (bw * (self.image_mean * inv_std)[None, :, None, None]).sum((1, 2, 3))
        wk = jnp.zeros((9, self.CIN_PAD, P128), jnp.float32)
        wk = wk.at[:, :in_channels, :C].set(
            bw_fold.transpose(2, 3, 1, 0).reshape(9, in_channels, C))
        self.backbone_wk = wk.astype(jnp.bfloat16)
        self.backbone_bk = jnp.zeros((1, P128), jnp.float32).at[0, :C].set(bb_fold)

        # --- rpn: 3x3 conv + fused (objectness | bbox) 1x1 head -------------
        rw = w(ks[1], (C, C, 3, 3))
        wc = jnp.zeros((9, P128, P128), jnp.float32)
        wc = wc.at[:, :C, :C].set(rw.transpose(2, 3, 1, 0).reshape(9, C, C))
        self.rpn_conv_wk = wc.astype(jnp.bfloat16)
        self.rpn_conv_bk = jnp.zeros((1, P128), jnp.float32)
        cls_w = w(ks[2], (A, C))                               # objectness
        bbox_w = w(ks[3], (4 * A, C))                          # bbox deltas
        wh = jnp.zeros((P128, P128), jnp.float32)
        wh = wh.at[:C, :A].set(cls_w.T)
        wh = wh.at[:C, A:5 * A].set(bbox_w.T)
        self.rpn_head_wk = wh.astype(jnp.bfloat16)
        self.rpn_head_bk = jnp.zeros((1, P128), jnp.float32)

        # --- roi heads: fc1 -> fc2 -> (cls | box) predictor ------------------
        kpool = s * s * P128       # pooled channel axis is the padded 128 lanes
        w1 = jnp.zeros((kpool, P128), jnp.float32).at[:, :rep].set(w(ks[4], (kpool, rep)))
        w2 = jnp.zeros((P128, P128), jnp.float32).at[:rep, :rep].set(w(ks[5], (rep, rep)))
        wp = jnp.zeros((P128, P128), jnp.float32)
        wp = wp.at[:rep, :num_classes].set(w(ks[6], (rep, num_classes)))
        wp = wp.at[:rep, num_classes:5 * num_classes].set(w(ks[7], (rep, 4 * num_classes)))
        self.fc1_w, self.fc1_b = w1.astype(jnp.bfloat16), jnp.zeros((1, P128), jnp.float32)
        self.fc2_w, self.fc2_b = w2.astype(jnp.bfloat16), jnp.zeros((1, P128), jnp.float32)
        self.pred_w, self.pred_b = wp.astype(jnp.bfloat16), jnp.zeros((1, P128), jnp.float32)

    # ---------------------- sub-modules ----------------------
    def _rpn(self, features, image_sizes):
        N, H, W, _ = features.shape
        A = self.num_anchors
        fp = jnp.pad(features, ((0, 0), (1, 1), (1, 1), (0, 0))).astype(jnp.bfloat16)
        head = rpn_head(fp, self.rpn_conv_wk, self.rpn_conv_bk,
                        self.rpn_head_wk, self.rpn_head_bk)        # (N,H,W,128)

        scores = head[..., :A].reshape(N, H * W * A)
        deltas = head[..., A:5 * A].reshape(N, H * W * A, 4)

        # anchors (H*W*A, 4), centered square anchors
        ys = jnp.arange(H, dtype=jnp.float32) + 0.5
        xs = jnp.arange(W, dtype=jnp.float32) + 0.5
        cy, cx = jnp.meshgrid(ys, xs, indexing="ij")
        half = jnp.asarray(self.anchor_sizes, jnp.float32) / 2.0
        anchors = jnp.stack(
            [cx[..., None] - half, cy[..., None] - half,
             cx[..., None] + half, cy[..., None] + half], axis=-1
        ).reshape(H * W * A, 4)

        boxes = decode_boxes(anchors[None], deltas)
        Hs, Ws = image_sizes[0]
        boxes = clip_boxes(boxes, float(Hs), float(Ws))

        # TODO(synk): RPN NMS has no clean Pallas equivalent; top-k pre-selection only.
        top_scores, top_idx = jax.lax.top_k(scores, self.pre_nms_top_n)
        proposals = jnp.take_along_axis(boxes, top_idx[..., None], axis=1)  # (N, P, 4)
        return proposals, {}

    def _roi_heads(self, features, proposals, image_sizes):
        N, H, W, Cpad = features.shape
        P, s = proposals.shape[1], self.roi_output_size
        feat_flat = features.reshape(N, H * W, Cpad)
        pooled = jax.vmap(lambda f, b: roi_pool_nhwc(f, b, H, W, s))(feat_flat, proposals)
        pooled = pooled.reshape(N * P, s * s * Cpad).astype(jnp.bfloat16)

        probs, head = roi_head(pooled, self.fc1_w, self.fc1_b, self.fc2_w, self.fc2_b,
                               self.pred_w, self.pred_b, self.num_classes)

        nc = self.num_classes
        fg = probs[:, 1:nc]                                    # drop background
        labels = jnp.argmax(fg, axis=-1).astype(jnp.int32) + 1
        scores = jnp.max(fg, axis=-1)

        box_deltas = head[:, nc:5 * nc].reshape(N * P, nc, 4)
        sel_deltas = jnp.take_along_axis(
            box_deltas, labels[:, None, None], axis=1)[:, 0]
        boxes = decode_boxes(proposals.reshape(N * P, 4), sel_deltas)
        Hs, Ws = image_sizes[0]
        boxes = clip_boxes(boxes, float(Hs), float(Ws))

        # TODO(synk): per-class NMS / score threshold / batched_nms flag omitted.
        boxes = boxes.reshape(N, P, 4)
        labels = labels.reshape(N, P)
        scores = scores.reshape(N, P)
        detections = [{"boxes": boxes[i], "labels": labels[i], "scores": scores[i]}
                      for i in range(N)]
        return detections, {}

    # ---------------------- forward ----------------------
    def __call__(self, images, targets=None):
        # eval mode: targets unused; _check_for_degenerate_boxes(None) is a no-op.
        original_image_sizes = [(int(img.shape[-2]), int(img.shape[-1])) for img in images]
        x = jnp.stack([jnp.asarray(img) for img in images], axis=0)   # (N, C, H, W)
        N, C, H, W = x.shape
        image_sizes = [(H, W)] * N

        # transform (normalize) is folded into the backbone conv: fill the conv
        # border with the per-channel mean so "normalize -> zero-pad -> conv"
        # is reproduced exactly; no standalone normalization pass.
        x_nhwc = jnp.transpose(x, (0, 2, 3, 1)).astype(jnp.float32)
        fill = jnp.zeros((N, H + 2, W + 2, self.CIN_PAD), jnp.float32)
        fill = fill.at[..., :C].set(self.image_mean[None, None, None, :])
        xp = fill.at[:, 1:H + 1, 1:W + 1, :C].set(x_nhwc).astype(jnp.bfloat16)

        # backbone (single NHWC feature map; OrderedDict([('0', features)]) semantics)
        features = backbone_conv(xp, self.backbone_wk, self.backbone_bk)  # (N,H,W,128)

        # rpn
        proposals, proposal_losses = self._rpn(features, image_sizes)

        # roi heads (n_testtime_augmentations == 0 -> _cprobabs is None)
        detections, detector_losses = self._roi_heads(features, proposals, image_sizes)

        # transform.postprocess: rescale boxes back to original image sizes
        results = []
        for i, det in enumerate(detections):
            rh = original_image_sizes[i][0] / image_sizes[i][0]
            rw = original_image_sizes[i][1] / image_sizes[i][1]
            scale = jnp.array([rw, rh, rw, rh], jnp.float32)
            det = dict(det)
            det["boxes"] = det["boxes"] * scale
            results.append(det)

        losses = {}
        losses.update(detector_losses)
        losses.update(proposal_losses)
        # eager_outputs: eval mode -> detections
        return results


if __name__ == "__main__":
    key = jax.random.PRNGKey(0)
    k_model, k_img = jax.random.split(key)

    model = GeneralizedRCNN(k_model)

    # list of images (PyTorch NCHW per-image layout), batch=2, 3x16x16
    imgs = jax.random.uniform(k_img, (2, 3, 16, 16), jnp.float32)
    images = [imgs[i] for i in range(imgs.shape[0])]

    detections = model(images)
    for det in detections:
        jax.block_until_ready(det["boxes"])
        jax.block_until_ready(det["labels"])
        jax.block_until_ready(det["scores"])

    assert detections[0]["boxes"].shape == (8, 4)
    assert detections[0]["scores"].shape == (8,)
    assert detections[0]["labels"].shape == (8,)
    assert bool(jnp.all(jnp.isfinite(detections[0]["boxes"])))
    print("KERNEL_OK")
</pallas_src>

<mosaic_0001>
module attributes {stable_mosaic.version = 11 : i64} {
  func.func @_backbone_conv_kernel(%arg0: i32, %arg1: memref<1x18x18x8xbf16, #tpu.memory_space<vmem>>, %arg2: memref<9x8x128xbf16, #tpu.memory_space<vmem>>, %arg3: memref<1x128xf32, #tpu.memory_space<vmem>>, %arg4: memref<1x16x16x128xf32, #tpu.memory_space<vmem>>) attributes {dimension_semantics = [#tpu.dimension_semantics<parallel>], iteration_bounds = array<i64: 2>, scalar_prefetch = 0 : i64, scratch_operands = 0 : i64, tpu.core_type = #tpu.core_type<tc>, window_params = [{transform_indices = @transform_0, window_bounds = array<i64: 1, 18, 18, 8>}, {pipeline_mode = #tpu.pipeline_mode<synchronous>, transform_indices = @transform_1, window_bounds = array<i64: 9, 8, 128>}, {pipeline_mode = #tpu.pipeline_mode<synchronous>, transform_indices = @transform_2, window_bounds = array<i64: 1, 128>}, {transform_indices = @transform_3, window_bounds = array<i64: 1, 16, 16, 128>}]} {
    %cst = arith.constant 0.000000e+00 : f32
    %0 = vector.broadcast %cst : f32 to vector<256x128xf32>
    %c0 = arith.constant 0 : index
    %c0_0 = arith.constant 0 : index
    %c0_1 = arith.constant 0 : index
    %c0_2 = arith.constant 0 : index
    %1 = vector.load %arg1[%c0, %c0_0, %c0_1, %c0_2] : memref<1x18x18x8xbf16, #tpu.memory_space<vmem>>, vector<1x16x16x8xbf16>
    %2 = vector.shape_cast %1 : vector<1x16x16x8xbf16> to vector<16x16x8xbf16>
    %3 = vector.shape_cast %2 : vector<16x16x8xbf16> to vector<256x8xbf16>
    %c0_3 = arith.constant 0 : index
    %c0_4 = arith.constant 0 : index
    %c0_5 = arith.constant 0 : index
    %4 = vector.load %arg2[%c0_3, %c0_4, %c0_5] : memref<9x8x128xbf16, #tpu.memory_space<vmem>>, vector<1x8x128xbf16>
    %5 = vector.shape_cast %4 : vector<1x8x128xbf16> to vector<8x128xbf16>
    %cst_6 = arith.constant dense<0.000000e+00> : vector<256x128xf32>
    %6 = tpu.matmul %3, %5, %cst_6 {dimension_numbers = #tpu.dot_dimension_numbers<[1], [0], [0], [1], [0, 0, 1, 1], [], []>} : vector<256x8xbf16>, vector<8x128xbf16>, vector<256x128xf32> -> vector<256x128xf32>
    %7 = arith.addf %0, %6 : vector<256x128xf32>
    %c0_7 = arith.constant 0 : index
    %c0_8 = arith.constant 0 : index
    %c1 = arith.constant 1 : index
    %c0_9 = arith.constant 0 : index
    %8 = vector.load %arg1[%c0_7, %c0_8, %c1, %c0_9] : memref<1x18x18x8xbf16, #tpu.memory_space<vmem>>, vector<1x16x16x8xbf16>
    %9 = vector.shape_cast %8 : vector<1x16x16x8xbf16> to vector<16x16x8xbf16>
    %10 = vector.shape_cast %9 : vector<16x16x8xbf16> to vector<256x8xbf16>
    %c1_10 = arith.constant 1 : index
    %c0_11 = arith.constant 0 : index
    %c0_12 = arith.constant 0 : index
    %11 = vector.load %arg2[%c1_10, %c0_11, %c0_12] : memref<9x8x128xbf16, #tpu.memory_space<vmem>>, vector<1x8x128xbf16>
    %12 = vector.shape_cast %11 : vector<1x8x128xbf16> to vector<8x128xbf16>
    %cst_13 = arith.constant dense<0.000000e+00> : vector<256x128xf32>
    %13 = tpu.matmul %10, %12, %cst_13 {dimension_numbers = #tpu.dot_dimension_numbers<[1], [0], [0], [1], [0, 0, 1, 1], [], []>} : vector<256x8xbf16>, vector<8x128xbf16>, vector<256x128xf32> -> vector<256x128xf32>
    %14 = arith.addf %7, %13 : vector<256x128xf32>
    %c0_14 = arith.constant 0 : index
    %c0_15 = arith.constant 0 : index
    %c2 = arith.constant 2 : index
    %c0_16 = arith.constant 0 : index
    %15 = vector.load %arg1[%c0_14, %c0_15, %c2, %c0_16] : memref<1x18x18x8xbf16, #tpu.memory_space<vmem>>, vector<1x16x16x8xbf16>
    %16 = vector.shape_cast %15 : vector<1x16x16x8xbf16> to vector<16x16x8xbf16>
    %17 = vector.shape_cast %16 : vector<16x16x8xbf16> to vector<256x8xbf16>
    %c2_17 = arith.constant 2 : index
    %c0_18 = arith.constant 0 : index
    %c0_19 = arith.constant 0 : index
    %18 = vector.load %arg2[%c2_17, %c0_18, %c0_19] : memref<9x8x128xbf16, #tpu.memory_space<vmem>>, vector<1x8x128xbf16>
    %19 = vector.shape_cast %18 : vector<1x8x128xbf16> to vector<8x128xbf16>
    %cst_20 = arith.constant dense<0.000000e+00> : vector<256x128xf32>
    %20 = tpu.matmul %17, %19, %cst_20 {dimension_numbers = #tpu.dot_dimension_numbers<[1], [0], [0], [1], [0, 0, 1, 1], [], []>} : vector<256x8xbf16>, vector<8x128xbf16>, vector<256x128xf32> -> vector<256x128xf32>
    %21 = arith.addf %14, %20 : vector<256x128xf32>
    %c0_21 = arith.constant 0 : index
    %c1_22 = arith.constant 1 : index
    %c0_23 = arith.constant 0 : index
    %c0_24 = arith.constant 0 : index
    %22 = vector.load %arg1[%c0_21, %c1_22, %c0_23, %c0_24] : memref<1x18x18x8xbf16, #tpu.memory_space<vmem>>, vector<1x16x16x8xbf16>
    %23 = vector.shape_cast %22 : vector<1x16x16x8xbf16> to vector<16x16x8xbf16>
    %24 = vector.shape_cast %23 : vector<16x16x8xbf16> to vector<256x8xbf16>
    %c3 = arith.constant 3 : index
    %c0_25 = arith.constant 0 : index
    %c0_26 = arith.constant 0 : index
    %25 = vector.load %arg2[%c3, %c0_25, %c0_26] : memref<9x8x128xbf16, #tpu.memory_space<vmem>>, vector<1x8x128xbf16>
    %26 = vector.shape_cast %25 : vector<1x8x128xbf16> to vector<8x128xbf16>
    %cst_27 = arith.constant dense<0.000000e+00> : vector<256x128xf32>
    %27 = tpu.matmul %24, %26, %cst_27 {dimension_numbers = #tpu.dot_dimension_numbers<[1], [0], [0], [1], [0, 0, 1, 1], [], []>} : vector<256x8xbf16>, vector<8x128xbf16>, vector<256x128xf32> -> vector<256x128xf32>
    %28 = arith.addf %21, %27 : vector<256x128xf32>
    %c0_28 = arith.constant 0 : index
    %c1_29 = arith.constant 1 : index
    %c1_30 = arith.constant 1 : index
    %c0_31 = arith.constant 0 : index
    %29 = vector.load %arg1[%c0_28, %c1_29, %c1_30, %c0_31] : memref<1x18x18x8xbf16, #tpu.memory_space<vmem>>, vector<1x16x16x8xbf16>
    %30 = vector.shape_cast %29 : vector<1x16x16x8xbf16> to vector<16x16x8xbf16>
    %31 = vector.shape_cast %30 : vector<16x16x8xbf16> to vector<256x8xbf16>
    %c4 = arith.constant 4 : index
    %c0_32 = arith.constant 0 : index
    %c0_33 = arith.constant 0 : index
    %32 = vector.load %arg2[%c4, %c0_32, %c0_33] : memref<9x8x128xbf16, #tpu.memory_space<vmem>>, vector<1x8x128xbf16>
    %33 = vector.shape_cast %32 : vector<1x8x128xbf16> to vector<8x128xbf16>
    %cst_34 = arith.constant dense<0.000000e+00> : vector<256x128xf32>
    %34 = tpu.matmul %31, %33, %cst_34 {dimension_numbers = #tpu.dot_dimension_numbers<[1], [0], [0], [1], [0, 0, 1, 1], [], []>} : vector<256x8xbf16>, vector<8x128xbf16>, vector<256x128xf32> -> vector<256x128xf32>
    %35 = arith.addf %28, %34 : vector<256x128xf32>
    %c0_35 = arith.constant 0 : index
    %c1_36 = arith.constant 1 : index
    %c2_37 = arith.constant 2 : index
    %c0_38 = arith.constant 0 : index
    %36 = vector.load %arg1[%c0_35, %c1_36, %c2_37, %c0_38] : memref<1x18x18x8xbf16, #tpu.memory_space<vmem>>, vector<1x16x16x8xbf16>
    %37 = vector.shape_cast %36 : vector<1x16x16x8xbf16> to vector<16x16x8xbf16>
    %38 = vector.shape_cast %37 : vector<16x16x8xbf16> to vector<256x8xbf16>
    %c5 = arith.constant 5 : index
    %c0_39 = arith.constant 0 : index
    %c0_40 = arith.constant 0 : index
    %39 = vector.load %arg2[%c5, %c0_39, %c0_40] : memref<9x8x128xbf16, #tpu.memory_space<vmem>>, vector<1x8x128xbf16>
    %40 = vector.shape_cast %39 : vector<1x8x128xbf16> to vector<8x128xbf16>
    %cst_41 = arith.constant dense<0.000000e+00> : vector<256x128xf32>
    %41 = tpu.matmul %38, %40, %cst_41 {dimension_numbers = #tpu.dot_dimension_numbers<[1], [0], [0], [1], [0, 0, 1, 1], [], []>} : vector<256x8xbf16>, vector<8x128xbf16>, vector<256x128xf32> -> vector<256x128xf32>
    %42 = arith.addf %35, %41 : vector<256x128xf32>
    %c0_42 = arith.constant 0 : index
    %c2_43 = arith.constant 2 : index
    %c0_44 = arith.constant 0 : index
    %c0_45 = arith.constant 0 : index
    %43 = vector.load %arg1[%c0_42, %c2_43, %c0_44, %c0_45] : memref<1x18x18x8xbf16, #tpu.memory_space<vmem>>, vector<1x16x16x8xbf16>
    %44 = vector.shape_cast %43 : vector<1x16x16x8xbf16> to vector<16x16x8xbf16>
    %45 = vector.shape_cast %44 : vector<16x16x8xbf16> to vector<256x8xbf16>
    %c6 = arith.constant 6 : index
    %c0_46 = arith.constant 0 : index
    %c0_47 = arith.constant 0 : index
    %46 = vector.load %arg2[%c6, %c0_46, %c0_47] : memref<9x8x128xbf16, #tpu.memory_space<vmem>>, vector<1x8x128xbf16>
    %47 = vector.shape_cast %46 : vector<1x8x128xbf16> to vector<8x128xbf16>
    %cst_48 = arith.constant dense<0.000000e+00> : vector<256x128xf32>
    %48 = tpu.matmul %45, %47, %cst_48 {dimension_numbers = #tpu.dot_dimension_numbers<[1], [0], [0], [1], [0, 0, 1, 1], [], []>} : vector<256x8xbf16>, vector<8x128xbf16>, vector<256x128xf32> -> vector<256x128xf32>
    %49 = arith.addf %42, %48 : vector<256x128xf32>
    %c0_49 = arith.constant 0 : index
    %c2_50 = arith.constant 2 : index
    %c1_51 = arith.constant 1 : index
    %c0_52 = arith.constant 0 : index
    %50 = vector.load %arg1[%c0_49, %c2_50, %c1_51, %c0_52] : memref<1x18x18x8xbf16, #tpu.memory_space<vmem>>, vector<1x16x16x8xbf16>
    %51 = vector.shape_cast %50 : vector<1x16x16x8xbf16> to vector<16x16x8xbf16>
    %52 = vector.shape_cast %51 : vector<16x16x8xbf16> to vector<256x8xbf16>
    %c7 = arith.constant 7 : index
    %c0_53 = arith.constant 0 : index
    %c0_54 = arith.constant 0 : index
    %53 = vector.load %arg2[%c7, %c0_53, %c0_54] : memref<9x8x128xbf16, #tpu.memory_space<vmem>>, vector<1x8x128xbf16>
    %54 = vector.shape_cast %53 : vector<1x8x128xbf16> to vector<8x128xbf16>
    %cst_55 = arith.constant dense<0.000000e+00> : vector<256x128xf32>
    %55 = tpu.matmul %52, %54, %cst_55 {dimension_numbers = #tpu.dot_dimension_numbers<[1], [0], [0], [1], [0, 0, 1, 1], [], []>} : vector<256x8xbf16>, vector<8x128xbf16>, vector<256x128xf32> -> vector<256x128xf32>
    %56 = arith.addf %49, %55 : vector<256x128xf32>
    %c0_56 = arith.constant 0 : index
    %c2_57 = arith.constant 2 : index
    %c2_58 = arith.constant 2 : index
    %c0_59 = arith.constant 0 : index
    %57 = vector.load %arg1[%c0_56, %c2_57, %c2_58, %c0_59] : memref<1x18x18x8xbf16, #tpu.memory_space<vmem>>, vector<1x16x16x8xbf16>
    %58 = vector.shape_cast %57 : vector<1x16x16x8xbf16> to vector<16x16x8xbf16>
    %59 = vector.shape_cast %58 : vector<16x16x8xbf16> to vector<256x8xbf16>
    %c8 = arith.constant 8 : index
    %c0_60 = arith.constant 0 : index
    %c0_61 = arith.constant 0 : index
    %60 = vector.load %arg2[%c8, %c0_60, %c0_61] : memref<9x8x128xbf16, #tpu.memory_space<vmem>>, vector<1x8x128xbf16>
    %61 = vector.shape_cast %60 : vector<1x8x128xbf16> to vector<8x128xbf16>
    %cst_62 = arith.constant dense<0.000000e+00> : vector<256x128xf32>
    %62 = tpu.matmul %59, %61, %cst_62 {dimension_numbers = #tpu.dot_dimension_numbers<[1], [0], [0], [1], [0, 0, 1, 1], [], []>} : vector<256x8xbf16>, vector<8x128xbf16>, vector<256x128xf32> -> vector<256x128xf32>
    %63 = arith.addf %56, %62 : vector<256x128xf32>
    %c0_63 = arith.constant 0 : index
    %c0_64 = arith.constant 0 : index
    %64 = vector.load %arg3[%c0_63, %c0_64] : memref<1x128xf32, #tpu.memory_space<vmem>>, vector<1x128xf32>
    %65 = vector.broadcast %64 : vector<1x128xf32> to vector<256x128xf32>
    %66 = arith.addf %63, %65 : vector<256x128xf32>
    %cst_65 = arith.constant 0.000000e+00 : f32
    %67 = vector.broadcast %cst_65 : f32 to vector<256x128xf32>
    %68 = arith.maximumf %66, %67 : vector<256x128xf32>
    %69 = vector.shape_cast %68 : vector<256x128xf32> to vector<1x16x16x128xf32>
    %c0_66 = arith.constant 0 : index
    %c0_67 = arith.constant 0 : index
    %c0_68 = arith.constant 0 : index
    %c0_69 = arith.constant 0 : index
    %70 = vector.load %arg4[%c0_66, %c0_67, %c0_68, %c0_69] : memref<1x16x16x128xf32, #tpu.memory_space<vmem>>, vector<1x16x16x128xf32>
    tpu.vector_store %arg4[%c0_66, %c0_67, %c0_68, %c0_69], %69 {strides = array<i32>} : memref<1x16x16x128xf32, #tpu.memory_space<vmem>>, vector<1x16x16x128xf32>,
    return
  }
  func.func @transform_0(%arg0: i32) -> (i32, i32, i32, i32) {
    %c0_i32 = arith.constant 0 : i32
    %c0_i32_0 = arith.constant 0 : i32
    %c0_i32_1 = arith.constant 0 : i32
    %c0_i32_2 = arith.constant 0 : i32
    return %arg0, %c0_i32, %c0_i32_0, %c0_i32_1 : i32, i32, i32, i32
  }
  func.func @transform_1(%arg0: i32) -> (i32, i32, i32) {
    %c0_i32 = arith.constant 0 : i32
    %c0_i32_0 = arith.constant 0 : i32
    %c0_i32_1 = arith.constant 0 : i32
    %c0_i32_2 = arith.constant 0 : i32
    return %c0_i32, %c0_i32_0, %c0_i32_1 : i32, i32, i32
  }
  func.func @transform_2(%arg0: i32) -> (i32, i32) {
    %c0_i32 = arith.constant 0 : i32
    %c0_i32_0 = arith.constant 0 : i32
    %c0_i32_1 = arith.constant 0 : i32
    return %c0_i32, %c0_i32_0 : i32, i32
  }
  func.func @transform_3(%arg0: i32) -> (i32, i32, i32, i32) {
    %c0_i32 = arith.constant 0 : i32
    %c0_i32_0 = arith.constant 0 : i32
    %c0_i32_1 = arith.constant 0 : i32
    %c0_i32_2 = arith.constant 0 : i32
    return %arg0, %c0_i32, %c0_i32_0, %c0_i32_1 : i32, i32, i32, i32
  }
}

</mosaic_0001>

<bundles_post_ra>
// kernel: tpu_custom_call.1
= control target key start
LH: loop header
LB: loop body
LE: loop exit
PB: predicated region body
PF: predicated region fallthrough
CT: control target
= control target key end

     0   :  { %8 = vsyncpa [#allocation3], 0  ;;  %s6556_s0 = inlined_call_operand.vmem [shape: bf16[2,18,18,8], index: 0, kind: input, shape index: {}]   ;;  %s6557_s1 = inlined_call_operand.vmem [shape: bf16[9,8,128], index: 1, kind: input, shape index: {}]   ;;  %s6558_s2 = inlined_call_operand.vmem [shape: f32[1,128], index: 2, kind: input, shape index: {}]   ;;  %s6559_s3 = inlined_call_operand.hbm [shape: f32[2,16,16,128], index: 3, kind: output, shape index: {}]  }
   0x1   :  { %10 = vsyncpa [#allocation3 + $0x1], 0  ;;  %s5086_s12 = smov 0   ;;  %s5088_s13 = smov 0  }
   0x2   :  { %s5090_s14 = smov 0   ;;  %s5092_s15 = smov 0  }
   0x3 LB: > { %s5107_s16 = sadd.s32 4294967295, %s5062_s15   ;;  %s4259_s17 = sadd.s32 4294967294, %s5062_s15   ;;  %s5062_s15 = sphi %s5092_s15, %s6575_s15   ;;  %s5058_s14 = sphi %s5090_s14, %s6574_s14   ;;  %s5054_s13 = sphi %s5088_s13, %s6573_s13   ;;  %s5050_s12 = sphi %s5086_s12, %s6572_s12  }
   0x4   : > { %s5111_s18 = sadd.s32 1, %s5062_s15   ;;  %s91_s19 = sadd.s32 1, %s5058_s14 }
   0x5   : > { %s88_s20 = ssub.s32 %s5062_s15, %s5111_s18  ;;  %p101_p0 = scmp.ne.s32.totalorder %s5058_s14, %s5054_s13 }
   0x6   : > { %p89_p1 = scmp.eq.s32.totalorder %s88_s20, 0  ;;  %p102_p2 = scmp.eq.s32.totalorder %s5107_s16, 1 }
   0x7   : > { %p107_p3 = scmp.ne.s32.totalorder %s5054_s13, %s5050_s12  ;;  %p108_p4 = scmp.eq.s32.totalorder %s4259_s17, 1 }
   0x8   : > { %s5122_s21 = scalar_select %p89_p1, %s5058_s14, %s91_s19  }
   0x9   : > { %p5124_p5 = por %p102_p2, %p101_p0  ;;  %p5128_p6 = por %p108_p4, %p107_p3 }
   0xa   : > { %p4262_p7 = scmp.ge.s32.totalorder %s5062_s15, 1  ;;  %p140_p8 = scmp.lt.s32.totalorder %s5062_s15, 3 }
   0xc   : > { %p141_p9 = pnand %p4262_p7, %p140_p8 }
   0xe   : > { %144 = sbr.rel (%p141_p9) target bundleno = 770 (0x302), region = 32 }
  0x13   : > { %v4265_v0 = vld [vmem:[%s6557_s1 + $0x4] sm:$0xf]  ;;  %vm705_vm0 = vcmask 1043456   ;;  %p164_p10 = scmp.lt.s32.totalorder %s5107_s16, 1  ;;  %v4378_v2 = vld [vmem:[%s6557_s1 + $0x8] sm:$0xf] }
  0x14   : > { %v707_v1 = vsel %vm705_vm0, %v4265_v0, 0  ;;  %v1280_v3 = vsel %vm705_vm0, %v4378_v2, 0  ;;  %v4427_v4 = vld [vmem:[%s6557_s1 + $0xc] sm:$0xf]  ;;  %v202_v5 = vld [vmem:[%s6557_s1] sm:$0xf] }
  0x15   : > { %4903 = vmatpush.bf16.msra.mxu1 %v707_v1  ;;  %4904 = vmatpush.bf16.msra.mxu2 %v707_v1  ;;  %s165_s28 = scalar_select %p164_p10, %s5107_s16, 1  ;;  %v4556_v6 = vld [vmem:[%s6557_s1 + $0x10] sm:$0xf]  ;;  %v1567_v7 = vsel %vm705_vm0, %v4427_v4, 0  ;;  %v927_v8 = vsel %vm705_vm0, %v202_v5, 0  ;;  %vm656_vm4 = vcmask 64512  }
  0x16   : > { %4905 = vmatpush.bf16.msra.mxu3 %v707_v1  ;;  %716 = vmatpush.bf16.msra.mxu0 %v707_v1  ;;  %v2221_v9 = vsel %vm705_vm0, %v4556_v6, 0  ;;  %vm219_vm1 = vsmask.f32 3328  ;;  %vm220_vm2 = vsmask.f32 7440  ;;  %vm1066_vm5 = vcmask 1042432  }
  0x17   : > { %s4906_s8 = smul.u32 216, %s165_s28  ;;  %vm5171_vm3 = vmor %vm219_vm1, %vm220_vm2  ;;  %vm1067_vm6 = vcmask 1046532   ;;  %s161_s29 = sand.u32 1, %s5054_s13  }
  0x18   : > { %vm5345_vm7 = vmor %vm1066_vm5, %vm1067_vm6  ;;  %s4263_s5 = sshll.u32 %s161_s29, 8  ;;  %s4902_s9 = sshll.u32 %s5107_s16, 8 }
  0x19   : > { %1289 = vmatpush.bf16.msrb.mxu2 %v1280_v3  ;;  %936 = vmatpush.bf16.msrb.mxu1 %v927_v8  ;;  %s5159_s11 = scalar_lea.vmem %s6556_s0, %s4906_s8  ;;  %s6229_s6 = scalar_lea.vmem [#allocation2], %s4263_s5 }
  0x1a   : > { %1576 = vmatpush.bf16.msrb.mxu3 %v1567_v7  ;;  %2230 = vmatpush.bf16.msrb.mxu0 %v2221_v9  ;;  %v178_v10 = vld [vmem:[%s5159_s11 + $0x30] sm:$0xf]  ;;  %v179_v11 = vld [vmem:[%s5159_s11 + $0x34] sm:$0xf]  ;;  %v207_v12 = vld [vmem:[%s5159_s11 + $0x38] sm:$0x1]  ;;  %s4193_s17 = scalar_lea.hbm %s6559_s3, %s4902_s9 }
  0x1b   : > { %v319_v13 = vshrl.u32 %v178_v10, 16  ;;  %v322_v14 = vshll.u32 %v178_v10, 16  ;;  %v328_v15 = vshll.u32 %v179_v11, 16  ;;  %v332_v16 = vshrl.u32 %v179_v11, 16  ;;  %v186_v17 = vld [vmem:[%s5159_s11 + $0x60] sm:$0xf] }
  0x1c   : > { %v338_v18 = vshll.u32 %v207_v12, 16  ;;  %v187_v19 = vld [vmem:[%s5159_s11 + $0x64] sm:$0xf]  ;;  %v211_v20 = vld [vmem:[%s5159_s11 + $0x68] sm:$0x1]  ;;  %v415_v21 = vshrl.u32 %v186_v17, 16 }
  0x1d   : > { %v321_v22 = vrot.slane %v319_v13, 4  ;;  %v324_v23 = vrot.slane %v322_v14, 5  ;;  %v330_v24 = vrot.slane %v328_v15, 5  ;;  %v334_v25 = vrot.slane %v332_v16, 4  ;;  %v194_v26 = vld [vmem:[%s5159_s11 + $0x90] sm:$0xf] }
  0x1e   : > { %v340_v27 = vrot.slane %v338_v18, 5  ;;  %v417_v28 = vrot.slane %v415_v21, 4  ;;  %v418_v29 = vshll.u32 %v186_v17, 16  ;;  %v424_v30 = vshll.u32 %v187_v19, 16  ;;  %v195_v35 = vld [vmem:[%s5159_s11 + $0x94] sm:$0xf] }
  0x1f   : > { %v325_v31 = vor.u32 %v324_v23, %v321_v22  ;;  %v335_v32 = vor.u32 %v334_v25, %v330_v24  ;;  %v428_v33 = vshrl.u32 %v187_v19, 16  ;;  %v434_v34 = vshll.u32 %v211_v20, 16  ;;  %v215_v45 = vld [vmem:[%s5159_s11 + $0x98] sm:$0x1]  ;;  %v170_v61 = vld [vmem:[%s5159_s11] sm:$0xf] }
  0x20   : > { %v420_v37 = vrot.slane %v418_v29, 5  ;;  %v426_v38 = vrot.slane %v424_v30, 5  ;;  %v511_v39 = vshrl.u32 %v194_v26, 16  ;;  %v514_v47 = vshll.u32 %v194_v26, 16  ;;  %v5184_v1 = vld [vmem:[%s5159_s11 + $0x4] sm:$0xf] }
  0x21   : > { %v326_v40 = vrot.slane %v325_v31, 4  ;;  %v336_v41 = vrot.slane %v335_v32, 4  ;;  %v430_v42 = vrot.slane %v428_v33, 4  ;;  %v436_v43 = vrot.slane %v434_v34, 5  ;;  %v5187_v2 = vld [vmem:[%s5159_s11 + $0x8] sm:$0x1] }
  0x22   : > { %v421_v44 = vor.u32 %v420_v37, %v417_v28  ;;  %v513_v46 = vrot.slane %v511_v39, 4  ;;  %v520_v48 = vshll.u32 %v195_v35, 16  ;;  %v524_v52 = vshrl.u32 %v195_v35, 16  ;;  %v180_v19 = vld [vmem:[%s5159_s11 + $0x3c] sm:$0xf]  ;;  %s4194_s19 = sshll.u32 %s6229_s6, 4  ;;  %s4195_s19 = int_to_ptr.vmem [resolvable:$true] %s4194_s19 }
  0x23   : > { %v331_v49 = vsel %vm5171_vm3, %v326_v40, %v330_v24  ;;  %v341_v50 = vsel %vm5171_vm3, %v336_v41, %v340_v27  ;;  %v431_v51 = vor.u32 %v430_v42, %v426_v38  ;;  %v516_v56 = vrot.slane %v514_v47, 5  ;;  %v5199_v20 = vld [vmem:[%s5159_s11 + $0x40] sm:$0xf]  ;;  %v5204_v25 = vld [vmem:[%s5159_s11 + $0x44] sm:$0x1]  ;;  %s4196_s20 = sshll.u32 %s4193_s17, 4  ;;  %s4197_s20 = int_to_ptr.hbm [resolvable:$true] %s4196_s20 }
  0x24   : > { %v616_v53 = vunpack.c.l.b16 %v331_v49  ;;  %v617_v54 = vunpack.c.l.b16 %v341_v50  ;;  %v422_v55 = vrot.slane %v421_v44, 4  ;;  %v522_v58 = vrot.slane %v520_v48, 5  ;;  %v188_v33 = vld [vmem:[%s5159_s11 + $0x6c] sm:$0xf]  ;;  %v212_v47 = vld [vmem:[%s5159_s11 + $0x74] sm:$0x1] }
  0x25   : > { %v432_v57 = vrot.slane %v431_v51, 4  ;;  %v526_v59 = vrot.slane %v524_v52, 4  ;;  %v530_v60 = vshll.u32 %v215_v45, 16  ;;  %v517_v0 = vor.u32 %v516_v56, %v513_v46  ;;  %s4182_s16 = scalar_lea.sflag [#allocation3], %s161_s29  ;;  %s5014_s24 = sshra.s32 %s4197_s20, 4  ;;  %s5015_s24 = int_to_ptr.hbm [resolvable:$true] %s5014_s24 }
  0x26   : > { %v644_v62 = vpack.c.b16 %v617_v54, %v616_v53  ;;  %v427_v63 = vsel %vm5171_vm3, %v422_v55, %v426_v38  ;;  %v223_v9 = vshrl.u32 %v170_v61, 16  ;;  %v226_v10 = vshll.u32 %v170_v61, 16  ;;  %v196_v61 = vld [vmem:[%s5159_s11 + $0x9c] sm:$0xf]  ;;  %s5016_s25 = scalar_lea.hbm %s5015_s24, 256  ;;  %s5020_s28 = scalar_lea.hbm %s6559_s3, 512 }
  0x27   : > { %v437_v3 = vsel %vm5171_vm3, %v432_v57, %v436_v43  ;;  %v624_v4 = vunpack.c.l.b16 %v427_v63  ;;  %v527_v5 = vor.u32 %v526_v59, %v522_v58  ;;  %v532_v6 = vrot.slane %v530_v60, 5  ;;  %v189_v43 = vld [vmem:[%s5159_s11 + $0x70] sm:$0xf]  ;;  %p5017_p11 = scmp.ne.s32.totalorder %s5015_s24, %s5016_s25  ;;  %p5021_p0 = scmp.lt.s32.totalorder %s5015_s24, %s6559_s3 }
  0x28   : > { %4270 = vmatmul.msk.bf16.vlgmr.msra.gmra.mxu1 %vm656_vm4, %v644_v62  ;;  %v625_v7 = vunpack.c.l.b16 %v437_v3  ;;  %v518_v8 = vrot.slane %v517_v0, 4  ;;  %v232_v12 = vshll.u32 %v5184_v1, 16  ;;  %v236_v13 = vshrl.u32 %v5184_v1, 16  ;;  %v197_v3 = vld [vmem:[%s5159_s11 + $0xa0] sm:$0xf]  ;;  %p5022_p1 = scmp.lt.s32.totalorder %s5020_s28, %s5016_s25 }
  0x29   : > { %v528_v11 = vrot.slane %v527_v5, 4  ;;  %v242_v14 = vshll.u32 %v5187_v2, 16  ;;  %v225_v17 = vrot.slane %v223_v9, 4  ;;  %v228_v18 = vrot.slane %v226_v10, 5  ;;  %p5018_p12 = pnand %p5017_p11, %p5124_p5 }
  0x2a   : > { %v648_v15 = vpack.c.b16 %v625_v7, %v624_v4  ;;  %v523_v16 = vsel %vm5171_vm3, %v518_v8, %v522_v58  ;;  %v234_v23 = vrot.slane %v232_v12, 5  ;;  %v238_v24 = vrot.slane %v236_v13, 4  ;;  %v216_v8 = vld [vmem:[%s5159_s11 + $0xa4] sm:$0x1]  ;;  %p5023_p2 = por %p5022_p1, %p5021_p0 }
  0x2b   : > { %v533_v21 = vsel %vm5171_vm3, %v528_v11, %v532_v6  ;;  %v632_v22 = vunpack.c.l.b16 %v523_v16  ;;  %v229_v27 = vor.u32 %v228_v18, %v225_v17  ;;  %v244_v28 = vrot.slane %v242_v14, 5  ;;  %p5019_p13 = pneg %p5018_p12 }
  0x2c   : > { %4274 = vmatmul.msk.bf16.vlgmr.msra.gmra.mxu2 %vm656_vm4, %v648_v15  ;;  %v633_v26 = vunpack.c.l.b16 %v533_v21  ;;  %v239_v29 = vor.u32 %v238_v24, %v234_v23  ;;  %v343_v30 = vshrl.u32 %v180_v19, 16  ;;  %v346_v31 = vshll.u32 %v180_v19, 16 }
  0x2d   : > { %v352_v32 = vshll.u32 %v5199_v20, 16  ;;  %v230_v35 = vrot.slane %v229_v27, 4  ;;  %v356_v37 = vshrl.u32 %v5199_v20, 16  ;;  %v362_v38 = vshll.u32 %v5204_v25, 16  ;;  %p5024_p3 = pnand %p5023_p2, %p5019_p13 }
  0x2e   : > { %v652_v34 = vpack.c.b16 %v633_v26, %v632_v22  ;;  %v240_v39 = vrot.slane %v239_v29, 4  ;;  %v345_v40 = vrot.slane %v343_v30, 4  ;;  %v348_v41 = vrot.slane %v346_v31, 5  ;;  %v172_v22 = vld [vmem:[%s5159_s11 + $0xc] sm:$0xf] }
  0x2f   : > { %v354_v42 = vrot.slane %v352_v32, 5  ;;  %v235_v44 = vsel %vm5171_vm3, %v230_v35, %v234_v23  ;;  %v358_v45 = vrot.slane %v356_v37, 4  ;;  %v364_v46 = vrot.slane %v362_v38, 5  ;;  %v5233_v32 = vld [vmem:[%s5159_s11 + $0x14] sm:$0x1] }
  0x30   : > { %4278 = vmatmul.msk.bf16.vlgmr.msra.gmra.mxu3 %vm656_vm4, %v652_v34  ;;  %v439_v48 = vshrl.u32 %v188_v33, 16  ;;  %v245_v49 = vsel %vm5171_vm3, %v240_v39, %v244_v28  ;;  %v608_v50 = vunpack.c.l.b16 %v235_v44  ;;  %v349_v51 = vor.u32 %v348_v41, %v345_v40  ;;  %v5230_v28 = vld [vmem:[%s5159_s11 + $0x10] sm:$0xf] }
  0x31   : > { %v442_v52 = vshll.u32 %v188_v33, 16  ;;  %v609_v53 = vunpack.c.l.b16 %v245_v49  ;;  %v359_v54 = vor.u32 %v358_v45, %v354_v42  ;;  %v448_v56 = vshll.u32 %v189_v43, 16 }
  0x32   : > { %v441_v55 = vrot.slane %v439_v48, 4  ;;  %v350_v57 = vrot.slane %v349_v51, 4  ;;  %v452_v59 = vshrl.u32 %v189_v43, 16  ;;  %v458_v60 = vshll.u32 %v212_v47, 16  ;;  %v5243_v47 = vld [vmem:[%s5159_s11 + $0x4c] sm:$0xf] }
  0x33   : > { %v444_v58 = vrot.slane %v442_v52, 5  ;;  %v640_v62 = vpack.c.b16 %v609_v53, %v608_v50  ;;  %v360_v63 = vrot.slane %v359_v54, 4  ;;  %v450_v0 = vrot.slane %v448_v56, 5  ;;  %v5248_v56 = vld [vmem:[%s5159_s11 + $0x50] sm:$0x1] }
  0x34   : > { %v355_v4 = vsel %vm5171_vm3, %v350_v57, %v354_v42  ;;  %v454_v6 = vrot.slane %v452_v59, 4  ;;  %v460_v7 = vrot.slane %v458_v60, 5  ;;  %v535_v11 = vshrl.u32 %v196_v61, 16  ;;  %v182_v42 = vld [vmem:[%s5159_s11 + $0x48] sm:$0xf] }
  0x35   : > { %v445_v5 = vor.u32 %v444_v58, %v441_v55  ;;  %4266 = vmatmul.msk.bf16.vlgmr.msra.gmra.mxu0 %vm656_vm4, %v640_v62  ;;  %v365_v9 = vsel %vm5171_vm3, %v360_v63, %v364_v46  ;;  %v618_v10 = vunpack.c.l.b16 %v355_v4  ;;  %v538_v12 = vshll.u32 %v196_v61, 16 }
  0x36   : > { %v619_v13 = vunpack.c.l.b16 %v365_v9  ;;  %v455_v15 = vor.u32 %v454_v6, %v450_v0  ;;  %v544_v16 = vshll.u32 %v197_v3, 16  ;;  %v537_v17 = vrot.slane %v535_v11, 4 }
  0x37   : > { %v446_v14 = vrot.slane %v445_v5, 4  ;;  %v540_v18 = vrot.slane %v538_v12, 5  ;;  %v548_v19 = vshrl.u32 %v197_v3, 16  ;;  %v554_v21 = vshll.u32 %v216_v8, 16  ;;  %v190_v3 = vld [vmem:[%s5159_s11 + $0x78] sm:$0xf] }
  0x38   : > { %v645_v23 = vpack.c.b16 %v619_v13, %v618_v10  ;;  %v456_v26 = vrot.slane %v455_v15, 4  ;;  %v546_v27 = vrot.slane %v544_v16, 5  ;;  %v247_v35 = vshrl.u32 %v172_v22, 16  ;;  %v191_v8 = vld [vmem:[%s5159_s11 + $0x7c] sm:$0xf] }
  0x39   : > { %v451_v24 = vsel %vm5171_vm3, %v446_v14, %v450_v0  ;;  %v541_v30 = vor.u32 %v540_v18, %v537_v17  ;;  %v550_v31 = vrot.slane %v548_v19, 4  ;;  %v556_v34 = vrot.slane %v554_v21, 5  ;;  %v213_v16 = vld [vmem:[%s5159_s11 + $0x80] sm:$0x1] }
  0x3a   : > { %v626_v29 = vunpack.c.l.b16 %v451_v24  ;;  %4271 = vmatmul.msk.bf16.gmra.mxu1 %vm656_vm4, %v645_v23  ;;  %v461_v33 = vsel %vm5171_vm3, %v456_v26, %v460_v7  ;;  %v250_v37 = vshll.u32 %v172_v22, 16  ;;  %v256_v41 = vshll.u32 %v5230_v28, 16 }
  0x3b   : > { %v627_v38 = vunpack.c.l.b16 %v461_v33  ;;  %v542_v39 = vrot.slane %v541_v30, 4  ;;  %v551_v40 = vor.u32 %v550_v31, %v546_v27  ;;  %v249_v43 = vrot.slane %v247_v35, 4 }
  0x3c   : > { %v252_v44 = vrot.slane %v250_v37, 5  ;;  %v260_v45 = vshrl.u32 %v5230_v28, 16  ;;  %v266_v46 = vshll.u32 %v5233_v32, 16  ;;  %v258_v51 = vrot.slane %v256_v41, 5 }
  0x3d   : > { %v649_v48 = vpack.c.b16 %v627_v38, %v626_v29  ;;  %v547_v49 = vsel %vm5171_vm3, %v542_v39, %v546_v27  ;;  %v552_v50 = vrot.slane %v551_v40, 4  ;;  %v367_v58 = vshrl.u32 %v182_v42, 16  ;;  %v199_v39 = vld [vmem:[%s5159_s11 + $0xac] sm:$0xf]  ;;  %v217_v40 = vld [vmem:[%s5159_s11 + $0xb0] sm:$0x1] }
  0x3e   : > { %v634_v52 = vunpack.c.l.b16 %v547_v49  ;;  %v253_v53 = vor.u32 %v252_v44, %v249_v43  ;;  %v262_v54 = vrot.slane %v260_v45, 4  ;;  %v268_v55 = vrot.slane %v266_v46, 5 }
  0x3f   : > { %4275 = vmatmul.msk.bf16.gmra.mxu2 %vm656_vm4, %v649_v48  ;;  %v557_v57 = vsel %vm5171_vm3, %v552_v50, %v556_v34  ;;  %v370_v59 = vshll.u32 %v182_v42, 16  ;;  %v376_v60 = vshll.u32 %v5243_v47, 16  ;;  %v380_v0 = vshrl.u32 %v5243_v47, 16  ;;  %v198_v34 = vld [vmem:[%s5159_s11 + $0xa8] sm:$0xf] }
  0x40   : > { %v635_v61 = vunpack.c.l.b16 %v557_v57  ;;  %v254_v62 = vrot.slane %v253_v53, 4  ;;  %v263_v63 = vor.u32 %v262_v54, %v258_v51  ;;  %v369_v4 = vrot.slane %v367_v58, 4 }
  0x41   : > { %v372_v5 = vrot.slane %v370_v59, 5  ;;  %v378_v6 = vrot.slane %v376_v60, 5  ;;  %v386_v7 = vshll.u32 %v5248_v56, 16  ;;  %v382_v12 = vrot.slane %v380_v0, 4  ;;  %v174_v59 = vld [vmem:[%s5159_s11 + $0x18] sm:$0xf] }
  0x42   : > { %v653_v9 = vpack.c.b16 %v635_v61, %v634_v52  ;;  %v259_v10 = vsel %vm5171_vm3, %v254_v62, %v258_v51  ;;  %v264_v11 = vrot.slane %v263_v63, 4  ;;  %v463_v17 = vshrl.u32 %v190_v3, 16  ;;  %v5276_v63 = vld [vmem:[%s5159_s11 + $0x1c] sm:$0xf]  ;;  %v5279_v0 = vld [vmem:[%s5159_s11 + $0x20] sm:$0x1] }
  0x43   : > { %v610_v13 = vunpack.c.l.b16 %v259_v10  ;;  %v373_v14 = vor.u32 %v372_v5, %v369_v4  ;;  %v388_v15 = vrot.slane %v386_v7, 5  ;;  %v383_v19 = vor.u32 %v382_v12, %v378_v6 }
  0x44   : > { %4279 = vmatmul.msk.bf16.gmra.mxu3 %vm656_vm4, %v653_v9  ;;  %v269_v18 = vsel %vm5171_vm3, %v264_v11, %v268_v55  ;;  %v466_v21 = vshll.u32 %v190_v3, 16  ;;  %v472_v22 = vshll.u32 %v191_v8, 16  ;;  %v465_v26 = vrot.slane %v463_v17, 4 }
  0x45   : > { %v611_v23 = vunpack.c.l.b16 %v269_v18  ;;  %v374_v24 = vrot.slane %v373_v14, 4  ;;  %v476_v27 = vshrl.u32 %v191_v8, 16  ;;  %v384_v29 = vrot.slane %v383_v19, 4 }
  0x46   : > { %v468_v30 = vrot.slane %v466_v21, 5  ;;  %v474_v31 = vrot.slane %v472_v22, 5  ;;  %v482_v33 = vshll.u32 %v213_v16, 16  ;;  %v559_v48 = vshrl.u32 %v198_v34, 16  ;;  %v5289_v21 = vld [vmem:[%s5159_s11 + $0x58] sm:$0xf] }
  0x47   : > { %v641_v35 = vpack.c.b16 %v611_v23, %v610_v13  ;;  %v379_v37 = vsel %vm5171_vm3, %v374_v24, %v378_v6  ;;  %v478_v38 = vrot.slane %v476_v27, 4  ;;  %v389_v41 = vsel %vm5171_vm3, %v384_v29, %v388_v15  ;;  %v184_v15 = vld [vmem:[%s5159_s11 + $0x54] sm:$0xf]  ;;  %v5294_v27 = vld [vmem:[%s5159_s11 + $0x5c] sm:$0x1] }
  0x48   : > { %v620_v42 = vunpack.c.l.b16 %v379_v37  ;;  %v469_v43 = vor.u32 %v468_v30, %v465_v26  ;;  %v484_v44 = vrot.slane %v482_v33, 5  ;;  %v621_v45 = vunpack.c.l.b16 %v389_v41 }
  0x49   : > { %4267 = vmatmul.msk.bf16.gmra.mxu0 %vm656_vm4, %v641_v35  ;;  %v479_v46 = vor.u32 %v478_v38, %v474_v31  ;;  %v562_v49 = vshll.u32 %v198_v34, 16  ;;  %v568_v51 = vshll.u32 %v199_v39, 16  ;;  %v572_v52 = vshrl.u32 %v199_v39, 16  ;;  %v192_v39 = vld [vmem:[%s5159_s11 + $0x84] sm:$0xf] }
  0x4a   : > { %v470_v50 = vrot.slane %v469_v43, 4  ;;  %v578_v53 = vshll.u32 %v217_v40, 16  ;;  %v646_v54 = vpack.c.b16 %v621_v45, %v620_v42  ;;  %v561_v57 = vrot.slane %v559_v48, 4 }
  0x4b   : > { %v480_v55 = vrot.slane %v479_v46, 4  ;;  %v564_v58 = vrot.slane %v562_v49, 5  ;;  %v570_v61 = vrot.slane %v568_v51, 5  ;;  %v574_v62 = vrot.slane %v572_v52, 4  ;;  %v193_v49 = vld [vmem:[%s5159_s11 + $0x88] sm:$0xf] }
  0x4c   : > { %v475_v60 = vsel %vm5171_vm3, %v470_v50, %v474_v31  ;;  %4272 = vmatmul.msk.bf16.gmra.mxu1 %vm656_vm4, %v646_v54  ;;  %v580_v6 = vrot.slane %v578_v53, 5  ;;  %v271_v9 = vshrl.u32 %v174_v59, 16  ;;  %v274_v10 = vshll.u32 %v174_v59, 16  ;;  %v214_v53 = vld [vmem:[%s5159_s11 + $0x8c] sm:$0x1] }
  0x4d   : > { %v485_v3 = vsel %vm5171_vm3, %v480_v55, %v484_v44  ;;  %v628_v4 = vunpack.c.l.b16 %v475_v60  ;;  %v565_v5 = vor.u32 %v564_v58, %v561_v57  ;;  %v575_v8 = vor.u32 %v574_v62, %v570_v61 }
  0x4e   : > { %v629_v7 = vunpack.c.l.b16 %v485_v3  ;;  %v280_v12 = vshll.u32 %v5276_v63, 16  ;;  %v284_v13 = vshrl.u32 %v5276_v63, 16  ;;  %v290_v14 = vshll.u32 %v5279_v0, 16 }
  0x4f   : > { %v566_v11 = vrot.slane %v565_v5, 4  ;;  %v576_v17 = vrot.slane %v575_v8, 4  ;;  %v273_v18 = vrot.slane %v271_v9, 4  ;;  %v276_v19 = vrot.slane %v274_v10, 5  ;;  %v200_v8 = vld [vmem:[%s5159_s11 + $0xb4] sm:$0xf] }
  0x50   : > { %v650_v16 = vpack.c.b16 %v629_v7, %v628_v4  ;;  %v282_v23 = vrot.slane %v280_v12, 5  ;;  %v286_v24 = vrot.slane %v284_v13, 4  ;;  %v292_v26 = vrot.slane %v290_v14, 5  ;;  %v201_v12 = vld [vmem:[%s5159_s11 + $0xb8] sm:$0xf] }
  0x51   : > { %v571_v22 = vsel %vm5171_vm3, %v566_v11, %v570_v61  ;;  %v581_v29 = vsel %vm5171_vm3, %v576_v17, %v580_v6  ;;  %v277_v31 = vor.u32 %v276_v19, %v273_v18  ;;  %v391_v33 = vshrl.u32 %v184_v15, 16  ;;  %v218_v17 = vld [vmem:[%s5159_s11 + $0xbc] sm:$0x1] }
  0x52   : > { %4276 = vmatmul.msk.bf16.gmra.mxu2 %vm656_vm4, %v650_v16  ;;  %v636_v30 = vunpack.c.l.b16 %v571_v22  ;;  %v637_v34 = vunpack.c.l.b16 %v581_v29  ;;  %v287_v35 = vor.u32 %v286_v24, %v282_v23  ;;  %v394_v37 = vshll.u32 %v184_v15, 16 }
  0x53   : > { %v400_v38 = vshll.u32 %v5289_v21, 16  ;;  %v278_v40 = vrot.slane %v277_v31, 4  ;;  %v393_v41 = vrot.slane %v391_v33, 4  ;;  %v404_v42 = vshrl.u32 %v5289_v21, 16 }
  0x54   : > { %v410_v43 = vshll.u32 %v5294_v27, 16  ;;  %v654_v44 = vpack.c.b16 %v637_v34, %v636_v30  ;;  %v288_v45 = vrot.slane %v287_v35, 4  ;;  %v396_v46 = vrot.slane %v394_v37, 5  ;;  %v176_v37 = vld [vmem:[%s5159_s11 + $0x24] sm:$0xf] }
  0x55   : > { %v402_v48 = vrot.slane %v400_v38, 5  ;;  %v283_v50 = vsel %vm5171_vm3, %v278_v40, %v282_v23  ;;  %v406_v51 = vrot.slane %v404_v42, 4  ;;  %v487_v54 = vshrl.u32 %v192_v39, 16  ;;  %v5322_v42 = vld [vmem:[%s5159_s11 + $0x28] sm:$0xf] }
  0x56   : > { %v412_v52 = vrot.slane %v410_v43, 5  ;;  %4280 = vmatmul.msk.bf16.gmra.mxu3 %vm656_vm4, %v654_v44  ;;  %v293_v55 = vsel %vm5171_vm3, %v288_v45, %v292_v26  ;;  %v612_v57 = vunpack.c.l.b16 %v283_v50  ;;  %v397_v58 = vor.u32 %v396_v46, %v393_v41 }
  0x57   : > { %v490_v59 = vshll.u32 %v192_v39, 16  ;;  %v613_v60 = vunpack.c.l.b16 %v293_v55  ;;  %v407_v61 = vor.u32 %v406_v51, %v402_v48  ;;  %v489_v62 = vrot.slane %v487_v54, 4 }
  0x58   : > { %v496_v3 = vshll.u32 %v193_v49, 16  ;;  %v398_v4 = vrot.slane %v397_v58, 4  ;;  %v500_v6 = vshrl.u32 %v193_v49, 16  ;;  %v506_v7 = vshll.u32 %v214_v53, 16 }
  0x59   : > { %v492_v5 = vrot.slane %v490_v59, 5  ;;  %v642_v9 = vpack.c.b16 %v613_v60, %v612_v57  ;;  %v408_v10 = vrot.slane %v407_v61, 4  ;;  %v583_v22 = vshrl.u32 %v200_v8, 16  ;;  %v1018_v61 = vld [vmem:[%s5159_s11] sm:$0xe] }
  0x5a   : > { %v498_v11 = vrot.slane %v496_v3, 5  ;;  %v403_v13 = vsel %vm5171_vm3, %v398_v4, %v402_v48  ;;  %v502_v15 = vrot.slane %v500_v6, 4  ;;  %v508_v16 = vrot.slane %v506_v7, 5  ;;  %v5326_v48 = vld [vmem:[%s5159_s11 + $0x2c] sm:$0x1] }
  0x5b   : > { %v493_v14 = vor.u32 %v492_v5, %v489_v62  ;;  %4268 = vmatmul.msk.bf16.gmra.mxu0 %vm656_vm4, %v642_v9  ;;  %v413_v18 = vsel %vm5171_vm3, %v408_v10, %v412_v52  ;;  %v622_v19 = vunpack.c.l.b16 %v403_v13  ;;  %v586_v23 = vshll.u32 %v200_v8, 16  ;;  %v4508_v6 = vld [vmem:[%s5159_s11 + $0xc] sm:$0xf] }
  0x5c   : > { %v623_v24 = vunpack.c.l.b16 %v413_v18  ;;  %v503_v29 = vor.u32 %v502_v15, %v498_v11  ;;  %v592_v30 = vshll.u32 %v201_v12, 16  ;;  %v585_v31 = vrot.slane %v583_v22, 4 }
  0x5d   : > { %v494_v26 = vrot.slane %v493_v14, 4  ;;  %v588_v33 = vrot.slane %v586_v23, 5  ;;  %v596_v34 = vshrl.u32 %v201_v12, 16  ;;  %v602_v35 = vshll.u32 %v218_v17, 16  ;;  %v4509_v12 = vld [vmem:[%s5159_s11 + $0x10] sm:$0xf] }
  0x5e   : > { %v647_v38 = vpack.c.b16 %v623_v24, %v622_v19  ;;  %v504_v40 = vrot.slane %v503_v29, 4  ;;  %v594_v41 = vrot.slane %v592_v30, 5  ;;  %v1074_v43 = vrot.slane %v5187_v2, 5 }
  0x5f   : > { %v499_v39 = vsel %vm5171_vm3, %v494_v26, %v498_v11  ;;  %v589_v45 = vor.u32 %v588_v33, %v585_v31  ;;  %v598_v46 = vrot.slane %v596_v34, 4  ;;  %v604_v50 = vrot.slane %v602_v35, 5  ;;  %v4654_v11 = vld [vmem:[%s6557_s1 + $0x18] sm:$0xf] }
  0x60   : > { %v630_v44 = vunpack.c.l.b16 %v499_v39  ;;  %4273 = vmatmul.msk.bf16.gmra.mxu1 %vm656_vm4, %v647_v38  ;;  %v509_v49 = vsel %vm5171_vm3, %v504_v40, %v508_v16  ;;  %v295_v51 = vshrl.u32 %v176_v37, 16  ;;  %v298_v52 = vshll.u32 %v176_v37, 16  ;;  %v4510_v38 = vld [vmem:[%s5159_s11 + $0x14] sm:$0x1] }
  0x61   : > { %v631_v53 = vunpack.c.l.b16 %v509_v49  ;;  %v590_v54 = vrot.slane %v589_v45, 4  ;;  %v599_v55 = vor.u32 %v598_v46, %v594_v41  ;;  %v304_v2 = vshll.u32 %v5322_v42, 16  ;;  %v4783_v45 = vld [vmem:[%s6557_s1 + $0x1c] sm:$0xf] }
  0x62   : > { %v297_v57 = vrot.slane %v295_v51, 4  ;;  %v300_v58 = vrot.slane %v298_v52, 5  ;;  %v308_v59 = vshrl.u32 %v5322_v42, 16  ;;  %v314_v60 = vshll.u32 %v5326_v48, 16  ;;  %v4854_v51 = vld [vmem:[%s5159_s11] sm:$0xff] }
  0x63   : > { %v651_v62 = vpack.c.b16 %v631_v53, %v630_v44  ;;  %v595_v3 = vsel %vm5171_vm3, %v590_v54, %v594_v41  ;;  %v600_v4 = vrot.slane %v599_v55, 4  ;;  %v306_v5 = vrot.slane %v304_v2, 5  ;;  %v4832_v2 = vld [vmem:[%s6557_s1 + $0x20] sm:$0xf] }
  0x64   : > { %v638_v7 = vunpack.c.l.b16 %v595_v3  ;;  %v301_v8 = vor.u32 %v300_v58, %v297_v57  ;;  %v310_v9 = vrot.slane %v308_v59, 4  ;;  %v316_v10 = vrot.slane %v314_v60, 5 }
  0x65   : > { %4277 = vmatmul.msk.bf16.gmra.mxu2 %vm656_vm4, %v651_v62  ;;  %v605_v13 = vsel %vm5171_vm3, %v600_v4, %v604_v50  ;;  %v4362_v14 = vrot.slane %v1018_v61, 9  ;;  %v1071_v19 = vrot.slane %v5184_v1, 5  ;;  %v2906_v22 = vsel %vm705_vm0, %v4654_v11, 0  ;;  %v4605_v50 = vld [vmem:[%s6557_s1 + $0x14] sm:$0xf] }
  0x66   : > { %v639_v15 = vunpack.c.l.b16 %v605_v13  ;;  %v302_v16 = vrot.slane %v301_v8, 4  ;;  %v311_v17 = vor.u32 %v310_v9, %v306_v5  ;;  %v1739_v23 = vshrl.u32 %v4508_v6, 16  ;;  %2915 = vmatpush.bf16.msra.mxu2 %v2906_v22  ;;  %v1019_v8 = vld [vmem:[%s5159_s11 + $0xc] sm:$0xe] }
  0x67   : > { %v1742_v24 = vshll.u32 %v4508_v6, 16  ;;  %v1748_v26 = vshll.u32 %v4509_v12, 16  ;;  %v1072_v33 = vsel %vm5345_vm7, %v4362_v14, %v1071_v19  ;;  %v1073_v35 = vrot.slane %v1071_v19, 4  ;;  %v4512_v6 = vld [vmem:[%s5159_s11 + $0x1c] sm:$0xf] }
  0x68   : > { %v655_v29 = vpack.c.b16 %v639_v15, %v638_v7  ;;  %v307_v30 = vsel %vm5171_vm3, %v302_v16, %v306_v5  ;;  %v312_v31 = vrot.slane %v311_v17, 4  ;;  %v1183_v37 = vunpack.c.l.b16 %v1072_v33  ;;  %v4511_v5 = vld [vmem:[%s5159_s11 + $0x18] sm:$0xf]  ;;  %v4870_v15 = vld [vmem:[%s5159_s11 + $0xc] sm:$0xff] }
  0x69   : > { %v614_v34 = vunpack.c.l.b16 %v307_v30  ;;  %v1741_v1 = vrot.slane %v1739_v23, 4  ;;  %v1744_v40 = vrot.slane %v1742_v24, 5  ;;  %v1750_v41 = vrot.slane %v1748_v26, 5  ;;  %v4513_v30 = vld [vmem:[%s5159_s11 + $0x20] sm:$0x1] }
  0x6a   : > { %4281 = vmatmul.msk.bf16.gmra.mxu3 %vm656_vm4, %v655_v29  ;;  %v317_v39 = vsel %vm5171_vm3, %v312_v31, %v316_v10  ;;  %v1752_v44 = vshrl.u32 %v4509_v12, 16  ;;  %v1075_v49 = vsel %vm5345_vm7, %v1073_v35, %v1074_v43  ;;  %v1758_v55 = vshll.u32 %v4510_v38, 16  ;;  %v4855_v35 = vld [vmem:[%s5159_s11 + $0xc] sm:$0xff] }
  0x6b   : > { %v615_v46 = vunpack.c.l.b16 %v317_v39  ;;  %v1184_v52 = vunpack.c.l.b16 %v1075_v49  ;;  %v1745_v53 = vor.u32 %v1744_v40, %v1741_v1  ;;  %v3560_v58 = vsel %vm705_vm0, %v4783_v45, 0 }
  0x6c   : > { %v1754_v54 = vrot.slane %v1752_v44, 4  ;;  %3569 = vmatpush.bf16.msra.mxu3 %v3560_v58  ;;  %v2619_v60 = vsel %vm705_vm0, %v4605_v50, 0  ;;  %v3958_v61 = vsel %vm705_vm0, %v4832_v2, 0  ;;  %v1760_v4 = vrot.slane %v1758_v55, 5  ;;  %v1020_v50 = vld [vmem:[%s5159_s11 + $0x18] sm:$0xe] }
  0x6d   : > { %v643_v57 = vpack.c.b16 %v615_v46, %v614_v34  ;;  %v1215_v43 = vpack.c.b16 %v1184_v52, %v1183_v37  ;;  %2628 = vmatpush.bf16.msra.mxu1 %v2619_v60  ;;  %v1746_v62 = vrot.slane %v1745_v53, 4  ;;  %3967 = vmatpush.bf16.msra.mxu0 %v3958_v61  ;;  %v1078_v7 = vrot.slane %v5230_v28, 5  ;;  %v4515_v46 = vld [vmem:[%s5159_s11 + $0x28] sm:$0xf] }
  0x6e   : > { %v1755_v59 = vor.u32 %v1754_v54, %v1750_v41  ;;  %v1763_v9 = vshrl.u32 %v4511_v5, 16  ;;  %v1766_v10 = vshll.u32 %v4511_v5, 16  ;;  %v1772_v13 = vshll.u32 %v4512_v6, 16 }
  0x6f   : > { %4269 = vmatmul.msk.bf16.gmra.mxu0 %vm656_vm4, %v643_v57  ;;  %v1751_v11 = vsel %vm5171_vm3, %v1746_v62, %v1750_v41  ;;  %v1776_v14 = vshrl.u32 %v4512_v6, 16  ;;  %v4363_v16 = vrot.slane %v1019_v8, 9  ;;  %v1080_v17 = vrot.slane %v1078_v7, 4  ;;  %v4514_v41 = vld [vmem:[%s5159_s11 + $0x24] sm:$0xf] }
  0x70   : > { %4346 = vmatmul.msk.bf16.vlgmr.msrb.gmra.mxu1 %vm656_vm4, %v4854_v51  ;;  %v1756_v3 = vrot.slane %v1755_v59, 4  ;;  %v1081_v28 = vrot.slane %v5233_v32, 5  ;;  %v2124_v19 = vunpack.c.l.b16 %v1751_v11  ;;  %v1765_v23 = vrot.slane %v1763_v9, 4  ;;  %v4516_v6 = vld [vmem:[%s5159_s11 + $0x2c] sm:$0x1] }
  0x71   : > { %v1768_v24 = vrot.slane %v1766_v10, 5  ;;  %v1774_v26 = vrot.slane %v1772_v13, 5  ;;  %v1778_v29 = vrot.slane %v1776_v14, 4  ;;  %v1079_v31 = vsel %vm5345_vm7, %v4363_v16, %v1078_v7 }
  0x72   : > { %v1761_v12 = vsel %vm5171_vm3, %v1756_v3, %v1760_v4  ;;  %v1082_v33 = vsel %vm5345_vm7, %v1080_v17, %v1081_v28  ;;  %v1782_v38 = vshll.u32 %v4513_v30, 16  ;;  %v1185_v1 = vunpack.c.l.b16 %v1079_v31 }
  0x73   : > { %v2125_v22 = vunpack.c.l.b16 %v1761_v12  ;;  %v1769_v32 = vor.u32 %v1768_v24, %v1765_v23  ;;  %v1779_v37 = vor.u32 %v1778_v29, %v1774_v26  ;;  %v1186_v39 = vunpack.c.l.b16 %v1082_v33  ;;  %v4856_v12 = vld [vmem:[%s5159_s11 + $0x18] sm:$0xff]  ;;  %v1021_v29 = vld [vmem:[%s5159_s11 + $0x24] sm:$0xe] }
  0x74   : > { %v1784_v45 = vrot.slane %v1782_v38, 5  ;;  %v1085_v51 = vrot.slane %v5276_v63, 5  ;;  %v1787_v52 = vshrl.u32 %v4514_v41, 16  ;;  %v1790_v54 = vshll.u32 %v4514_v41, 16 }
  0x75   : > { %4379 = vmatmul.msk.bf16.vlgmr.msrb.gmra.mxu2 %vm656_vm4, %v1215_v43  ;;  %v2156_v34 = vpack.c.b16 %v2125_v22, %v2124_v19  ;;  %v1770_v40 = vrot.slane %v1769_v32, 4  ;;  %v1780_v44 = vrot.slane %v1779_v37, 4  ;;  %v1216_v49 = vpack.c.b16 %v1186_v39, %v1185_v1  ;;  %v4871_v43 = vld [vmem:[%s5159_s11 + $0x18] sm:$0xff]  ;;  %v4517_v19 = vld [vmem:[%s5159_s11 + $0x30] sm:$0xf]  ;;  %v4872_v32 = vld [vmem:[%s5159_s11 + $0x24] sm:$0xff] }
  0x76   : > { %v1796_v55 = vshll.u32 %v4515_v46, 16  ;;  %v1800_v2 = vshrl.u32 %v4515_v46, 16  ;;  %v4364_v58 = vrot.slane %v1020_v50, 9  ;;  %v1087_v60 = vrot.slane %v1085_v51, 4  ;;  %v4518_v22 = vld [vmem:[%s5159_s11 + $0x34] sm:$0xf] }
  0x77   : > { %v1775_v53 = vsel %vm5171_vm3, %v1770_v40, %v1774_v26  ;;  %v1785_v57 = vsel %vm5171_vm3, %v1780_v44, %v1784_v45  ;;  %v1088_v63 = vrot.slane %v5279_v0, 5  ;;  %v1789_v61 = vrot.slane %v1787_v52, 4  ;;  %v4519_v45 = vld [vmem:[%s5159_s11 + $0x38] sm:$0x1] }
  0x78   : > { %v2126_v59 = vunpack.c.l.b16 %v1775_v53  ;;  %v2127_v62 = vunpack.c.l.b16 %v1785_v57  ;;  %v1792_v3 = vrot.slane %v1790_v54, 5  ;;  %v1798_v4 = vrot.slane %v1796_v55, 5  ;;  %v4521_v57 = vld [vmem:[%s5159_s11 + $0x40] sm:$0xf] }
  0x79   : > { %v1802_v5 = vrot.slane %v1800_v2, 4  ;;  %v1086_v7 = vsel %vm5345_vm7, %v4364_v58, %v1085_v51  ;;  %v1089_v8 = vsel %vm5345_vm7, %v1087_v60, %v1088_v63  ;;  %v1806_v0 = vshll.u32 %v4516_v6, 16  ;;  %v4520_v2 = vld [vmem:[%s5159_s11 + $0x3c] sm:$0xf]  ;;  %v4949_v63 = vld [vmem:[%s5159_s11 + $0x34] sm:$0xf] }
  0x7a   : > { %4492 = vmatmul.msk.bf16.vlgmr.msrb.gmra.mxu3 %vm656_vm4, %v4870_v15  ;;  %v2157_v9 = vpack.c.b16 %v2127_v62, %v2126_v59  ;;  %v1793_v10 = vor.u32 %v1792_v3, %v1789_v61  ;;  %v1187_v13 = vunpack.c.l.b16 %v1086_v7  ;;  %v1188_v14 = vunpack.c.l.b16 %v1089_v8  ;;  %v1022_v62 = vld [vmem:[%s5159_s11 + $0x30] sm:$0xe] }
  0x7b   : > { %v1803_v11 = vor.u32 %v1802_v5, %v1798_v4  ;;  %v1808_v17 = vrot.slane %v1806_v0, 5  ;;  %v1092_v23 = vrot.slane %v5322_v42, 5  ;;  %v1811_v30 = vshrl.u32 %v4517_v19, 16  ;;  %v4950_v0 = vld [vmem:[%s5159_s11 + $0x38] sm:$0x1] }
  0x7c   : > { %v1794_v15 = vrot.slane %v1793_v10, 4  ;;  %v1217_v28 = vpack.c.b16 %v1188_v14, %v1187_v13  ;;  %v1814_v31 = vshll.u32 %v4517_v19, 16  ;;  %v1820_v33 = vshll.u32 %v4518_v22, 16  ;;  %v4873_v13 = vld [vmem:[%s5159_s11 + $0x30] sm:$0xff] }
  0x7d   : > { %v1804_v16 = vrot.slane %v1803_v11, 4  ;;  %v1094_v37 = vrot.slane %v1092_v23, 4  ;;  %v1095_v42 = vrot.slane %v5326_v48, 5  ;;  %v1813_v39 = vrot.slane %v1811_v30, 4  ;;  %v4857_v48 = vld [vmem:[%s5159_s11 + $0x24] sm:$0xff] }
  0x7e   : > { %v1799_v24 = vsel %vm5171_vm3, %v1794_v15, %v1798_v4  ;;  %v1816_v40 = vrot.slane %v1814_v31, 5  ;;  %v1822_v41 = vrot.slane %v1820_v33, 5  ;;  %v1830_v53 = vshll.u32 %v4519_v45, 16  ;;  %v4858_v33 = vld [vmem:[%s5159_s11 + $0x30] sm:$0xff] }
  0x7f   : > { %4557 = vmatmul.msk.bf16.vlgmr.msrb.gmra.mxu0 %vm656_vm4, %v2156_v34  ;;  %v1809_v26 = vsel %vm5171_vm3, %v1804_v16, %v1808_v17  ;;  %v1824_v34 = vshrl.u32 %v4518_v22, 16  ;;  %v2128_v38 = vunpack.c.l.b16 %v1799_v24  ;;  %v1099_v61 = vrot.slane %v4949_v63, 5  ;;  %v4522_v22 = vld [vmem:[%s5159_s11 + $0x44] sm:$0x1] }
  0x80   : > { %4347 = vmatmul.msk.bf16.gmra.mxu1 %vm656_vm4, %v4855_v35  ;;  %v4365_v35 = vrot.slane %v1021_v29, 9  ;;  %v2129_v1 = vunpack.c.l.b16 %v1809_v26  ;;  %v1817_v51 = vor.u32 %v1816_v40, %v1813_v39  ;;  %v1832_v59 = vrot.slane %v1830_v53, 5  ;;  %v4523_v39 = vld [vmem:[%s5159_s11 + $0x48] sm:$0xf]  ;;  %v4524_v40 = vld [vmem:[%s5159_s11 + $0x4c] sm:$0xf] }
  0x81   : > { %v1826_v44 = vrot.slane %v1824_v34, 4  ;;  %v1835_v3 = vshrl.u32 %v4520_v2, 16  ;;  %v1838_v4 = vshll.u32 %v4520_v2, 16  ;;  %v1844_v5 = vshll.u32 %v4521_v57, 16  ;;  %v4874_v2 = vld [vmem:[%s5159_s11 + $0x3c] sm:$0xff] }
  0x82   : > { %v1093_v46 = vsel %vm5345_vm7, %v4365_v35, %v1092_v23  ;;  %v2158_v50 = vpack.c.b16 %v2129_v1, %v2128_v38  ;;  %v1818_v58 = vrot.slane %v1817_v51, 4  ;;  %v1848_v6 = vshrl.u32 %v4521_v57, 16 }
  0x83   : > { %v1827_v52 = vor.u32 %v1826_v44, %v1822_v41  ;;  %v1189_v54 = vunpack.c.l.b16 %v1093_v46  ;;  %v4366_v10 = vrot.slane %v1022_v62, 9  ;;  %v1101_v11 = vrot.slane %v1099_v61, 4 }
  0x84   : > { %v1823_v8 = vsel %vm5171_vm3, %v1818_v58, %v1822_v41  ;;  %v1837_v14 = vrot.slane %v1835_v3, 4  ;;  %v1840_v15 = vrot.slane %v1838_v4, 5  ;;  %v1846_v16 = vrot.slane %v1844_v5, 5  ;;  %v4525_v4 = vld [vmem:[%s5159_s11 + $0x50] sm:$0x1] }
  0x85   : > { %4380 = vmatmul.msk.bf16.gmra.mxu2 %vm656_vm4, %v1216_v49  ;;  %v1096_v49 = vsel %vm5345_vm7, %v1094_v37, %v1095_v42  ;;  %v1850_v17 = vrot.slane %v1848_v6, 4  ;;  %v1100_v23 = vsel %vm5345_vm7, %v4366_v10, %v1099_v61  ;;  %v1854_v30 = vshll.u32 %v4522_v22, 16 }
  0x86   : > { %v1190_v55 = vunpack.c.l.b16 %v1096_v49  ;;  %v1841_v26 = vor.u32 %v1840_v15, %v1837_v14  ;;  %v1859_v51 = vshrl.u32 %v4523_v39, 16  ;;  %v1868_v53 = vshll.u32 %v4524_v40, 16 }
  0x87   : > { %v1851_v29 = vor.u32 %v1850_v17, %v1846_v16  ;;  %v1856_v1 = vrot.slane %v1854_v30, 5 }
  0x88   : > { %v1218_v60 = vpack.c.b16 %v1190_v55, %v1189_v54  ;;  %v1842_v42 = vrot.slane %v1841_v26, 4  ;;  %v1872_v54 = vshrl.u32 %v4524_v40, 16  ;;  %v1870_v62 = vrot.slane %v1868_v53, 5 }
  0x89   : > { %v1852_v38 = vrot.slane %v1851_v29, 4  ;;  %v1113_v26 = vrot.slane %v5243_v47, 5 }
  0x8a   : > { %4493 = vmatmul.msk.bf16.gmra.mxu3 %vm656_vm4, %v4871_v43  ;;  %v1828_v43 = vrot.slane %v1827_v52, 4  ;;  %v1847_v45 = vsel %vm5171_vm3, %v1842_v42, %v1846_v16  ;;  %v1862_v52 = vshll.u32 %v4523_v39, 16  ;;  %v1874_v3 = vrot.slane %v1872_v54, 4  ;;  %v4528_v54 = vld [vmem:[%s5159_s11 + $0x5c] sm:$0x1] }
  0x8b   : > { %v1857_v46 = vsel %vm5171_vm3, %v1852_v38, %v1856_v1  ;;  %v2132_v55 = vunpack.c.l.b16 %v1847_v45  ;;  %v4875_v1 = vld [vmem:[%s5159_s11 + $0x48] sm:$0xff]  ;;  %v1115_v40 = vrot.slane %v1113_v26, 4 }
  0x8c   : > { %v2133_v57 = vunpack.c.l.b16 %v1857_v46  ;;  %v1864_v61 = vrot.slane %v1862_v52, 5  ;;  %v1875_v10 = vor.u32 %v1874_v3, %v1870_v62 }
  0x8e   : > { %v1876_v16 = vrot.slane %v1875_v10, 4 }
  0x8f   : > { %4558 = vmatmul.msk.bf16.gmra.mxu0 %vm656_vm4, %v2157_v9  ;;  %v1833_v9 = vsel %vm5171_vm3, %v1828_v43, %v1832_v59 }
  0x90   : > { %4348 = vmatmul.msk.bf16.gmra.mxu1 %vm656_vm4, %v4856_v12  ;;  %v1102_v12 = vrot.slane %v4950_v0, 5  ;;  %v2131_v19 = vunpack.c.l.b16 %v1833_v9 }
  0x92   : > { %v1103_v24 = vsel %vm5345_vm7, %v1101_v11, %v1102_v12  ;;  %v1878_v11 = vshll.u32 %v4525_v4, 16  ;;  %v4859_v12 = vld [vmem:[%s5159_s11 + $0x3c] sm:$0xff] }
  0x93   : > { %v1192_v35 = vunpack.c.l.b16 %v1103_v24  ;;  %v4527_v24 = vld [vmem:[%s5159_s11 + $0x58] sm:$0xf]  ;;  %v4529_v4 = vld [vmem:[%s5159_s11 + $0x60] sm:$0xf] }
  0x94   : > { %v1880_v17 = vrot.slane %v1878_v11, 5  ;;  %v1896_v42 = vshrl.u32 %v4527_v24, 16 }
  0x95   : > { %4381 = vmatmul.msk.bf16.gmra.mxu2 %vm656_vm4, %v1217_v28  ;;  %v2130_v28 = vunpack.c.l.b16 %v1823_v8  ;;  %v2160_v8 = vpack.c.b16 %v2133_v57, %v2132_v55 }
  0x96   : > { %v1881_v30 = vsel %vm5171_vm3, %v1876_v16, %v1880_v17  ;;  %v1898_v52 = vrot.slane %v1896_v42, 4 }
  0x97   : > { %v2159_v31 = vpack.c.b16 %v2131_v19, %v2130_v28  ;;  %v2135_v46 = vunpack.c.l.b16 %v1881_v30 }
  0x9a   : > { %4494 = vmatmul.msk.bf16.gmra.mxu3 %vm656_vm4, %v4872_v32  ;;  %v1191_v32 = vunpack.c.l.b16 %v1100_v23  ;;  %v4526_v23 = vld [vmem:[%s5159_s11 + $0x54] sm:$0xf] }
  0x9c   : > { %v1219_v44 = vpack.c.b16 %v1192_v35, %v1191_v32  ;;  %v1886_v32 = vshll.u32 %v4526_v23, 16  ;;  %v1892_v35 = vshll.u32 %v4527_v24, 16 }
  0x9f   : > { %4559 = vmatmul.msk.bf16.gmra.mxu0 %vm656_vm4, %v2158_v50  ;;  %v1106_v50 = vrot.slane %v5199_v20, 5  ;;  %v1861_v20 = vrot.slane %v1859_v51, 4  ;;  %v1894_v51 = vrot.slane %v1892_v35, 5  ;;  %v1123_v35 = vrot.slane %v5294_v27, 5 }
  0xa0   : > { %4349 = vmatmul.msk.bf16.gmra.mxu1 %vm656_vm4, %v4857_v48  ;;  %v1023_v48 = vld [vmem:[%s5159_s11 + $0x3c] sm:$0xe] }
  0xa1   : > { %v4367_v43 = vrot.slane %v1023_v48, 9  ;;  %v1108_v59 = vrot.slane %v1106_v50, 4  ;;  %v1888_v48 = vrot.slane %v1886_v32, 5 }
  0xa3   : > { %v1107_v5 = vsel %vm5345_vm7, %v4367_v43, %v1106_v50  ;;  %v4860_v43 = vld [vmem:[%s5159_s11 + $0x48] sm:$0xff] }
  0xa5   : > { %v5440_v7 = vpop.f32.mrf.mxu1  ;;  %4382 = vmatmul.msk.bf16.gmra.mxu2 %vm656_vm4, %v1218_v60  ;;  %v1109_v60 = vrot.slane %v5204_v25, 5  ;;  %v1865_v25 = vor.u32 %v1864_v61, %v1861_v20  ;;  %v1902_v20 = vshll.u32 %v4528_v54, 16  ;;  %v4861_v54 = vld [vmem:[%s5159_s11 + $0x54] sm:$0xff] }
  0xa7   : > { %v1110_v6 = vsel %vm5345_vm7, %v1108_v59, %v1109_v60  ;;  %v1866_v15 = vrot.slane %v1865_v25, 4  ;;  %v1899_v60 = vor.u32 %v1898_v52, %v1894_v51  ;;  %v1904_v10 = vrot.slane %v1902_v20, 5 }
  0xa8   : > { %v1194_v14 = vunpack.c.l.b16 %v1110_v6 }
  0xa9   : > { %v1871_v29 = vsel %vm5171_vm3, %v1866_v15, %v1870_v62  ;;  %v1900_v25 = vrot.slane %v1899_v60, 4  ;;  %v1120_v15 = vrot.slane %v5289_v21, 5 }
  0xaa   : > { %4495 = vmatmul.msk.bf16.gmra.mxu3 %vm656_vm4, %v4873_v13  ;;  %v1193_v13 = vunpack.c.l.b16 %v1107_v5  ;;  %v2134_v45 = vunpack.c.l.b16 %v1871_v29  ;;  %v4530_v5 = vld [vmem:[%s5159_s11 + $0x64] sm:$0xf] }
  0xab   : > { %v1920_v16 = vshrl.u32 %v4530_v5, 16  ;;  %v1905_v24 = vsel %vm5171_vm3, %v1900_v25, %v1904_v10  ;;  %v1122_v32 = vrot.slane %v1120_v15, 4  ;;  %v4951_v10 = vld [vmem:[%s5159_s11 + $0x64] sm:$0xf] }
  0xac   : > { %v1220_v19 = vpack.c.b16 %v1194_v14, %v1193_v13  ;;  %v2161_v57 = vpack.c.b16 %v2135_v46, %v2134_v45  ;;  %v1910_v13 = vshll.u32 %v4529_v4, 16  ;;  %v1916_v14 = vshll.u32 %v4530_v5, 16 }
  0xad   : > { %v5456_v34 = vpop.f32.mrf.mxu1  ;;  %v1922_v42 = vrot.slane %v1920_v16, 4 }
  0xae   : > { %v1912_v30 = vrot.slane %v1910_v13, 5  ;;  %v1026_v13 = vld [vmem:[%s5159_s11 + $0x60] sm:$0xe] }
  0xaf   : > { %v5458_v37 = vpop.f32.mrf.mxu2  ;;  %4560 = vmatmul.msk.bf16.gmra.mxu0 %vm656_vm4, %v2159_v31  ;;  %v1024_v31 = vld [vmem:[%s5159_s11 + $0x48] sm:$0xe] }
  0xb0   : > { %4350 = vmatmul.msk.bf16.gmra.mxu1 %vm656_vm4, %v4858_v33  ;;  %v1883_v33 = vshrl.u32 %v4526_v23, 16  ;;  %v4368_v47 = vrot.slane %v1024_v31, 9  ;;  %v1918_v31 = vrot.slane %v1916_v14, 5 }
  0xb2   : > { %v5464_v41 = vpop.f32.mrf.mxu0  ;;  %v1885_v50 = vrot.slane %v1883_v33, 4  ;;  %v4876_v33 = vld [vmem:[%s5159_s11 + $0x54] sm:$0xff]  ;;  %v1923_v27 = vor.u32 %v1922_v42, %v1918_v31 }
  0xb3   : > { %v5470_v49 = vpop.f32.mrf.mxu3 }
  0xb4   : > { %v1889_v59 = vor.u32 %v1888_v48, %v1885_v50  ;;  %v1124_v48 = vsel %vm5345_vm7, %v1122_v32, %v1123_v35  ;;  %v1924_v60 = vrot.slane %v1923_v27, 4 }
  0xb5   : > { %4383 = vmatmul.msk.bf16.gmra.mxu2 %vm656_vm4, %v1219_v44  ;;  %v1116_v44 = vrot.slane %v5248_v56, 5 }
  0xb7   : > { %v5476_v58 = vpop.f32.mrf.mxu1  ;;  %v5479_v63 = vpop.f32.mrf.mxu2  ;;  %v1117_v56 = vsel %vm5345_vm7, %v1115_v40, %v1116_v44  ;;  %v4531_v40 = vld [vmem:[%s5159_s11 + $0x68] sm:$0x1] }
  0xb8   : > { %v1196_v62 = vunpack.c.l.b16 %v1117_v56 }
  0xba   : > { %4496 = vmatmul.msk.bf16.gmra.mxu3 %vm656_vm4, %v4874_v2  ;;  %v5487_v9 = vpop.f32.mrf.mxu0  ;;  %v1114_v2 = vsel %vm5345_vm7, %v4368_v47, %v1113_v26  ;;  %v2137_v47 = vunpack.c.l.b16 %v1905_v24 }
  0xbb   : > { %v5489_v0 = vpop.f32.mrf.mxu3  ;;  %v1195_v61 = vunpack.c.l.b16 %v1114_v2 }
  0xbd   : > { %v1221_v11 = vpack.c.b16 %v1196_v62, %v1195_v61  ;;  %v4532_v61 = vld [vmem:[%s5159_s11 + $0x6c] sm:$0xf]  ;;  %v4533_v62 = vld [vmem:[%s5159_s11 + $0x70] sm:$0xf] }
  0xbe   : > { %v1931_v14 = vshrl.u32 %v4532_v61, 16  ;;  %v1940_v16 = vshll.u32 %v4533_v62, 16 }
  0xbf   : > { %4561 = vmatmul.msk.bf16.gmra.mxu0 %vm656_vm4, %v2160_v8  ;;  %v5493_v28 = vpop.f32.mrf.mxu1  ;;  %v1890_v8 = vrot.slane %v1889_v59, 4 }
  0xc0   : > { %4351 = vmatmul.msk.bf16.gmra.mxu1 %vm656_vm4, %v4859_v12  ;;  %v1907_v12 = vshrl.u32 %v4529_v4, 16  ;;  %v1933_v35 = vrot.slane %v1931_v14, 4  ;;  %v4536_v14 = vld [vmem:[%s5159_s11 + $0x7c] sm:$0xf] }
  0xc1   : > { %v1895_v23 = vsel %vm5171_vm3, %v1890_v8, %v1894_v51  ;;  %v1926_v51 = vshll.u32 %v4531_v40, 16 }
  0xc2   : > { %v5496_v22 = vpop.f32.mrf.mxu2  ;;  %v1909_v29 = vrot.slane %v1907_v12, 4 }
  0xc3   : > { %v1928_v20 = vrot.slane %v1926_v51, 5 }
  0xc4   : > { %v1913_v46 = vor.u32 %v1912_v30, %v1909_v29  ;;  %v4877_v30 = vld [vmem:[%s5159_s11 + $0x60] sm:$0xff] }
  0xc5   : > { %4384 = vmatmul.msk.bf16.gmra.mxu2 %vm656_vm4, %v1220_v19  ;;  %v1025_v19 = vld [vmem:[%s5159_s11 + $0x54] sm:$0xe]  ;;  %v1929_v25 = vsel %vm5171_vm3, %v1924_v60, %v1928_v20 }
  0xc6   : > { %v5506_v38 = vpop.f32.mrf.mxu0  ;;  %v4369_v21 = vrot.slane %v1025_v19, 9  ;;  %v1914_v59 = vrot.slane %v1913_v46, 4  ;;  %v1944_v19 = vshrl.u32 %v4533_v62, 16  ;;  %v4534_v46 = vld [vmem:[%s5159_s11 + $0x74] sm:$0x1] }
  0xc7   : > { %v5510_v39 = vpop.f32.mrf.mxu3 }
  0xc8   : > { %v1121_v50 = vsel %vm5345_vm7, %v4369_v21, %v1120_v15  ;;  %v1919_v8 = vsel %vm5171_vm3, %v1914_v59, %v1918_v31  ;;  %v1934_v15 = vshll.u32 %v4532_v61, 16  ;;  %v4370_v21 = vrot.slane %v1026_v13, 9  ;;  %v4535_v13 = vld [vmem:[%s5159_s11 + $0x78] sm:$0xf] }
  0xc9   : > { %v5513_v53 = vpop.f32.mrf.mxu1  ;;  %v1197_v56 = vunpack.c.l.b16 %v1121_v50  ;;  %v2138_v31 = vunpack.c.l.b16 %v1919_v8 }
  0xca   : > { %4497 = vmatmul.msk.bf16.gmra.mxu3 %vm656_vm4, %v4875_v1  ;;  %v5517_v55 = vpop.f32.mrf.mxu2  ;;  %v2136_v1 = vunpack.c.l.b16 %v1895_v23  ;;  %v4952_v23 = vld [vmem:[%s5159_s11 + $0x68] sm:$0x1]  ;;  %v1936_v42 = vrot.slane %v1934_v15, 5  ;;  %v4953_v15 = vld [vmem:[%s5159_s11 + $0x70] sm:$0xf] }
  0xcb   : > { %v1130_v24 = vrot.slane %v4952_v23, 5  ;;  %v1027_v23 = vld [vmem:[%s5159_s11 + $0x6c] sm:$0xe] }
  0xcc   : > { %v2162_v52 = vpack.c.b16 %v2137_v47, %v2136_v1  ;;  %v1942_v1 = vrot.slane %v1940_v16, 5  ;;  %v1946_v47 = vrot.slane %v1944_v19, 4  ;;  %v1937_v51 = vor.u32 %v1936_v42, %v1933_v35  ;;  %v4954_v42 = vld [vmem:[%s5159_s11 + $0x74] sm:$0x1] }
  0xcd   : > { %v1134_v16 = vrot.slane %v4953_v15, 5 }
  0xce   : > { %v5524_v3 = vpop.f32.mrf.mxu0 }
  0xcf   : > { %4562 = vmatmul.msk.bf16.gmra.mxu0 %vm656_vm4, %v2161_v57  ;;  %v5529_v6 = vpop.f32.mrf.mxu3  ;;  %v1198_v57 = vunpack.c.l.b16 %v1124_v48 }
  0xd0   : > { %4352 = vmatmul.msk.bf16.gmra.mxu1 %vm656_vm4, %v4860_v43 }
  0xd1   : > { %v5533_v17 = vpop.f32.mrf.mxu1  ;;  %v1222_v4 = vpack.c.b16 %v1198_v57, %v1197_v56  ;;  %v4862_v57 = vld [vmem:[%s5159_s11 + $0x60] sm:$0xff] }
  0xd5   : > { %v5540_v26 = vpop.f32.mrf.mxu2  ;;  %4385 = vmatmul.msk.bf16.gmra.mxu2 %vm656_vm4, %v1221_v11  ;;  %v1127_v11 = vrot.slane %v4951_v10, 5 }
  0xd7   : > { %v1129_v32 = vrot.slane %v1127_v11, 4  ;;  %v1128_v50 = vsel %vm5345_vm7, %v4370_v21, %v1127_v11  ;;  %v1968_v21 = vshrl.u32 %v4536_v14, 16 }
  0xd8   : > { %v5546_v44 = vpop.f32.mrf.mxu0  ;;  %v1199_v20 = vunpack.c.l.b16 %v1128_v50  ;;  %v4371_v50 = vrot.slane %v1027_v23, 9 }
  0xd9   : > { %v5548_v45 = vpop.f32.mrf.mxu3  ;;  %v1131_v48 = vsel %vm5345_vm7, %v1129_v32, %v1130_v24 }
  0xda   : > { %4498 = vmatmul.msk.bf16.gmra.mxu3 %vm656_vm4, %v4876_v33  ;;  %v2139_v33 = vunpack.c.l.b16 %v1929_v25  ;;  %v1200_v61 = vunpack.c.l.b16 %v1131_v48  ;;  %v1136_v48 = vrot.slane %v1134_v16, 4 }
  0xdc   : > { %v2163_v27 = vpack.c.b16 %v2139_v33, %v2138_v31  ;;  %v1223_v11 = vpack.c.b16 %v1200_v61, %v1199_v20  ;;  %v1958_v31 = vshll.u32 %v4535_v13, 16  ;;  %v1964_v33 = vshll.u32 %v4536_v14, 16 }
  0xdd   : > { %v5556_v2 = vpop.f32.mrf.mxu1  ;;  %v5558_v43 = vpop.f32.mrf.mxu2  ;;  %v1970_v20 = vrot.slane %v1968_v21, 4 }
  0xdf   : > { %4563 = vmatmul.msk.bf16.gmra.mxu0 %vm656_vm4, %v2162_v52  ;;  %v1947_v52 = vor.u32 %v1946_v47, %v1942_v1  ;;  %v1137_v47 = vrot.slane %v4954_v42, 5 }
  0xe0   : > { %4353 = vmatmul.msk.bf16.gmra.mxu1 %vm656_vm4, %v4861_v54  ;;  %v5564_v5 = vpop.f32.mrf.mxu0  ;;  %v1950_v54 = vshll.u32 %v4534_v46, 16  ;;  %v4878_v46 = vld [vmem:[%s5159_s11 + $0x6c] sm:$0xff] }
  0xe1   : > { %v5571_v12 = vpop.f32.mrf.mxu3  ;;  %v1948_v8 = vrot.slane %v1947_v52, 4 }
  0xe2   : > { %v1952_v25 = vrot.slane %v1950_v54, 5 }
  0xe5   : > { %4386 = vmatmul.msk.bf16.gmra.mxu2 %vm656_vm4, %v1222_v4  ;;  %v5576_v29 = vpop.f32.mrf.mxu1  ;;  %v1938_v4 = vrot.slane %v1937_v51, 4 }
  0xe7   : > { %v1943_v19 = vsel %vm5171_vm3, %v1938_v4, %v1942_v1  ;;  %v4537_v4 = vld [vmem:[%s5159_s11 + $0x80] sm:$0x1] }
  0xe8   : > { %v5579_v40 = vpop.f32.mrf.mxu2 }
  0xea   : > { %4499 = vmatmul.msk.bf16.gmra.mxu3 %vm656_vm4, %v4877_v30  ;;  %v1955_v30 = vshrl.u32 %v4535_v13, 16  ;;  %v4863_v13 = vld [vmem:[%s5159_s11 + $0x6c] sm:$0xff] }
  0xec   : > { %v5587_v56 = vpop.f32.mrf.mxu0  ;;  %v1957_v54 = vrot.slane %v1955_v30, 4 }
  0xed   : > { %v5590_v59 = vpop.f32.mrf.mxu3  ;;  %v938_v60 = vpop.f32.mrf.mxu1 }
  0xee   : > { %v939_v62 = vadd.f32 %v938_v60, %v5464_v41  ;;  %v1953_v41 = vsel %vm5171_vm3, %v1948_v8, %v1952_v25  ;;  %v1966_v60 = vrot.slane %v1964_v33, 5  ;;  %v1135_v8 = vsel %vm5345_vm7, %v4371_v50, %v1134_v16 }
  0xef   : > { %4564 = vmatmul.msk.bf16.gmra.mxu0 %vm656_vm4, %v2163_v27  ;;  %v2140_v27 = vunpack.c.l.b16 %v1943_v19  ;;  %v2141_v51 = vunpack.c.l.b16 %v1953_v41  ;;  %v1974_v19 = vshll.u32 %v4537_v4, 16 }
  0xf0   : > { %v5594_v10 = vpop.f32.mrf.mxu2  ;;  %4354 = vmatmul.msk.bf16.gmra.mxu1 %vm656_vm4, %v4862_v57  ;;  %v1960_v57 = vrot.slane %v1958_v31, 5  ;;  %v1971_v15 = vor.u32 %v1970_v20, %v1966_v60 }
  0xf1   : > { %v2164_v25 = vpack.c.b16 %v2141_v51, %v2140_v27  ;;  %v1976_v42 = vrot.slane %v1974_v19, 5  ;;  %v4539_v27 = vld [vmem:[%s5159_s11 + $0x88] sm:$0xf]  ;;  %v4955_v51 = vld [vmem:[%s5159_s11 + $0x7c] sm:$0xf] }
  0xf2   : > { %v1961_v14 = vor.u32 %v1960_v57, %v1957_v54  ;;  %v1028_v54 = vld [vmem:[%s5159_s11 + $0x78] sm:$0xe] }
  0xf4   : > { %v5605_v24 = vpop.f32.mrf.mxu0  ;;  %v1962_v21 = vrot.slane %v1961_v14, 4 }
  0xf5   : > { %v5607_v32 = vpop.f32.mrf.mxu3  ;;  %4387 = vmatmul.msk.bf16.gmra.mxu2 %vm656_vm4, %v1223_v11  ;;  %v940_v35 = vpop.f32.mrf.mxu1 }
  0xf6   : > { %v941_v1 = vadd.f32 %v940_v35, %v5487_v9  ;;  %v1138_v9 = vsel %vm5345_vm7, %v1136_v48, %v1137_v47  ;;  %v1972_v35 = vrot.slane %v1971_v15, 4  ;;  %v4538_v47 = vld [vmem:[%s5159_s11 + $0x84] sm:$0xf]  ;;  %v4879_v15 = vld [vmem:[%s5159_s11 + $0x78] sm:$0xff] }
  0xf7   : > { %v1202_v30 = vunpack.c.l.b16 %v1138_v9  ;;  %v1982_v57 = vshll.u32 %v4538_v47, 16  ;;  %v1992_v9 = vshrl.u32 %v4539_v27, 16 }
  0xf8   : > { %v1291_v52 = vpop.f32.mrf.mxu2  ;;  %v1977_v4 = vsel %vm5171_vm3, %v1972_v35, %v1976_v42 }
  0xf9   : > { %v1371_v61 = vadd.f32 %v1291_v52, %v939_v62  ;;  %v1201_v62 = vunpack.c.l.b16 %v1135_v8  ;;  %v1141_v52 = vrot.slane %v4955_v51, 5  ;;  %v1988_v8 = vshll.u32 %v4539_v27, 16 }
  0xfa   : > { %4500 = vmatmul.msk.bf16.gmra.mxu3 %vm656_vm4, %v4878_v46  ;;  %v1994_v35 = vrot.slane %v1992_v9, 4 }
  0xfb   : > { %v1224_v48 = vpack.c.b16 %v1202_v30, %v1201_v62 }
  0xfc   : > { %v2232_v11 = vpop.f32.mrf.mxu0 }
  0xfd   : > { %v1578_v41 = vpop.f32.mrf.mxu3  ;;  %v943_v23 = vpop.f32.mrf.mxu1 }
  0xfe   : > { %v1658_v31 = vadd.f32 %v1578_v41, %v1371_v61  ;;  %v944_v16 = vadd.f32 %v943_v23, %v5506_v38  ;;  %v1979_v38 = vshrl.u32 %v4538_v47, 16  ;;  %v1967_v61 = vsel %vm5171_vm3, %v1962_v21, %v1966_v60 }
  0xff   : > { %4565 = vmatmul.msk.bf16.gmra.mxu0 %vm656_vm4, %v2164_v25  ;;  %v4956_v25 = vld [vmem:[%s5159_s11 + $0x80] sm:$0x1]  ;;  %v4372_v41 = vrot.slane %v1028_v54, 9  ;;  %v1143_v23 = vrot.slane %v1141_v52, 4  ;;  %v2142_v62 = vunpack.c.l.b16 %v1967_v61  ;;  %v2143_v60 = vunpack.c.l.b16 %v1977_v4 }
 0x100   : > { %v1293_v33 = vpop.f32.mrf.mxu2  ;;  %4355 = vmatmul.msk.bf16.gmra.mxu1 %vm656_vm4, %v4863_v13  ;;  %v5624_v46 = vadd.f32 %v2232_v11, %v1658_v31  ;;  %v1144_v11 = vrot.slane %v4956_v25, 5  ;;  %v1981_v30 = vrot.slane %v1979_v38, 4  ;;  %v1984_v31 = vrot.slane %v1982_v57, 5  ;;  %v4864_v38 = vld [vmem:[%s5159_s11 + $0x78] sm:$0xff] }
 0x101   : > { %v1372_v50 = vadd.f32 %v1293_v33, %v941_v1  ;;  %v1990_v21 = vrot.slane %v1988_v8, 5  ;;  %v2165_v27 = vpack.c.b16 %v2143_v60, %v2142_v62  ;;  %v4542_v62 = vld [vmem:[%s5159_s11 + $0x94] sm:$0xf]  ;;  %v4957_v60 = vld [vmem:[%s5159_s11 + $0x88] sm:$0xf] }
 0x102   : > { %v1985_v51 = vor.u32 %v1984_v31, %v1981_v30  ;;  %v1148_v30 = vrot.slane %v4957_v60, 5  ;;  %v1029_v31 = vld [vmem:[%s5159_s11 + $0x84] sm:$0xe] }
 0x103   : > { %v1995_v57 = vor.u32 %v1994_v35, %v1990_v21 }
 0x104   : > { %v2234_v20 = vpop.f32.mrf.mxu0  ;;  %v1986_v25 = vrot.slane %v1985_v51, 4 }
 0x105   : > { %v1580_v1 = vpop.f32.mrf.mxu3  ;;  %4388 = vmatmul.msk.bf16.gmra.mxu2 %vm656_vm4, %v1224_v48  ;;  %v945_v13 = vpop.f32.mrf.mxu1  ;;  %v4540_v48 = vld [vmem:[%s5159_s11 + $0x8c] sm:$0x1] }
 0x106   : > { %v1659_v14 = vadd.f32 %v1580_v1, %v1372_v50  ;;  %v946_v19 = vadd.f32 %v945_v13, %v5524_v3  ;;  %v1142_v50 = vsel %vm5345_vm7, %v4372_v41, %v1141_v52  ;;  %v1145_v3 = vsel %vm5345_vm7, %v1143_v23, %v1144_v11 }
 0x107   : > { %v1998_v61 = vshll.u32 %v4540_v48, 16  ;;  %v1204_v8 = vunpack.c.l.b16 %v1145_v3  ;;  %v1996_v1 = vrot.slane %v1995_v57, 4  ;;  %v2016_v3 = vshrl.u32 %v4542_v62, 16  ;;  %v4880_v57 = vld [vmem:[%s5159_s11 + $0x84] sm:$0xff] }
 0x108   : > { %v1296_v33 = vpop.f32.mrf.mxu2  ;;  %v5637_v42 = vadd.f32 %v2234_v20, %v1659_v14  ;;  %v4541_v14 = vld [vmem:[%s5159_s11 + $0x90] sm:$0xf] }
 0x109   : > { %v1373_v47 = vadd.f32 %v1296_v33, %v944_v16  ;;  %v1203_v16 = vunpack.c.l.b16 %v1142_v50  ;;  %v2000_v13 = vrot.slane %v1998_v61, 5  ;;  %v2003_v33 = vshrl.u32 %v4541_v14, 16 }
 0x10a   : > { %4501 = vmatmul.msk.bf16.gmra.mxu3 %vm656_vm4, %v4879_v15  ;;  %v2006_v48 = vshll.u32 %v4541_v14, 16  ;;  %v2012_v50 = vshll.u32 %v4542_v62, 16  ;;  %v4373_v61 = vrot.slane %v1029_v31, 9 }
 0x10b   : > { %v1225_v23 = vpack.c.b16 %v1204_v8, %v1203_v16  ;;  %v2005_v8 = vrot.slane %v2003_v33, 4 }
 0x10c   : > { %v2237_v54 = vpop.f32.mrf.mxu0 }
 0x10d   : > { %v1583_v4 = vpop.f32.mrf.mxu3  ;;  %v948_v20 = vpop.f32.mrf.mxu1 }
 0x10e   : > { %v1660_v9 = vadd.f32 %v1583_v4, %v1373_v47  ;;  %v949_v52 = vadd.f32 %v948_v20, %v5546_v44  ;;  %v1991_v44 = vsel %vm5171_vm3, %v1986_v25, %v1990_v21  ;;  %v2001_v47 = vsel %vm5171_vm3, %v1996_v1, %v2000_v13 }
 0x10f   : > { %4566 = vmatmul.msk.bf16.gmra.mxu0 %vm656_vm4, %v2165_v27  ;;  %v4958_v27 = vld [vmem:[%s5159_s11 + $0x8c] sm:$0x1]  ;;  %v1150_v4 = vrot.slane %v1148_v30, 4  ;;  %v2144_v20 = vunpack.c.l.b16 %v1991_v44  ;;  %v2145_v16 = vunpack.c.l.b16 %v2001_v47  ;;  %v2008_v25 = vrot.slane %v2006_v48, 5  ;;  %v4865_v44 = vld [vmem:[%s5159_s11 + $0x84] sm:$0xff] }
 0x110   : > { %v1298_v11 = vpop.f32.mrf.mxu2  ;;  %4356 = vmatmul.msk.bf16.gmra.mxu1 %vm656_vm4, %v4864_v38  ;;  %v5650_v15 = vadd.f32 %v2237_v54, %v1660_v9  ;;  %v1151_v51 = vrot.slane %v4958_v27, 5  ;;  %v2018_v1 = vrot.slane %v2016_v3, 4 }
 0x111   : > { %v1374_v41 = vadd.f32 %v1298_v11, %v946_v19  ;;  %v2014_v11 = vrot.slane %v2012_v50, 5  ;;  %v2166_v62 = vpack.c.b16 %v2145_v16, %v2144_v20  ;;  %v2009_v31 = vor.u32 %v2008_v25, %v2005_v8  ;;  %v4545_v20 = vld [vmem:[%s5159_s11 + $0xa0] sm:$0xf]  ;;  %v4959_v16 = vld [vmem:[%s5159_s11 + $0x94] sm:$0xf] }
 0x112   : > { %v1155_v8 = vrot.slane %v4959_v16, 5 }
 0x113   : > { %v2019_v33 = vor.u32 %v2018_v1, %v2014_v11 }
 0x114   : > { %v2239_v35 = vpop.f32.mrf.mxu0 }
 0x115   : > { %v1585_v19 = vpop.f32.mrf.mxu3  ;;  %4389 = vmatmul.msk.bf16.gmra.mxu2 %vm656_vm4, %v1225_v23  ;;  %v950_v54 = vpop.f32.mrf.mxu1  ;;  %v4543_v23 = vld [vmem:[%s5159_s11 + $0x98] sm:$0x1] }
 0x116   : > { %v1661_v38 = vadd.f32 %v1585_v19, %v1374_v41  ;;  %v951_v21 = vadd.f32 %v950_v54, %v5564_v5  ;;  %v1149_v41 = vsel %vm5345_vm7, %v4373_v61, %v1148_v30  ;;  %v1152_v5 = vsel %vm5345_vm7, %v1150_v4, %v1151_v51 }
 0x117   : > { %v2022_v47 = vshll.u32 %v4543_v23, 16  ;;  %v1206_v50 = vunpack.c.l.b16 %v1152_v5  ;;  %v2010_v51 = vrot.slane %v2009_v31, 4  ;;  %v2020_v19 = vrot.slane %v2019_v33, 4  ;;  %v4881_v33 = vld [vmem:[%s5159_s11 + $0x90] sm:$0xff] }
 0x118   : > { %v1301_v9 = vpop.f32.mrf.mxu2  ;;  %v5663_v13 = vadd.f32 %v2239_v35, %v1661_v38  ;;  %v4544_v38 = vld [vmem:[%s5159_s11 + $0x9c] sm:$0xf]  ;;  %v2040_v5 = vshrl.u32 %v4545_v20, 16 }
 0x119   : > { %v1375_v14 = vadd.f32 %v1301_v9, %v949_v52  ;;  %v1205_v52 = vunpack.c.l.b16 %v1149_v41  ;;  %v2024_v54 = vrot.slane %v2022_v47, 5  ;;  %v1030_v9 = vld [vmem:[%s5159_s11 + $0x90] sm:$0xe]  ;;  %v2030_v25 = vshll.u32 %v4544_v38, 16 }
 0x11a   : > { %4502 = vmatmul.msk.bf16.gmra.mxu3 %vm656_vm4, %v4880_v57  ;;  %v2036_v41 = vshll.u32 %v4545_v20, 16 }
 0x11b   : > { %v1226_v4 = vpack.c.b16 %v1206_v50, %v1205_v52  ;;  %v2025_v23 = vsel %vm5171_vm3, %v2020_v19, %v2024_v54  ;;  %v2042_v19 = vrot.slane %v2040_v5, 4 }
 0x11c   : > { %v2242_v60 = vpop.f32.mrf.mxu0 }
 0x11d   : > { %v1588_v48 = vpop.f32.mrf.mxu3  ;;  %v953_v35 = vpop.f32.mrf.mxu1 }
 0x11e   : > { %v1662_v3 = vadd.f32 %v1588_v48, %v1375_v14  ;;  %v954_v30 = vadd.f32 %v953_v35, %v5587_v56  ;;  %v2027_v56 = vshrl.u32 %v4544_v38, 16  ;;  %v2015_v14 = vsel %vm5171_vm3, %v2010_v51, %v2014_v11 }
 0x11f   : > { %4567 = vmatmul.msk.bf16.gmra.mxu0 %vm656_vm4, %v2166_v62  ;;  %v4960_v62 = vld [vmem:[%s5159_s11 + $0x98] sm:$0x1]  ;;  %v4374_v48 = vrot.slane %v1030_v9, 9  ;;  %v1157_v35 = vrot.slane %v1155_v8, 4  ;;  %v2146_v52 = vunpack.c.l.b16 %v2015_v14  ;;  %v2147_v11 = vunpack.c.l.b16 %v2025_v23 }
 0x120   : > { %v1303_v27 = vpop.f32.mrf.mxu2  ;;  %4357 = vmatmul.msk.bf16.gmra.mxu1 %vm656_vm4, %v4865_v44  ;;  %v5676_v57 = vadd.f32 %v2242_v60, %v1662_v3  ;;  %v1158_v60 = vrot.slane %v4960_v62, 5  ;;  %v2029_v50 = vrot.slane %v2027_v56, 4  ;;  %v2032_v3 = vrot.slane %v2030_v25, 5  ;;  %v4866_v56 = vld [vmem:[%s5159_s11 + $0x90] sm:$0xff] }
 0x121   : > { %v1376_v61 = vadd.f32 %v1303_v27, %v951_v21  ;;  %v2038_v51 = vrot.slane %v2036_v41, 5  ;;  %v2167_v20 = vpack.c.b16 %v2147_v11, %v2146_v52  ;;  %v4548_v11 = vld [vmem:[%s5159_s11 + $0xac] sm:$0xf] }
 0x122   : > { %v2033_v16 = vor.u32 %v2032_v3, %v2029_v50  ;;  %v1031_v50 = vld [vmem:[%s5159_s11 + $0x9c] sm:$0xe] }
 0x123   : > { %v2043_v25 = vor.u32 %v2042_v19, %v2038_v51 }
 0x124   : > { %v2244_v1 = vpop.f32.mrf.mxu0 }
 0x125   : > { %v1590_v21 = vpop.f32.mrf.mxu3  ;;  %4390 = vmatmul.msk.bf16.gmra.mxu2 %vm656_vm4, %v1226_v4  ;;  %v955_v44 = vpop.f32.mrf.mxu1  ;;  %v4546_v4 = vld [vmem:[%s5159_s11 + $0xa4] sm:$0x1] }
 0x126   : > { %v1663_v31 = vadd.f32 %v1590_v21, %v1376_v61  ;;  %v956_v47 = vadd.f32 %v955_v44, %v5605_v24  ;;  %v1156_v61 = vsel %vm5345_vm7, %v4374_v48, %v1155_v8  ;;  %v1159_v24 = vsel %vm5345_vm7, %v1157_v35, %v1158_v60  ;;  %v4547_v44 = vld [vmem:[%s5159_s11 + $0xa8] sm:$0xf]  ;;  %v4961_v35 = vld [vmem:[%s5159_s11 + $0xa0] sm:$0xf] }
 0x127   : > { %v2046_v14 = vshll.u32 %v4546_v4, 16  ;;  %v1208_v41 = vunpack.c.l.b16 %v1159_v24  ;;  %v2034_v8 = vrot.slane %v2033_v16, 4  ;;  %v2044_v60 = vrot.slane %v2043_v25, 4 }
 0x128   : > { %v1306_v27 = vpop.f32.mrf.mxu2  ;;  %v5689_v54 = vadd.f32 %v2244_v1, %v1663_v31  ;;  %v1162_v52 = vrot.slane %v4961_v35, 5  ;;  %v2054_v19 = vshll.u32 %v4547_v44, 16  ;;  %v2064_v24 = vshrl.u32 %v4548_v11, 16 }
 0x129   : > { %v1377_v38 = vadd.f32 %v1306_v27, %v954_v30  ;;  %v1207_v30 = vunpack.c.l.b16 %v1156_v61  ;;  %v2048_v21 = vrot.slane %v2046_v14, 5  ;;  %v2039_v3 = vsel %vm5171_vm3, %v2034_v8, %v2038_v51 }
 0x12a   : > { %4503 = vmatmul.msk.bf16.gmra.mxu3 %vm656_vm4, %v4881_v33  ;;  %v2051_v27 = vshrl.u32 %v4547_v44, 16  ;;  %v2060_v61 = vshll.u32 %v4548_v11, 16  ;;  %v1164_v25 = vrot.slane %v1162_v52, 4  ;;  %v2148_v51 = vunpack.c.l.b16 %v2039_v3  ;;  %v4549_v11 = vld [vmem:[%s5159_s11 + $0xb0] sm:$0x1]  ;;  %v4867_v3 = vld [vmem:[%s5159_s11 + $0x9c] sm:$0xff] }
 0x12b   : > { %v1227_v48 = vpack.c.b16 %v1208_v41, %v1207_v30  ;;  %v2049_v4 = vsel %vm5171_vm3, %v2044_v60, %v2048_v21  ;;  %v2056_v8 = vrot.slane %v2054_v19, 5  ;;  %v2066_v21 = vrot.slane %v2064_v24, 4 }
 0x12c   : > { %v2247_v9 = vpop.f32.mrf.mxu0  ;;  %v2149_v41 = vunpack.c.l.b16 %v2049_v4  ;;  %v2062_v60 = vrot.slane %v2060_v61, 5  ;;  %v2070_v4 = vshll.u32 %v4549_v11, 16 }
 0x12d   : > { %v1593_v1 = vpop.f32.mrf.mxu3  ;;  %v958_v23 = vpop.f32.mrf.mxu1 }
 0x12e   : > { %v1664_v5 = vadd.f32 %v1593_v1, %v1377_v38  ;;  %v4882_v1 = vld [vmem:[%s5159_s11 + $0x9c] sm:$0xff]  ;;  %v959_v30 = vadd.f32 %v958_v23, %v5440_v7  ;;  %v2168_v7 = vpack.c.b16 %v2149_v41, %v2148_v51  ;;  %v2072_v51 = vrot.slane %v2070_v4, 5 }
 0x12f   : > { %4568 = vmatmul.msk.bf16.gmra.mxu0 %vm656_vm4, %v2167_v20  ;;  %v4962_v20 = vld [vmem:[%s5159_s11 + $0xa4] sm:$0x1] }
 0x130   : > { %v1308_v62 = vpop.f32.mrf.mxu2  ;;  %4358 = vmatmul.msk.bf16.gmra.mxu1 %vm656_vm4, %v4866_v56  ;;  %v5701_v31 = vadd.f32 %v2247_v9, %v1664_v5  ;;  %v1165_v16 = vrot.slane %v4962_v20, 5  ;;  %v4375_v56 = vrot.slane %v1031_v50, 9  ;;  %v2053_v5 = vrot.slane %v2051_v27, 4 }
 0x131   : > { %v1378_v33 = vadd.f32 %v1308_v62, %v956_v47 }
 0x132   : > { %v2057_v23 = vor.u32 %v2056_v8, %v2053_v5 }
 0x134   : > { %v2249_v38 = vpop.f32.mrf.mxu0 }
 0x135   : > { %v1595_v47 = vpop.f32.mrf.mxu3  ;;  %4391 = vmatmul.msk.bf16.gmra.mxu2 %vm656_vm4, %v1227_v48  ;;  %v960_v9 = vpop.f32.mrf.mxu1  ;;  %v1163_v48 = vsel %vm5345_vm7, %v4375_v56, %v1162_v52  ;;  %v4550_v52 = vld [vmem:[%s5159_s11 + $0xb4] sm:$0xf]  ;;  %v2058_v56 = vrot.slane %v2057_v23, 4 }
 0x136   : > { %v1665_v14 = vadd.f32 %v1595_v47, %v1378_v33  ;;  %v1166_v33 = vsel %vm5345_vm7, %v1164_v25, %v1165_v16  ;;  %v1209_v27 = vunpack.c.l.b16 %v1163_v48  ;;  %v4551_v47 = vld [vmem:[%s5159_s11 + $0xb8] sm:$0xf]  ;;  %v961_v16 = vadd.f32 %v960_v9, %v5456_v34 }
 0x137   : > { %v1210_v19 = vunpack.c.l.b16 %v1166_v33  ;;  %v2075_v5 = vshrl.u32 %v4550_v52, 16  ;;  %v2078_v8 = vshll.u32 %v4550_v52, 16  ;;  %v2088_v48 = vshrl.u32 %v4551_v47, 16  ;;  %v1032_v33 = vld [vmem:[%s5159_s11 + $0xa8] sm:$0xe] }
 0x138   : > { %v1311_v62 = vpop.f32.mrf.mxu2  ;;  %v5714_v44 = vadd.f32 %v2249_v38, %v1665_v14  ;;  %v2067_v38 = vor.u32 %v2066_v21, %v2062_v60  ;;  %v4963_v21 = vld [vmem:[%s5159_s11 + $0xac] sm:$0xf]  ;;  %v2063_v9 = vsel %vm5171_vm3, %v2058_v56, %v2062_v60 }
 0x139   : > { %v1379_v35 = vadd.f32 %v1311_v62, %v959_v30  ;;  %v1228_v14 = vpack.c.b16 %v1210_v19, %v1209_v27  ;;  %v2084_v62 = vshll.u32 %v4551_v47, 16  ;;  %v2077_v27 = vrot.slane %v2075_v5, 4 }
 0x13a   : > { %4504 = vmatmul.msk.bf16.gmra.mxu3 %vm656_vm4, %v4882_v1  ;;  %v2068_v1 = vrot.slane %v2067_v38, 4  ;;  %v2080_v19 = vrot.slane %v2078_v8, 5  ;;  %v2090_v47 = vrot.slane %v2088_v48, 4  ;;  %v4868_v48 = vld [vmem:[%s5159_s11 + $0xa8] sm:$0xff] }
 0x13b   : > { %v2086_v38 = vrot.slane %v2084_v62, 5 }
 0x13c   : > { %v2252_v50 = vpop.f32.mrf.mxu0  ;;  %v2073_v11 = vsel %vm5171_vm3, %v2068_v1, %v2072_v51 }
 0x13d   : > { %v1598_v61 = vpop.f32.mrf.mxu3  ;;  %v963_v24 = vpop.f32.mrf.mxu1  ;;  %v2151_v56 = vunpack.c.l.b16 %v2073_v11  ;;  %v2091_v8 = vor.u32 %v2090_v47, %v2086_v38 }
 0x13e   : > { %v1666_v20 = vadd.f32 %v1598_v61, %v1379_v35  ;;  %v1169_v35 = vrot.slane %v4963_v21, 5  ;;  %v4883_v61 = vld [vmem:[%s5159_s11 + $0xa8] sm:$0xff]  ;;  %v964_v60 = vadd.f32 %v963_v24, %v5476_v58 }
 0x13f   : > { %4569 = vmatmul.msk.bf16.gmra.mxu0 %vm656_vm4, %v2168_v7  ;;  %v4964_v7 = vld [vmem:[%s5159_s11 + $0xb0] sm:$0x1] }
 0x140   : > { %v1313_v25 = vpop.f32.mrf.mxu2  ;;  %4359 = vmatmul.msk.bf16.gmra.mxu1 %vm656_vm4, %v4867_v3  ;;  %v5728_v30 = vadd.f32 %v2252_v50, %v1666_v20  ;;  %v1172_v23 = vrot.slane %v4964_v7, 5  ;;  %v4376_v20 = vrot.slane %v1032_v33, 9  ;;  %v1171_v52 = vrot.slane %v1169_v35, 4 }
 0x141   : > { %v1380_v41 = vadd.f32 %v1313_v25, %v961_v16  ;;  %v2150_v16 = vunpack.c.l.b16 %v2063_v9  ;;  %v4552_v25 = vld [vmem:[%s5159_s11 + $0xbc] sm:$0x1] }
 0x142   : > { %v1173_v5 = vsel %vm5345_vm7, %v1171_v52, %v1172_v23  ;;  %v2094_v58 = vshll.u32 %v4552_v25, 16  ;;  %v4554_v52 = vld [vmem:[%s5159_s11 + $0xc4] sm:$0xf] }
 0x143   : > { %v2169_v24 = vpack.c.b16 %v2151_v56, %v2150_v16  ;;  %v1212_v11 = vunpack.c.l.b16 %v1173_v5  ;;  %v1033_v16 = vld [vmem:[%s5159_s11 + $0xb4] sm:$0xe]  ;;  %v4966_v56 = vld [vmem:[%s5159_s11 + $0xb8] sm:$0xf]  ;;  %v2112_v5 = vshrl.u32 %v4554_v52, 16 }
 0x144   : > { %v2254_v34 = vpop.f32.mrf.mxu0  ;;  %v1176_v25 = vrot.slane %v4966_v56, 5 }
 0x145   : > { %v1600_v50 = vpop.f32.mrf.mxu3  ;;  %4392 = vmatmul.msk.bf16.gmra.mxu2 %vm656_vm4, %v1228_v14  ;;  %v965_v3 = vpop.f32.mrf.mxu1  ;;  %v2081_v14 = vor.u32 %v2080_v19, %v2077_v27  ;;  %v2096_v27 = vrot.slane %v2094_v58, 5  ;;  %v4553_v19 = vld [vmem:[%s5159_s11 + $0xc0] sm:$0xf]  ;;  %v4967_v58 = vld [vmem:[%s5159_s11 + $0x14] sm:$0x1] }
 0x146   : > { %v1667_v4 = vadd.f32 %v1600_v50, %v1380_v41  ;;  %v1170_v41 = vsel %vm5345_vm7, %v4376_v20, %v1169_v35  ;;  %v2092_v35 = vrot.slane %v2091_v8, 4  ;;  %v966_v23 = vadd.f32 %v965_v3, %v5493_v28 }
 0x147   : > { %v1211_v9 = vunpack.c.l.b16 %v1170_v41  ;;  %v2082_v50 = vrot.slane %v2081_v14, 4  ;;  %v2099_v3 = vshrl.u32 %v4553_v19, 16  ;;  %v2102_v14 = vshll.u32 %v4553_v19, 16  ;;  %v4884_v19 = vld [vmem:[%s5159_s11 + $0xb4] sm:$0xff] }
 0x148   : > { %v1316_v1 = vpop.f32.mrf.mxu2  ;;  %v5741_v51 = vadd.f32 %v2254_v34, %v1667_v4  ;;  %v4965_v4 = vld [vmem:[%s5159_s11 + $0x10] sm:$0xf]  ;;  %v2097_v28 = vsel %vm5171_vm3, %v2092_v35, %v2096_v27  ;;  %v2108_v41 = vshll.u32 %v4554_v52, 16  ;;  %v1178_v35 = vrot.slane %v1176_v25, 4  ;;  %v4573_v27 = vld [vmem:[%s5159_s11 + $0xc] sm:$0xe] }
 0x149   : > { %v1381_v21 = vadd.f32 %v1316_v1, %v964_v60  ;;  %v1229_v60 = vpack.c.b16 %v1212_v11, %v1211_v9  ;;  %v4968_v9 = vld [vmem:[%s5159_s11 + $0xbc] sm:$0x1]  ;;  %v4589_v52 = vrot.slane %v4573_v27, 9 }
 0x14a   : > { %4505 = vmatmul.msk.bf16.gmra.mxu3 %vm656_vm4, %v4883_v61  ;;  %v2410_v61 = vrot.slane %v4965_v4, 5  ;;  %v2101_v4 = vrot.slane %v2099_v3, 4 }
 0x14c   : > { %v2257_v62 = vpop.f32.mrf.mxu0  ;;  %v2412_v8 = vrot.slane %v2410_v61, 4 }
 0x14d   : > { %v1603_v33 = vpop.f32.mrf.mxu3  ;;  %v968_v34 = vpop.f32.mrf.mxu1 }
 0x14e   : > { %v1668_v7 = vadd.f32 %v1603_v33, %v1381_v21  ;;  %v2087_v21 = vsel %vm5171_vm3, %v2082_v50, %v2086_v38  ;;  %v4377_v33 = vrot.slane %v1033_v16, 9  ;;  %v969_v56 = vadd.f32 %v968_v34, %v5513_v53 }
 0x14f   : > { %4570 = vmatmul.msk.bf16.gmra.mxu0 %vm656_vm4, %v2169_v24  ;;  %v2413_v24 = vrot.slane %v4967_v58, 5  ;;  %v2152_v38 = vunpack.c.l.b16 %v2087_v21  ;;  %v2110_v16 = vrot.slane %v2108_v41, 5  ;;  %v2114_v58 = vrot.slane %v2112_v5, 4  ;;  %v4555_v21 = vld [vmem:[%s5159_s11 + $0xc8] sm:$0x1] }
 0x150   : > { %v1318_v20 = vpop.f32.mrf.mxu2  ;;  %4360 = vmatmul.msk.bf16.gmra.mxu1 %vm656_vm4, %v4868_v48  ;;  %v5757_v1 = vadd.f32 %v2257_v62, %v1668_v7  ;;  %v1179_v62 = vrot.slane %v4968_v9, 5  ;;  %v2153_v7 = vunpack.c.l.b16 %v2097_v28  ;;  %v2411_v28 = vsel %vm5345_vm7, %v4589_v52, %v2410_v61  ;;  %v4735_v41 = vld [vmem:[%s5159_s11 + $0x18] sm:$0xf] }
 0x151   : > { %v1382_v47 = vadd.f32 %v1318_v20, %v966_v23  ;;  %v2104_v20 = vrot.slane %v2102_v14, 5  ;;  %v2522_v53 = vunpack.c.l.b16 %v2411_v28  ;;  %v2118_v27 = vshll.u32 %v4555_v21, 16 }
 0x152   : > { %v1180_v14 = vsel %vm5345_vm7, %v1178_v35, %v1179_v62  ;;  %v2170_v5 = vpack.c.b16 %v2153_v7, %v2152_v38  ;;  %v3078_v62 = vshrl.u32 %v4735_v41, 16  ;;  %v3081_v35 = vshll.u32 %v4735_v41, 16 }
 0x154   : > { %v2259_v48 = vpop.f32.mrf.mxu0  ;;  %v3080_v21 = vrot.slane %v3078_v62, 4 }
 0x155   : > { %v1605_v11 = vpop.f32.mrf.mxu3  ;;  %4393 = vmatmul.msk.bf16.gmra.mxu2 %vm656_vm4, %v1229_v60  ;;  %v970_v50 = vpop.f32.mrf.mxu1  ;;  %v1177_v60 = vsel %vm5345_vm7, %v4377_v33, %v1176_v25  ;;  %v5781_v25 = vld [vmem:[%s5159_s11 + $0x1c] sm:$0xf]  ;;  %v2115_v33 = vor.u32 %v2114_v58, %v2110_v16 }
 0x156   : > { %v1669_v23 = vadd.f32 %v1605_v11, %v1382_v47  ;;  %v2414_v47 = vsel %vm5345_vm7, %v2412_v8, %v2413_v24  ;;  %v2105_v11 = vor.u32 %v2104_v20, %v2101_v4  ;;  %v4869_v24 = vld [vmem:[%s5159_s11 + $0xb4] sm:$0xff]  ;;  %v3091_v38 = vshrl.u32 %v5781_v25, 16 }
 0x157   : > { %v2523_v34 = vunpack.c.l.b16 %v2414_v47  ;;  %v971_v4 = vadd.f32 %v970_v50, %v5533_v17 }
 0x158   : > { %v1321_v9 = vpop.f32.mrf.mxu2  ;;  %v5785_v52 = vadd.f32 %v2259_v48, %v1669_v23  ;;  %v2106_v48 = vrot.slane %v2105_v11, 4  ;;  %v2116_v23 = vrot.slane %v2115_v33, 4  ;;  %v3093_v41 = vrot.slane %v3091_v38, 4 }
 0x159   : > { %v1383_v3 = vadd.f32 %v1321_v9, %v969_v56  ;;  %v5783_v61 = vpack.c.b16 %v2523_v34, %v2522_v53  ;;  %v1213_v56 = vunpack.c.l.b16 %v1177_v60  ;;  %v1214_v9 = vunpack.c.l.b16 %v1180_v14 }
 0x15a   : > { %4506 = vmatmul.msk.bf16.gmra.mxu3 %vm656_vm4, %v4884_v19  ;;  %6566 = vst [vmem:[#allocation5_spill] sm:$0xff] %v5785_v52  ;;  %v3087_v19 = vshll.u32 %v5781_v25, 16  ;;  %v2120_v60 = vrot.slane %v2118_v27, 5  ;;  %v3083_v14 = vrot.slane %v3081_v35, 5  ;;  %v2111_v17 = vsel %vm5171_vm3, %v2106_v48, %v2110_v16  ;;  %v4800_v48 = vld [vmem:[%s5159_s11 + $0x18] sm:$0xe] }
 0x15b   : > { %v1230_v58 = vpack.c.b16 %v1214_v9, %v1213_v56  ;;  %v4885_v9 = vld [vmem:[%s5159_s11 + $0xc0] sm:$0xff]  ;;  %v2154_v16 = vunpack.c.l.b16 %v2111_v17 }
 0x15c   : > { %v2262_v8 = vpop.f32.mrf.mxu0  ;;  %v3089_v34 = vrot.slane %v3087_v19, 5  ;;  %v2121_v50 = vsel %vm5171_vm3, %v2116_v23, %v2120_v60  ;;  %v3084_v27 = vor.u32 %v3083_v14, %v3080_v21  ;;  %v4738_v23 = vld [vmem:[%s5159_s11 + $0x24] sm:$0xf]  ;;  %v5811_v60 = vld [vmem:[%s5159_s11 + $0x28] sm:$0xf] }
 0x15d   : > { %v1608_v28 = vpop.f32.mrf.mxu3  ;;  %v973_v47 = vpop.f32.mrf.mxu1  ;;  %v2155_v35 = vunpack.c.l.b16 %v2121_v50 }
 0x15e   : > { %v1670_v7 = vadd.f32 %v1608_v28, %v1383_v3  ;;  %v5796_v3 = vld [vmem:[%s5159_s11 + $0x20] sm:$0x1]  ;;  %v974_v62 = vadd.f32 %v973_v47, %v5556_v2  ;;  %v3085_v38 = vrot.slane %v3084_v27, 4  ;;  %v4969_v47 = vld [vmem:[%s5159_s11 + $0x1c] sm:$0xf] }
 0x15f   : > { %4571 = vmatmul.msk.bf16.gmra.mxu0 %vm656_vm4, %v2170_v5  ;;  %v2417_v14 = vrot.slane %v4969_v47, 5  ;;  %v4574_v27 = vld [vmem:[%s5159_s11 + $0x18] sm:$0xe] }
 0x160   : > { %v1323_v20 = vpop.f32.mrf.mxu2  ;;  %4361 = vmatmul.msk.bf16.gmra.mxu1 %vm656_vm4, %v4869_v24  ;;  %v5793_v52 = vadd.f32 %v2262_v8, %v1670_v7  ;;  %v3094_v24 = vor.u32 %v3093_v41, %v3089_v34  ;;  %v3097_v8 = vshll.u32 %v5796_v3, 16  ;;  %v3090_v17 = vsel %vm5171_vm3, %v3085_v38, %v3089_v34 }
 0x161   : > { %v1384_v53 = vadd.f32 %v1323_v20, %v971_v4  ;;  %v2171_v20 = vpack.c.b16 %v2155_v35, %v2154_v16  ;;  %v3752_v34 = vrot.slane %v5796_v3, 5  ;;  %v4970_v16 = vld [vmem:[%s5159_s11 + $0x20] sm:$0x1]  ;;  %v4590_v38 = vrot.slane %v4574_v27, 9 }
 0x162   : > { %v3095_v7 = vrot.slane %v3094_v24, 4  ;;  %v3099_v4 = vrot.slane %v3097_v8, 5  ;;  %v3102_v24 = vshrl.u32 %v4738_v23, 16  ;;  %v3105_v8 = vshll.u32 %v4738_v23, 16 }
 0x163   : > { %v2420_v35 = vrot.slane %v4970_v16, 5  ;;  %v2418_v27 = vsel %vm5345_vm7, %v4590_v38, %v2417_v14  ;;  %v4741_v38 = vld [vmem:[%s5159_s11 + $0x30] sm:$0xf] }
 0x164   : > { %v2264_v5 = vpop.f32.mrf.mxu0  ;;  %v3100_v50 = vsel %vm5171_vm3, %v3095_v7, %v3099_v4  ;;  %v2419_v7 = vrot.slane %v2417_v14, 4  ;;  %v3107_v3 = vrot.slane %v3105_v8, 5 }
 0x165   : > { %v1610_v11 = vpop.f32.mrf.mxu3  ;;  %4394 = vmatmul.msk.bf16.gmra.mxu2 %vm656_vm4, %v1230_v58  ;;  %v975_v33 = vpop.f32.mrf.mxu1  ;;  %v3749_v58 = vrot.slane %v5781_v25, 5  ;;  %v3464_v23 = vunpack.c.l.b16 %v3100_v50 }
 0x166   : > { %v1671_v56 = vadd.f32 %v1610_v11, %v1384_v53  ;;  %v4816_v11 = vrot.slane %v4800_v48, 9  ;;  %v4886_v48 = vld [vmem:[%s5159_s11 + $0x18] sm:$0xff]  ;;  %v2421_v50 = vsel %vm5345_vm7, %v2419_v7, %v2420_v35  ;;  %v5851_v7 = vld [vmem:[%s5159_s11 + $0x34] sm:$0xf] }
 0x168   : > { %v1326_v28 = vpop.f32.mrf.mxu2  ;;  %v5813_v21 = vadd.f32 %v2264_v5, %v1671_v56  ;;  %v3111_v5 = vshll.u32 %v5811_v60, 16  ;;  %v3115_v56 = vshrl.u32 %v5811_v60, 16 }
 0x169   : > { %v1385_v19 = vadd.f32 %v1326_v28, %v974_v62  ;;  %v3751_v62 = vrot.slane %v3749_v58, 4 }
 0x16a   : > { %4507 = vmatmul.msk.bf16.gmra.mxu3 %vm656_vm4, %v4885_v9  ;;  %v976_v9 = vadd.f32 %v975_v33, %v5576_v29  ;;  %v3104_v33 = vrot.slane %v3102_v24, 4  ;;  %v5834_v47 = vrot.slane %v3111_v5, 5 }
 0x16c   : > { %v2267_v2 = vpop.f32.mrf.mxu0  ;;  %v3108_v5 = vor.u32 %v3107_v3, %v3104_v33  ;;  %v4801_v33 = vld [vmem:[%s5159_s11 + $0x24] sm:$0xe] }
 0x16d   : > { %v1613_v53 = vpop.f32.mrf.mxu3  ;;  %v978_v41 = vpop.f32.mrf.mxu1 }
 0x16e   : > { %v1672_v25 = vadd.f32 %v1613_v53, %v1385_v19  ;;  %v3463_v19 = vunpack.c.l.b16 %v3090_v17  ;;  %v3117_v53 = vrot.slane %v3115_v56, 4  ;;  %v979_v14 = vadd.f32 %v978_v41, %v5458_v37 }
 0x16f   : > { %4572 = vmatmul.msk.bf16.gmra.mxu0 %vm656_vm4, %v2171_v20  ;;  %v3750_v20 = vsel %vm5345_vm7, %v4816_v11, %v3749_v58  ;;  %v3756_v37 = vrot.slane %v5811_v60, 5 }
 0x170   : > { %v1328_v28 = vpop.f32.mrf.mxu2  ;;  %4606 = vmatmul.msk.bf16.vlgmr.msra.gmra.mxu1 %vm656_vm4, %v5783_v61  ;;  %v5832_v29 = vadd.f32 %v2267_v2, %v1672_v25  ;;  %v3753_v61 = vsel %vm5345_vm7, %v3751_v62, %v3752_v34  ;;  %v3495_v2 = vpack.c.b16 %v3464_v23, %v3463_v19  ;;  %v3861_v11 = vunpack.c.l.b16 %v3750_v20 }
 0x171   : > { %v1386_v4 = vadd.f32 %v1328_v28, %v976_v9  ;;  %v5843_v9 = vld [vmem:[%s5159_s11 + $0x2c] sm:$0x1]  ;;  %v3862_v8 = vunpack.c.l.b16 %v3753_v61  ;;  %v3118_v56 = vor.u32 %v3117_v53, %v5834_v47  ;;  %v2524_v62 = vunpack.c.l.b16 %v2418_v27 }
 0x172   : > { %v2525_v34 = vunpack.c.l.b16 %v2421_v50  ;;  %v3121_v16 = vshll.u32 %v5843_v9, 16  ;;  %v3126_v53 = vshrl.u32 %v4741_v38, 16  ;;  %v3129_v61 = vshll.u32 %v4741_v38, 16 }
 0x173   : > { %v3893_v19 = vpack.c.b16 %v3862_v8, %v3861_v11  ;;  %v3135_v27 = vshll.u32 %v5851_v7, 16  ;;  %v3139_v50 = vshrl.u32 %v5851_v7, 16  ;;  %v4971_v11 = vld [vmem:[%s5159_s11 + $0x28] sm:$0xf]  ;;  %v3759_v60 = vrot.slane %v5843_v9, 5 }
 0x174   : > { %v2269_v17 = vpop.f32.mrf.mxu0  ;;  %v2555_v23 = vpack.c.b16 %v2525_v34, %v2524_v62  ;;  %v3123_v20 = vrot.slane %v3121_v16, 5  ;;  %v2424_v8 = vrot.slane %v4971_v11, 5  ;;  %v4817_v62 = vrot.slane %v4801_v33, 9  ;;  %v4887_v11 = vld [vmem:[%s5159_s11 + $0x24] sm:$0xff] }
 0x175   : > { %v1615_v58 = vpop.f32.mrf.mxu3  ;;  %4719 = vmatmul.msk.bf16.vlgmr.msra.gmra.mxu2 %vm656_vm4, %v4886_v48  ;;  %v980_v24 = vpop.f32.mrf.mxu1  ;;  %v3119_v48 = vrot.slane %v3118_v56, 4  ;;  %v3131_v33 = vrot.slane %v3129_v61, 5  ;;  %v5872_v9 = vrot.slane %v3135_v27, 5 }
 0x176   : > { %v1673_v25 = vadd.f32 %v1615_v58, %v1386_v4  ;;  %v3109_v4 = vrot.slane %v3108_v5, 4  ;;  %v4972_v5 = vld [vmem:[%s5159_s11 + $0x2c] sm:$0x1] }
 0x177   : > { %v2427_v56 = vrot.slane %v4972_v5, 5  ;;  %v3124_v16 = vsel %vm5171_vm3, %v3119_v48, %v3123_v20  ;;  %v3757_v20 = vsel %vm5345_vm7, %v4817_v62, %v3756_v37 }
 0x178   : > { %v1331_v35 = vpop.f32.mrf.mxu2  ;;  %v5856_v41 = vadd.f32 %v2269_v17, %v1673_v25  ;;  %v4575_v17 = vld [vmem:[%s5159_s11 + $0x24] sm:$0xe]  ;;  %v981_v25 = vadd.f32 %v980_v24, %v5479_v63  ;;  %v3114_v34 = vsel %vm5171_vm3, %v3109_v4, %v5834_v47  ;;  %v2426_v24 = vrot.slane %v2424_v8, 4 }
 0x179   : > { %v1387_v28 = vadd.f32 %v1331_v35, %v979_v14  ;;  %v3758_v35 = vrot.slane %v3756_v37, 4  ;;  %v4591_v63 = vrot.slane %v4575_v17, 9  ;;  %v3465_v47 = vunpack.c.l.b16 %v3114_v34 }
 0x17a   : > { %4784 = vmatmul.msk.bf16.vlgmr.msra.gmra.mxu3 %vm656_vm4, %v3495_v2  ;;  %6567 = vst [vmem:[#allocation6_spill] sm:$0xff] %v5856_v41  ;;  %v3466_v4 = vunpack.c.l.b16 %v3124_v16  ;;  %v5878_v41 = vld [vmem:[%s5159_s11 + $0x38] sm:$0x1] }
 0x17b   : > { %v3145_v37 = vshll.u32 %v5878_v41, 16 }
 0x17c   : > { %v2272_v3 = vpop.f32.mrf.mxu0  ;;  %v3496_v17 = vpack.c.b16 %v3466_v4, %v3465_v47  ;;  %v4973_v4 = vld [vmem:[%s5159_s11 + $0x34] sm:$0xf] }
 0x17d   : > { %v1618_v58 = vpop.f32.mrf.mxu3  ;;  %v983_v2 = vpop.f32.mrf.mxu1 }
 0x17e   : > { %v1674_v14 = vadd.f32 %v1618_v58, %v1387_v28  ;;  %v3128_v28 = vrot.slane %v3126_v53, 4  ;;  %v3141_v58 = vrot.slane %v3139_v50, 4  ;;  %v2428_v50 = vsel %vm5345_vm7, %v2426_v24, %v2427_v56  ;;  %v5897_v24 = vld [vmem:[%s5159_s11 + $0x40] sm:$0xf] }
 0x17f   : > { %4833 = vmatmul.msk.bf16.vlgmr.msra.gmra.mxu0 %vm656_vm4, %v3893_v19 }
 0x180   : > { %v1333_v38 = vpop.f32.mrf.mxu2  ;;  %4607 = vmatmul.msk.bf16.gmra.mxu1 %vm656_vm4, %v2555_v23  ;;  %v5875_v5 = vadd.f32 %v2272_v3, %v1674_v14  ;;  %v3760_v23 = vsel %vm5345_vm7, %v3758_v35, %v3759_v60  ;;  %v3132_v53 = vor.u32 %v3131_v33, %v3128_v28  ;;  %v2425_v3 = vsel %vm5345_vm7, %v4591_v63, %v2424_v8 }
 0x181   : > { %v1388_v19 = vadd.f32 %v1333_v38, %v981_v25  ;;  %v3142_v14 = vor.u32 %v3141_v58, %v5872_v9  ;;  %v984_v60 = vadd.f32 %v983_v2, %v5496_v22  ;;  %v3863_v25 = vunpack.c.l.b16 %v3757_v20  ;;  %v4802_v58 = vld [vmem:[%s5159_s11 + $0x30] sm:$0xe] }
 0x182   : > { %v3864_v34 = vunpack.c.l.b16 %v3760_v23  ;;  %v2526_v35 = vunpack.c.l.b16 %v2425_v3  ;;  %v2527_v8 = vunpack.c.l.b16 %v2428_v50  ;;  %v3133_v28 = vrot.slane %v3132_v53, 4 }
 0x183   : > { %v3143_v56 = vrot.slane %v3142_v14, 4  ;;  %v3147_v33 = vrot.slane %v3145_v37, 5  ;;  %v3763_v63 = vrot.slane %v5851_v7, 5  ;;  %v2431_v20 = vrot.slane %v4973_v4, 5  ;;  %v4576_v7 = vld [vmem:[%s5159_s11 + $0x30] sm:$0xe] }
 0x184   : > { %v2274_v48 = vpop.f32.mrf.mxu0  ;;  %v2556_v47 = vpack.c.b16 %v2527_v8, %v2526_v35  ;;  %v4818_v50 = vrot.slane %v4802_v58, 9 }
 0x185   : > { %v1620_v61 = vpop.f32.mrf.mxu3  ;;  %4720 = vmatmul.msk.bf16.gmra.mxu2 %vm656_vm4, %v4887_v11  ;;  %v985_v27 = vpop.f32.mrf.mxu1  ;;  %v4744_v11 = vld [vmem:[%s5159_s11 + $0x3c] sm:$0xf]  ;;  %v3148_v3 = vsel %vm5171_vm3, %v3143_v56, %v3147_v33  ;;  %v4888_v33 = vld [vmem:[%s5159_s11 + $0x30] sm:$0xff] }
 0x186   : > { %v1675_v62 = vadd.f32 %v1620_v61, %v1388_v19  ;;  %v3894_v19 = vpack.c.b16 %v3864_v34, %v3863_v25  ;;  %v3138_v61 = vsel %vm5171_vm3, %v3133_v28, %v5872_v9  ;;  %v3150_v14 = vshrl.u32 %v4744_v11, 16  ;;  %v4974_v34 = vld [vmem:[%s5159_s11 + $0x38] sm:$0x1] }
 0x187   : > { %v3765_v25 = vrot.slane %v3763_v63, 4  ;;  %v3766_v9 = vrot.slane %v5878_v41, 5  ;;  %v3467_v8 = vunpack.c.l.b16 %v3138_v61  ;;  %v2433_v28 = vrot.slane %v2431_v20, 4 }
 0x188   : > { %v1336_v16 = vpop.f32.mrf.mxu2  ;;  %v5899_v22 = vadd.f32 %v2274_v48, %v1675_v62  ;;  %v3153_v48 = vshll.u32 %v4744_v11, 16  ;;  %v3159_v62 = vshll.u32 %v5897_v24, 16  ;;  %v3468_v58 = vunpack.c.l.b16 %v3148_v3 }
 0x189   : > { %v1389_v38 = vadd.f32 %v1336_v16, %v984_v60  ;;  %v986_v60 = vadd.f32 %v985_v27, %v5517_v55  ;;  %v2434_v16 = vrot.slane %v4974_v34, 5  ;;  %v3764_v11 = vsel %vm5345_vm7, %v4818_v50, %v3763_v63 }
 0x18a   : > { %4785 = vmatmul.msk.bf16.gmra.mxu3 %vm656_vm4, %v3496_v17  ;;  %v3163_v17 = vshrl.u32 %v5897_v24, 16  ;;  %v3152_v55 = vrot.slane %v3150_v14, 4  ;;  %v3155_v27 = vrot.slane %v3153_v48, 5  ;;  %v5920_v41 = vrot.slane %v3159_v62, 5 }
 0x18b   : > { %v2435_v3 = vsel %vm5345_vm7, %v2433_v28, %v2434_v16  ;;  %v3865_v50 = vunpack.c.l.b16 %v3764_v11  ;;  %v4803_v11 = vld [vmem:[%s5159_s11 + $0x3c] sm:$0xe] }
 0x18c   : > { %v2277_v2 = vpop.f32.mrf.mxu0  ;;  %v3165_v4 = vrot.slane %v3163_v17, 4  ;;  %v3156_v62 = vor.u32 %v3155_v27, %v3152_v55 }
 0x18d   : > { %v1623_v23 = vpop.f32.mrf.mxu3  ;;  %v988_v53 = vpop.f32.mrf.mxu1 }
 0x18e   : > { %v1676_v37 = vadd.f32 %v1623_v23, %v1389_v38  ;;  %v4592_v38 = vrot.slane %v4576_v7, 9  ;;  %v5929_v7 = vld [vmem:[%s5159_s11 + $0x44] sm:$0x1]  ;;  %v3166_v17 = vor.u32 %v3165_v4, %v5920_v41  ;;  %v3157_v28 = vrot.slane %v3156_v62, 4 }
 0x18f   : > { %4834 = vmatmul.msk.bf16.gmra.mxu0 %vm656_vm4, %v3894_v19 }
 0x190   : > { %v1338_v35 = vpop.f32.mrf.mxu2  ;;  %4608 = vmatmul.msk.bf16.gmra.mxu1 %vm656_vm4, %v2556_v47  ;;  %v5918_v19 = vadd.f32 %v2277_v2, %v1676_v37  ;;  %v3767_v47 = vsel %vm5345_vm7, %v3765_v25, %v3766_v9  ;;  %v2432_v61 = vsel %vm5345_vm7, %v4592_v38, %v2431_v20  ;;  %v3497_v2 = vpack.c.b16 %v3468_v58, %v3467_v8  ;;  %v5937_v38 = vld [vmem:[%s5159_s11 + $0x4c] sm:$0xf] }
 0x191   : > { %v1390_v56 = vadd.f32 %v1338_v35, %v986_v60  ;;  %v3866_v48 = vunpack.c.l.b16 %v3767_v47  ;;  %v989_v20 = vadd.f32 %v988_v53, %v5540_v26  ;;  %v2528_v60 = vunpack.c.l.b16 %v2432_v61  ;;  %v4747_v35 = vld [vmem:[%s5159_s11 + $0x48] sm:$0xf] }
 0x192   : > { %v2529_v25 = vunpack.c.l.b16 %v2435_v3  ;;  %v3169_v9 = vshll.u32 %v5929_v7, 16  ;;  %v3770_v26 = vrot.slane %v5897_v24, 5  ;;  %v3174_v27 = vshrl.u32 %v4747_v35, 16 }
 0x193   : > { %v3895_v8 = vpack.c.b16 %v3866_v48, %v3865_v50  ;;  %v3177_v4 = vshll.u32 %v4747_v35, 16  ;;  %v3183_v47 = vshll.u32 %v5937_v38, 16  ;;  %v3187_v61 = vshrl.u32 %v5937_v38, 16  ;;  %v4976_v48 = vld [vmem:[%s5159_s11 + $0x44] sm:$0x1] }
 0x194   : > { %v2279_v23 = vpop.f32.mrf.mxu0  ;;  %v3171_v58 = vrot.slane %v3169_v9, 5  ;;  %v2441_v62 = vrot.slane %v4976_v48, 5  ;;  %v3773_v24 = vrot.slane %v5929_v7, 5  ;;  %v3772_v9 = vrot.slane %v3770_v26, 4  ;;  %v5964_v48 = vld [vmem:[%s5159_s11 + $0x50] sm:$0x1] }
 0x195   : > { %v1625_v63 = vpop.f32.mrf.mxu3  ;;  %4721 = vmatmul.msk.bf16.gmra.mxu2 %vm656_vm4, %v4888_v33  ;;  %v990_v14 = vpop.f32.mrf.mxu1  ;;  %v2557_v33 = vpack.c.b16 %v2529_v25, %v2528_v60  ;;  %v3162_v60 = vsel %vm5171_vm3, %v3157_v28, %v5920_v41  ;;  %v3179_v35 = vrot.slane %v3177_v4, 5  ;;  %v5958_v7 = vrot.slane %v3183_v47, 5 }
 0x196   : > { %v1677_v37 = vadd.f32 %v1625_v63, %v1390_v56  ;;  %v3167_v56 = vrot.slane %v3166_v17, 4  ;;  %v3469_v41 = vunpack.c.l.b16 %v3162_v60 }
 0x198   : > { %v1341_v34 = vpop.f32.mrf.mxu2  ;;  %v5942_v53 = vadd.f32 %v2279_v23, %v1677_v37  ;;  %v4577_v23 = vld [vmem:[%s5159_s11 + $0x3c] sm:$0xe]  ;;  %v991_v37 = vadd.f32 %v990_v14, %v5558_v43  ;;  %v3172_v25 = vsel %vm5171_vm3, %v3167_v56, %v3171_v58 }
 0x199   : > { %v1391_v16 = vadd.f32 %v1341_v34, %v989_v20  ;;  %v4819_v20 = vrot.slane %v4803_v11, 9  ;;  %v3189_v11 = vrot.slane %v3187_v61, 4  ;;  %v4593_v43 = vrot.slane %v4577_v23, 9 }
 0x19a   : > { %4786 = vmatmul.msk.bf16.gmra.mxu3 %vm656_vm4, %v3497_v2  ;;  %v4975_v2 = vld [vmem:[%s5159_s11 + $0x40] sm:$0xf]  ;;  %v3470_v28 = vunpack.c.l.b16 %v3172_v25 }
 0x19b   : > { %v2438_v50 = vrot.slane %v4975_v2, 5  ;;  %v3771_v58 = vsel %vm5345_vm7, %v4819_v20, %v3770_v26  ;;  %v3193_v26 = vshll.u32 %v5964_v48, 16 }
 0x19c   : > { %v2282_v55 = vpop.f32.mrf.mxu0  ;;  %v3498_v23 = vpack.c.b16 %v3470_v28, %v3469_v41  ;;  %v4977_v28 = vld [vmem:[%s5159_s11 + $0x4c] sm:$0xf] }
 0x19d   : > { %v1628_v3 = vpop.f32.mrf.mxu3  ;;  %v993_v63 = vpop.f32.mrf.mxu1  ;;  %v2440_v14 = vrot.slane %v2438_v50, 4 }
 0x19e   : > { %v1678_v17 = vadd.f32 %v1628_v3, %v1391_v16  ;;  %v3176_v16 = vrot.slane %v3174_v27, 4  ;;  %v4889_v3 = vld [vmem:[%s5159_s11 + $0x3c] sm:$0xff] }
 0x19f   : > { %4835 = vmatmul.msk.bf16.gmra.mxu0 %vm656_vm4, %v3895_v8  ;;  %v2442_v61 = vsel %vm5345_vm7, %v2440_v14, %v2441_v62  ;;  %v5983_v14 = vld [vmem:[%s5159_s11 + $0x58] sm:$0xf] }
 0x1a0   : > { %v1343_v34 = vpop.f32.mrf.mxu2  ;;  %4609 = vmatmul.msk.bf16.gmra.mxu1 %vm656_vm4, %v2557_v33  ;;  %v5961_v2 = vadd.f32 %v2282_v55, %v1678_v17  ;;  %v3774_v33 = vsel %vm5345_vm7, %v3772_v9, %v3773_v24  ;;  %v3180_v27 = vor.u32 %v3179_v35, %v3176_v16  ;;  %v2439_v55 = vsel %vm5345_vm7, %v4593_v43, %v2438_v50 }
 0x1a1   : > { %v1392_v8 = vadd.f32 %v1343_v34, %v991_v37  ;;  %v3190_v17 = vor.u32 %v3189_v11, %v5958_v7  ;;  %v994_v24 = vadd.f32 %v993_v63, %v5579_v40  ;;  %v3867_v37 = vunpack.c.l.b16 %v3771_v58  ;;  %v4804_v11 = vld [vmem:[%s5159_s11 + $0x48] sm:$0xe] }
 0x1a2   : > { %v3868_v60 = vunpack.c.l.b16 %v3774_v33  ;;  %v2530_v9 = vunpack.c.l.b16 %v2439_v55  ;;  %v2531_v50 = vunpack.c.l.b16 %v2442_v61  ;;  %v3181_v16 = vrot.slane %v3180_v27, 4 }
 0x1a3   : > { %v3191_v62 = vrot.slane %v3190_v17, 4  ;;  %v3195_v35 = vrot.slane %v3193_v26, 5  ;;  %v3777_v43 = vrot.slane %v5937_v38, 5  ;;  %v2445_v58 = vrot.slane %v4977_v28, 5  ;;  %v4578_v38 = vld [vmem:[%s5159_s11 + $0x48] sm:$0xe] }
 0x1a4   : > { %v2284_v56 = vpop.f32.mrf.mxu0  ;;  %v2558_v41 = vpack.c.b16 %v2531_v50, %v2530_v9  ;;  %v4820_v61 = vrot.slane %v4804_v11, 9 }
 0x1a5   : > { %v1630_v4 = vpop.f32.mrf.mxu3  ;;  %4722 = vmatmul.msk.bf16.gmra.mxu2 %vm656_vm4, %v4889_v3  ;;  %v995_v47 = vpop.f32.mrf.mxu1  ;;  %v4750_v3 = vld [vmem:[%s5159_s11 + $0x54] sm:$0xf]  ;;  %v3196_v55 = vsel %vm5171_vm3, %v3191_v62, %v3195_v35  ;;  %v4890_v35 = vld [vmem:[%s5159_s11 + $0x48] sm:$0xff] }
 0x1a6   : > { %v1679_v20 = vadd.f32 %v1630_v4, %v1392_v8  ;;  %v3896_v8 = vpack.c.b16 %v3868_v60, %v3867_v37  ;;  %v3186_v4 = vsel %vm5171_vm3, %v3181_v16, %v5958_v7  ;;  %v3198_v17 = vshrl.u32 %v4750_v3, 16  ;;  %v4978_v60 = vld [vmem:[%s5159_s11 + $0x50] sm:$0x1] }
 0x1a7   : > { %v3779_v37 = vrot.slane %v3777_v43, 4  ;;  %v3780_v7 = vrot.slane %v5964_v48, 5  ;;  %v3471_v50 = vunpack.c.l.b16 %v3186_v4  ;;  %v2447_v16 = vrot.slane %v2445_v58, 4 }
 0x1a8   : > { %v1346_v25 = vpop.f32.mrf.mxu2  ;;  %v5985_v40 = vadd.f32 %v2284_v56, %v1679_v20  ;;  %v3201_v56 = vshll.u32 %v4750_v3, 16  ;;  %v3207_v20 = vshll.u32 %v5983_v14, 16  ;;  %v3472_v11 = vunpack.c.l.b16 %v3196_v55 }
 0x1a9   : > { %v1393_v34 = vadd.f32 %v1346_v25, %v994_v24  ;;  %v996_v24 = vadd.f32 %v995_v47, %v5594_v10  ;;  %v2448_v25 = vrot.slane %v4978_v60, 5  ;;  %v3778_v3 = vsel %vm5345_vm7, %v4820_v61, %v3777_v43 }
 0x1aa   : > { %4787 = vmatmul.msk.bf16.gmra.mxu3 %vm656_vm4, %v3498_v23  ;;  %v3211_v23 = vshrl.u32 %v5983_v14, 16  ;;  %v3200_v10 = vrot.slane %v3198_v17, 4  ;;  %v3203_v47 = vrot.slane %v3201_v56, 5  ;;  %v6006_v48 = vrot.slane %v3207_v20, 5 }
 0x1ab   : > { %v2449_v55 = vsel %vm5345_vm7, %v2447_v16, %v2448_v25  ;;  %v3869_v61 = vunpack.c.l.b16 %v3778_v3  ;;  %v4805_v3 = vld [vmem:[%s5159_s11 + $0x54] sm:$0xe] }
 0x1ac   : > { %v2287_v63 = vpop.f32.mrf.mxu0  ;;  %v3213_v28 = vrot.slane %v3211_v23, 4  ;;  %v3204_v20 = vor.u32 %v3203_v47, %v3200_v10 }
 0x1ad   : > { %v1633_v33 = vpop.f32.mrf.mxu3  ;;  %v998_v27 = vpop.f32.mrf.mxu1 }
 0x1ae   : > { %v1680_v26 = vadd.f32 %v1633_v33, %v1393_v34  ;;  %v4594_v34 = vrot.slane %v4578_v38, 9  ;;  %v6015_v38 = vld [vmem:[%s5159_s11 + $0x5c] sm:$0x1]  ;;  %v3214_v23 = vor.u32 %v3213_v28, %v6006_v48  ;;  %v3205_v16 = vrot.slane %v3204_v20, 4 }
 0x1af   : > { %4836 = vmatmul.msk.bf16.gmra.mxu0 %vm656_vm4, %v3896_v8 }
 0x1b0   : > { %v1348_v9 = vpop.f32.mrf.mxu2  ;;  %4610 = vmatmul.msk.bf16.gmra.mxu1 %vm656_vm4, %v2558_v41  ;;  %v6004_v8 = vadd.f32 %v2287_v63, %v1680_v26  ;;  %v3781_v41 = vsel %vm5345_vm7, %v3779_v37, %v3780_v7  ;;  %v2446_v4 = vsel %vm5345_vm7, %v4594_v34, %v2445_v58  ;;  %v3499_v63 = vpack.c.b16 %v3472_v11, %v3471_v50  ;;  %v6023_v34 = vld [vmem:[%s5159_s11 + $0x64] sm:$0xf] }
 0x1b1   : > { %v1394_v62 = vadd.f32 %v1348_v9, %v996_v24  ;;  %v3870_v56 = vunpack.c.l.b16 %v3781_v41  ;;  %v999_v58 = vadd.f32 %v998_v27, %v5470_v49  ;;  %v2532_v24 = vunpack.c.l.b16 %v2446_v4  ;;  %v4753_v9 = vld [vmem:[%s5159_s11 + $0x60] sm:$0xf] }
 0x1b2   : > { %v2533_v37 = vunpack.c.l.b16 %v2449_v55  ;;  %v3217_v7 = vshll.u32 %v6015_v38, 16  ;;  %v3784_v49 = vrot.slane %v5983_v14, 5  ;;  %v3222_v47 = vshrl.u32 %v4753_v9, 16 }
 0x1b3   : > { %v3897_v50 = vpack.c.b16 %v3870_v56, %v3869_v61  ;;  %v3225_v28 = vshll.u32 %v4753_v9, 16  ;;  %v3231_v41 = vshll.u32 %v6023_v34, 16  ;;  %v3235_v4 = vshrl.u32 %v6023_v34, 16  ;;  %v4980_v56 = vld [vmem:[%s5159_s11 + $0x5c] sm:$0x1] }
 0x1b4   : > { %v2289_v33 = vpop.f32.mrf.mxu0  ;;  %v3219_v11 = vrot.slane %v3217_v7, 5  ;;  %v2455_v20 = vrot.slane %v4980_v56, 5  ;;  %v3787_v14 = vrot.slane %v6015_v38, 5  ;;  %v3786_v7 = vrot.slane %v3784_v49, 4 }
 0x1b5   : > { %v1635_v43 = vpop.f32.mrf.mxu3  ;;  %4723 = vmatmul.msk.bf16.gmra.mxu2 %vm656_vm4, %v4890_v35  ;;  %v1000_v17 = vpop.f32.mrf.mxu1  ;;  %v2559_v35 = vpack.c.b16 %v2533_v37, %v2532_v24  ;;  %v3210_v24 = vsel %vm5171_vm3, %v3205_v16, %v6006_v48  ;;  %v3227_v9 = vrot.slane %v3225_v28, 5  ;;  %v3233_v38 = vrot.slane %v3231_v41, 5  ;;  %v6048_v16 = vld [vmem:[%s5159_s11 + $0x68] sm:$0x1] }
 0x1b6   : > { %v1681_v26 = vadd.f32 %v1635_v43, %v1394_v62  ;;  %v3215_v62 = vrot.slane %v3214_v23, 4  ;;  %v3473_v56 = vunpack.c.l.b16 %v3210_v24 }
 0x1b8   : > { %v1351_v60 = vpop.f32.mrf.mxu2  ;;  %v6028_v27 = vadd.f32 %v2289_v33, %v1681_v26  ;;  %v4579_v33 = vld [vmem:[%s5159_s11 + $0x54] sm:$0xe]  ;;  %v1001_v26 = vadd.f32 %v1000_v17, %v5489_v0  ;;  %v3220_v37 = vsel %vm5171_vm3, %v3215_v62, %v3219_v11 }
 0x1b9   : > { %v1395_v25 = vadd.f32 %v1351_v60, %v999_v58  ;;  %v4821_v58 = vrot.slane %v4805_v3, 9  ;;  %v3237_v3 = vrot.slane %v3235_v4, 4  ;;  %v3474_v48 = vunpack.c.l.b16 %v3220_v37 }
 0x1ba   : > { %4788 = vmatmul.msk.bf16.gmra.mxu3 %vm656_vm4, %v3499_v63  ;;  %6568 = vst [vmem:[#allocation7_spill] sm:$0xff] %v6028_v27  ;;  %v4979_v63 = vld [vmem:[%s5159_s11 + $0x58] sm:$0xf] }
 0x1bb   : > { %v2452_v61 = vrot.slane %v4979_v63, 5  ;;  %v4595_v63 = vrot.slane %v4579_v33, 9  ;;  %v3785_v62 = vsel %vm5345_vm7, %v4821_v58, %v3784_v49  ;;  %v3238_v4 = vor.u32 %v3237_v3, %v3233_v38 }
 0x1bc   : > { %v2292_v10 = vpop.f32.mrf.mxu0  ;;  %v3500_v58 = vpack.c.b16 %v3474_v48, %v3473_v56  ;;  %v3871_v33 = vunpack.c.l.b16 %v3785_v62 }
 0x1bd   : > { %v1638_v55 = vpop.f32.mrf.mxu3  ;;  %v1003_v43 = vpop.f32.mrf.mxu1  ;;  %v2454_v0 = vrot.slane %v2452_v61, 4 }
 0x1be   : > { %v1682_v23 = vadd.f32 %v1638_v55, %v1395_v25  ;;  %v3224_v25 = vrot.slane %v3222_v47, 4 }
 0x1bf   : > { %4837 = vmatmul.msk.bf16.gmra.mxu0 %vm656_vm4, %v3897_v50  ;;  %v4891_v50 = vld [vmem:[%s5159_s11 + $0x54] sm:$0xff]  ;;  %v2456_v41 = vsel %vm5345_vm7, %v2454_v0, %v2455_v20  ;;  %v3791_v0 = vrot.slane %v6023_v34, 5  ;;  %v4982_v34 = vld [vmem:[%s5159_s11 + $0x68] sm:$0x1] }
 0x1c0   : > { %v1353_v60 = vpop.f32.mrf.mxu2  ;;  %4611 = vmatmul.msk.bf16.gmra.mxu1 %vm656_vm4, %v2559_v35  ;;  %v6045_v17 = vadd.f32 %v2292_v10, %v1682_v23  ;;  %v3788_v35 = vsel %vm5345_vm7, %v3786_v7, %v3787_v14  ;;  %v3228_v11 = vor.u32 %v3227_v9, %v3224_v25  ;;  %v2453_v10 = vsel %vm5345_vm7, %v4595_v63, %v2452_v61  ;;  %v4756_v9 = vld [vmem:[%s5159_s11 + $0x6c] sm:$0xf]  ;;  %v4806_v63 = vld [vmem:[%s5159_s11 + $0x60] sm:$0xe] }
 0x1c1   : > { %v1396_v55 = vadd.f32 %v1353_v60, %v1001_v26  ;;  %v3241_v23 = vshll.u32 %v6048_v16, 16  ;;  %v1004_v14 = vadd.f32 %v1003_v43, %v5510_v39  ;;  %v3872_v26 = vunpack.c.l.b16 %v3788_v35 }
 0x1c2   : > { %v2534_v37 = vunpack.c.l.b16 %v2453_v10  ;;  %v2535_v7 = vunpack.c.l.b16 %v2456_v41  ;;  %v3229_v61 = vrot.slane %v3228_v11, 4  ;;  %v3239_v25 = vrot.slane %v3238_v4, 4  ;;  %v4981_v11 = vld [vmem:[%s5159_s11 + $0x64] sm:$0xf] }
 0x1c3   : > { %v3243_v20 = vrot.slane %v3241_v23, 5  ;;  %v3898_v3 = vpack.c.b16 %v3872_v26, %v3871_v33  ;;  %v3246_v10 = vshrl.u32 %v4756_v9, 16  ;;  %v3249_v4 = vshll.u32 %v4756_v9, 16 }
 0x1c4   : > { %v2294_v27 = vpop.f32.mrf.mxu0  ;;  %v2560_v43 = vpack.c.b16 %v2535_v7, %v2534_v37  ;;  %v3234_v62 = vsel %vm5171_vm3, %v3229_v61, %v3233_v38  ;;  %v3793_v37 = vrot.slane %v3791_v0, 4  ;;  %v3794_v7 = vrot.slane %v6048_v16, 5  ;;  %v4892_v61 = vld [vmem:[%s5159_s11 + $0x60] sm:$0xff] }
 0x1c5   : > { %v1640_v47 = vpop.f32.mrf.mxu3  ;;  %4724 = vmatmul.msk.bf16.gmra.mxu2 %vm656_vm4, %v4891_v50  ;;  %v1005_v28 = vpop.f32.mrf.mxu1  ;;  %v3244_v35 = vsel %vm5171_vm3, %v3239_v25, %v3243_v20  ;;  %v3475_v26 = vunpack.c.l.b16 %v3234_v62 }
 0x1c6   : > { %v1683_v49 = vadd.f32 %v1640_v47, %v1396_v55  ;;  %v6064_v55 = vld [vmem:[%s5159_s11 + $0x70] sm:$0xf]  ;;  %v2459_v47 = vrot.slane %v4981_v11, 5  ;;  %v1006_v38 = vadd.f32 %v1005_v28, %v5529_v6  ;;  %v6089_v28 = vld [vmem:[%s5159_s11 + $0x74] sm:$0x1]  ;;  %v3795_v16 = vsel %vm5345_vm7, %v3793_v37, %v3794_v7 }
 0x1c7   : > { %v3255_v23 = vshll.u32 %v6064_v55, 16 }
 0x1c8   : > { %v1356_v24 = vpop.f32.mrf.mxu2  ;;  %v6066_v50 = vadd.f32 %v2294_v27, %v1683_v49  ;;  %v4580_v27 = vld [vmem:[%s5159_s11 + $0x60] sm:$0xe]  ;;  %v3259_v49 = vshrl.u32 %v6064_v55, 16  ;;  %v2461_v20 = vrot.slane %v2459_v47, 4 }
 0x1c9   : > { %v1397_v60 = vadd.f32 %v1356_v24, %v1004_v14  ;;  %v4822_v14 = vrot.slane %v4806_v63, 9  ;;  %v3476_v24 = vunpack.c.l.b16 %v3244_v35  ;;  %v4596_v25 = vrot.slane %v4580_v27, 9 }
 0x1ca   : > { %4789 = vmatmul.msk.bf16.gmra.mxu3 %vm656_vm4, %v3500_v58  ;;  %v2462_v58 = vrot.slane %v4982_v34, 5  ;;  %v6086_v11 = vrot.slane %v3255_v23, 5  ;;  %v3261_v6 = vrot.slane %v3259_v49, 4  ;;  %v3265_v23 = vshll.u32 %v6089_v28, 16 }
 0x1cc   : > { %v2297_v39 = vpop.f32.mrf.mxu0  ;;  %v3267_v7 = vrot.slane %v3265_v23, 5 }
 0x1cd   : > { %v1643_v56 = vpop.f32.mrf.mxu3  ;;  %v1008_v48 = vpop.f32.mrf.mxu1 }
 0x1ce   : > { %v1684_v41 = vadd.f32 %v1643_v56, %v1397_v60  ;;  %v3248_v56 = vrot.slane %v3246_v10, 4  ;;  %v2460_v10 = vsel %vm5345_vm7, %v4596_v25, %v2459_v47  ;;  %v1009_v49 = vadd.f32 %v1008_v48, %v5548_v45  ;;  %v4759_v47 = vld [vmem:[%s5159_s11 + $0x78] sm:$0xf] }
 0x1cf   : > { %4838 = vmatmul.msk.bf16.gmra.mxu0 %vm656_vm4, %v3898_v3  ;;  %v3251_v3 = vrot.slane %v3249_v4, 5  ;;  %v3798_v25 = vrot.slane %v6064_v55, 5 }
 0x1d0   : > { %v1358_v33 = vpop.f32.mrf.mxu2  ;;  %4612 = vmatmul.msk.bf16.gmra.mxu1 %vm656_vm4, %v2560_v43  ;;  %v6084_v9 = vadd.f32 %v2297_v39, %v1684_v41  ;;  %v3792_v43 = vsel %vm5345_vm7, %v4822_v14, %v3791_v0  ;;  %v3501_v39 = vpack.c.b16 %v3476_v24, %v3475_v26  ;;  %v2463_v41 = vsel %vm5345_vm7, %v2461_v20, %v2462_v58 }
 0x1d1   : > { %v1398_v60 = vadd.f32 %v1358_v33, %v1006_v38  ;;  %v3252_v4 = vor.u32 %v3251_v3, %v3248_v56  ;;  %v3262_v0 = vor.u32 %v3261_v6, %v6086_v11  ;;  %v3873_v34 = vunpack.c.l.b16 %v3792_v43  ;;  %v6110_v56 = vld [vmem:[%s5159_s11 + $0x7c] sm:$0xf] }
 0x1d2   : > { %v3874_v38 = vunpack.c.l.b16 %v3795_v16  ;;  %v2536_v33 = vunpack.c.l.b16 %v2460_v10  ;;  %v2537_v26 = vunpack.c.l.b16 %v2463_v41  ;;  %v3270_v3 = vshrl.u32 %v4759_v47, 16  ;;  %v4983_v10 = vld [vmem:[%s5159_s11 + $0x70] sm:$0xf] }
 0x1d3   : > { %v3253_v58 = vrot.slane %v3252_v4, 4  ;;  %v3263_v37 = vrot.slane %v3262_v0, 4  ;;  %v3273_v6 = vshll.u32 %v4759_v47, 16  ;;  %v2466_v41 = vrot.slane %v4983_v10, 5 }
 0x1d4   : > { %v2299_v63 = vpop.f32.mrf.mxu0  ;;  %v2561_v20 = vpack.c.b16 %v2537_v26, %v2536_v33  ;;  %v3800_v23 = vrot.slane %v3798_v25, 4 }
 0x1d5   : > { %v1645_v62 = vpop.f32.mrf.mxu3  ;;  %4725 = vmatmul.msk.bf16.gmra.mxu2 %vm656_vm4, %v4892_v61  ;;  %v1010_v35 = vpop.f32.mrf.mxu1  ;;  %v3899_v61 = vpack.c.b16 %v3874_v38, %v3873_v34  ;;  %v3258_v55 = vsel %vm5171_vm3, %v3253_v58, %v6086_v11  ;;  %v3283_v34 = vshrl.u32 %v6110_v56, 16  ;;  %v3272_v11 = vrot.slane %v3270_v3, 4  ;;  %v6134_v3 = vld [vmem:[%s5159_s11 + $0x80] sm:$0x1] }
 0x1d6   : > { %v1685_v27 = vadd.f32 %v1645_v62, %v1398_v60  ;;  %v4807_v60 = vld [vmem:[%s5159_s11 + $0x6c] sm:$0xe]  ;;  %v1011_v0 = vadd.f32 %v1010_v35, %v5571_v12  ;;  %v3275_v33 = vrot.slane %v3273_v6, 5  ;;  %v2468_v47 = vrot.slane %v2466_v41, 4 }
 0x1d7   : > { %v4823_v62 = vrot.slane %v4807_v60, 9  ;;  %v3477_v12 = vunpack.c.l.b16 %v3258_v55 }
 0x1d8   : > { %v1361_v14 = vpop.f32.mrf.mxu2  ;;  %v6107_v45 = vadd.f32 %v2299_v63, %v1685_v27  ;;  %v3268_v63 = vsel %vm5171_vm3, %v3263_v37, %v3267_v7  ;;  %v3801_v27 = vrot.slane %v6089_v28, 5  ;;  %v4984_v28 = vld [vmem:[%s5159_s11 + $0x74] sm:$0x1]  ;;  %v3276_v6 = vor.u32 %v3275_v33, %v3272_v11  ;;  %v4808_v33 = vld [vmem:[%s5159_s11 + $0x78] sm:$0xe] }
 0x1d9   : > { %v1399_v24 = vadd.f32 %v1361_v14, %v1009_v49  ;;  %v3279_v49 = vshll.u32 %v6110_v56, 16  ;;  %v2469_v58 = vrot.slane %v4984_v28, 5  ;;  %v3478_v35 = vunpack.c.l.b16 %v3268_v63  ;;  %v6148_v28 = vld [vmem:[%s5159_s11 + $0x88] sm:$0xf] }
 0x1da   : > { %4790 = vmatmul.msk.bf16.gmra.mxu3 %vm656_vm4, %v3501_v39  ;;  %v4581_v39 = vld [vmem:[%s5159_s11 + $0x6c] sm:$0xe]  ;;  %v3799_v7 = vsel %vm5345_vm7, %v4823_v62, %v3798_v25  ;;  %v3802_v60 = vsel %vm5345_vm7, %v3800_v23, %v3801_v27  ;;  %v3289_v23 = vshll.u32 %v6134_v3, 16  ;;  %v3277_v11 = vrot.slane %v3276_v6, 4 }
 0x1db   : > { %v4597_v14 = vrot.slane %v4581_v39, 9  ;;  %v2470_v25 = vsel %vm5345_vm7, %v2468_v47, %v2469_v58  ;;  %v3875_v55 = vunpack.c.l.b16 %v3799_v7  ;;  %v3876_v63 = vunpack.c.l.b16 %v3802_v60 }
 0x1dc   : > { %v2302_v48 = vpop.f32.mrf.mxu0 }
 0x1dd   : > { %v1648_v43 = vpop.f32.mrf.mxu3  ;;  %v1013_v16 = vpop.f32.mrf.mxu1  ;;  %v2467_v10 = vsel %vm5345_vm7, %v4597_v14, %v2466_v41  ;;  %v4762_v41 = vld [vmem:[%s5159_s11 + $0x84] sm:$0xf]  ;;  %v3900_v14 = vpack.c.b16 %v3876_v63, %v3875_v55 }
 0x1de   : > { %v1686_v4 = vadd.f32 %v1648_v43, %v1399_v24  ;;  %v4893_v24 = vld [vmem:[%s5159_s11 + $0x6c] sm:$0xff]  ;;  %v1014_v27 = vadd.f32 %v1013_v16, %v5590_v59  ;;  %v3291_v59 = vrot.slane %v3289_v23, 5  ;;  %v4824_v16 = vrot.slane %v4808_v33, 9  ;;  %v4894_v33 = vld [vmem:[%s5159_s11 + $0x78] sm:$0xff] }
 0x1df   : > { %4839 = vmatmul.msk.bf16.gmra.mxu0 %vm656_vm4, %v3899_v61  ;;  %v3281_v61 = vrot.slane %v3279_v49, 5  ;;  %v3294_v60 = vshrl.u32 %v4762_v41, 16 }
 0x1e0   : > { %v1363_v38 = vpop.f32.mrf.mxu2  ;;  %4613 = vmatmul.msk.bf16.gmra.mxu1 %vm656_vm4, %v2561_v20  ;;  %v6127_v37 = vadd.f32 %v2302_v48, %v1686_v4  ;;  %v3285_v20 = vrot.slane %v3283_v34, 4  ;;  %v3502_v4 = vpack.c.b16 %v3478_v35, %v3477_v12  ;;  %v2538_v34 = vunpack.c.l.b16 %v2467_v10 }
 0x1e1   : > { %v1400_v26 = vadd.f32 %v1363_v38, %v1011_v0  ;;  %v2539_v38 = vunpack.c.l.b16 %v2470_v25  ;;  %v3282_v7 = vsel %vm5171_vm3, %v3277_v11, %v3281_v61  ;;  %v3808_v10 = vrot.slane %v6134_v3, 5  ;;  %v4582_v25 = vld [vmem:[%s5159_s11 + $0x78] sm:$0xe] }
 0x1e2   : > { %v3286_v0 = vor.u32 %v3285_v20, %v3281_v61  ;;  %v3297_v20 = vshll.u32 %v4762_v41, 16  ;;  %v4986_v41 = vld [vmem:[%s5159_s11 + $0x80] sm:$0x1] }
 0x1e3   : > { %v2562_v35 = vpack.c.b16 %v2539_v38, %v2538_v34  ;;  %v3296_v34 = vrot.slane %v3294_v60, 4 }
 0x1e4   : > { %v2304_v43 = vpop.f32.mrf.mxu0  ;;  %v3287_v47 = vrot.slane %v3286_v0, 4  ;;  %v3479_v0 = vunpack.c.l.b16 %v3282_v7  ;;  %v3299_v38 = vrot.slane %v3297_v20, 5  ;;  %v4764_v7 = vld [vmem:[%s5159_s11 + $0x8c] sm:$0x1] }
 0x1e5   : > { %v1650_v39 = vpop.f32.mrf.mxu3  ;;  %4726 = vmatmul.msk.bf16.gmra.mxu2 %vm656_vm4, %v4893_v24  ;;  %v1015_v48 = vpop.f32.mrf.mxu1 }
 0x1e6   : > { %v1687_v62 = vadd.f32 %v1650_v39, %v1400_v26  ;;  %v3805_v26 = vrot.slane %v6110_v56, 5  ;;  %v4985_v56 = vld [vmem:[%s5159_s11 + $0x7c] sm:$0xf]  ;;  %v1016_v61 = vadd.f32 %v1015_v48, %v5607_v32 }
 0x1e8   : > { %v1366_v49 = vpop.f32.mrf.mxu2  ;;  %v6150_v58 = vadd.f32 %v2304_v43, %v1687_v62  ;;  %v3807_v63 = vrot.slane %v3805_v26, 4  ;;  %v3303_v43 = vshll.u32 %v6148_v28, 16  ;;  %v3307_v62 = vshrl.u32 %v6148_v28, 16 }
 0x1e9   : > { %v1401_v24 = vadd.f32 %v1366_v49, %v1014_v27  ;;  %v3292_v27 = vsel %vm5171_vm3, %v3287_v47, %v3291_v59  ;;  %v3806_v23 = vsel %vm5345_vm7, %v4824_v16, %v3805_v26  ;;  %v4598_v49 = vrot.slane %v4582_v25, 9 }
 0x1ea   : > { %4791 = vmatmul.msk.bf16.gmra.mxu3 %vm656_vm4, %v3502_v4  ;;  %v2473_v4 = vrot.slane %v4985_v56, 5  ;;  %v3480_v48 = vunpack.c.l.b16 %v3292_v27  ;;  %v3809_v47 = vsel %vm5345_vm7, %v3807_v63, %v3808_v10  ;;  %v6172_v59 = vrot.slane %v3303_v43, 5 }
 0x1eb   : > { %v3877_v16 = vunpack.c.l.b16 %v3806_v23  ;;  %v3878_v20 = vunpack.c.l.b16 %v3809_v47  ;;  %v3300_v25 = vor.u32 %v3299_v38, %v3296_v34  ;;  %v3313_v43 = vshll.u32 %v4764_v7, 16  ;;  %v6186_v47 = vld [vmem:[%s5159_s11 + $0x94] sm:$0xf] }
 0x1ec   : > { %v2307_v12 = vpop.f32.mrf.mxu0 }
 0x1ed   : > { %v1653_v6 = vpop.f32.mrf.mxu3  ;;  %v2630_v39 = vpop.f32.mrf.mxu1  ;;  %v3315_v38 = vrot.slane %v3313_v43, 5 }
 0x1ee   : > { %v1688_v55 = vadd.f32 %v1653_v6, %v1401_v24  ;;  %v2475_v24 = vrot.slane %v2473_v4, 4  ;;  %v2710_v27 = vadd.f32 %v2630_v39, %v5624_v46 }
 0x1ef   : > { %4840 = vmatmul.msk.bf16.gmra.mxu0 %vm656_vm4, %v3900_v14  ;;  %v2476_v14 = vrot.slane %v4986_v41, 5  ;;  %v4765_v41 = vld [vmem:[%s5159_s11 + $0x90] sm:$0xf] }
 0x1f0   : > { %v1368_v3 = vpop.f32.mrf.mxu2  ;;  %4614 = vmatmul.msk.bf16.gmra.mxu1 %vm656_vm4, %v2562_v35  ;;  %v6168_v32 = vadd.f32 %v2307_v12, %v1688_v55  ;;  %v3309_v35 = vrot.slane %v3307_v62, 4  ;;  %v2474_v12 = vsel %vm5345_vm7, %v4598_v49, %v2473_v4  ;;  %v3503_v55 = vpack.c.b16 %v3480_v48, %v3479_v0  ;;  %v4809_v62 = vld [vmem:[%s5159_s11 + $0x84] sm:$0xe] }
 0x1f1   : > { %v1402_v11 = vadd.f32 %v1368_v3, %v1016_v61  ;;  %v2477_v10 = vsel %vm5345_vm7, %v2475_v24, %v2476_v14  ;;  %v3812_v61 = vrot.slane %v6148_v28, 5  ;;  %v2540_v23 = vunpack.c.l.b16 %v2474_v12  ;;  %v4987_v12 = vld [vmem:[%s5159_s11 + $0x88] sm:$0xf] }
 0x1f2   : > { %v3310_v63 = vor.u32 %v3309_v35, %v6172_v59  ;;  %v3901_v4 = vpack.c.b16 %v3878_v20, %v3877_v16  ;;  %v3301_v49 = vrot.slane %v3300_v25, 4  ;;  %v3815_v28 = vrot.slane %v4764_v7, 5  ;;  %v6198_v7 = vld [vmem:[%s6558_s2] ss:$0 sm:$0xff] }
 0x1f3   : > { %v3814_v24 = vrot.slane %v3812_v61, 4  ;;  %v3318_v46 = vshrl.u32 %v4765_v41, 16  ;;  %v3321_v35 = vshll.u32 %v4765_v41, 16  ;;  %v3327_v16 = vshll.u32 %v6186_v47, 16 }
 0x1f4   : > { %v2309_v26 = vpop.f32.mrf.mxu0  ;;  %v3311_v34 = vrot.slane %v3310_v63, 4  ;;  %v3331_v25 = vshrl.u32 %v6186_v47, 16 }
 0x1f5   : > { %v1655_v60 = vpop.f32.mrf.mxu3  ;;  %4727 = vmatmul.msk.bf16.gmra.mxu2 %vm656_vm4, %v4894_v33  ;;  %v2632_v6 = vpop.f32.mrf.mxu1  ;;  %v2541_v33 = vunpack.c.l.b16 %v2477_v10  ;;  %v2480_v10 = vrot.slane %v4987_v12, 5  ;;  %v6215_v41 = vrot.slane %v3327_v16, 5 }
 0x1f6   : > { %v1689_v56 = vadd.f32 %v1655_v60, %v1402_v11  ;;  %v4825_v11 = vrot.slane %v4809_v62, 9  ;;  %v3316_v63 = vsel %vm5171_vm3, %v3311_v34, %v3315_v38  ;;  %v3816_v62 = vsel %vm5345_vm7, %v3814_v24, %v3815_v28 }
 0x1f7   : > { %v2563_v48 = vpack.c.b16 %v2541_v33, %v2540_v23  ;;  %v3323_v33 = vrot.slane %v3321_v35, 5  ;;  %v3333_v38 = vrot.slane %v3331_v25, 4 }
 0x1f8   : > { %v2917_v3 = vpop.f32.mrf.mxu2  ;;  %v6189_v39 = vadd.f32 %v2309_v26, %v1689_v56  ;;  %v3306_v26 = vsel %vm5171_vm3, %v3301_v49, %v6172_v59  ;;  %v4583_v56 = vld [vmem:[%s5159_s11 + $0x84] sm:$0xe]  ;;  %v3813_v43 = vsel %vm5345_vm7, %v4825_v11, %v3812_v61  ;;  %v2711_v59 = vadd.f32 %v2632_v6, %v5637_v42  ;;  %v4988_v61 = vld [vmem:[%s5159_s11 + $0x8c] sm:$0x1] }
 0x1f9   : > { %v2997_v0 = vadd.f32 %v2917_v3, %v2710_v27  ;;  %v3320_v27 = vrot.slane %v3318_v46, 4  ;;  %v4599_v49 = vrot.slane %v4583_v56, 9  ;;  %v2483_v34 = vrot.slane %v4988_v61, 5 }
 0x1fa   : > { %4792 = vmatmul.msk.bf16.gmra.mxu3 %vm656_vm4, %v3503_v55  ;;  %v3481_v28 = vunpack.c.l.b16 %v3306_v26  ;;  %v3482_v46 = vunpack.c.l.b16 %v3316_v63  ;;  %v3334_v26 = vor.u32 %v3333_v38, %v6215_v41 }
 0x1fb   : > { %v2481_v12 = vsel %vm5345_vm7, %v4599_v49, %v2480_v10  ;;  %v6236_v49 = vld [vmem:[%s5159_s11 + $0xa0] sm:$0xf] }
 0x1fc   : > { %v3969_v14 = vpop.f32.mrf.mxu0  ;;  %v3504_v63 = vpack.c.b16 %v3482_v46, %v3481_v28  ;;  %v3351_v28 = vshll.u32 %v6236_v49, 16  ;;  %v3355_v46 = vshrl.u32 %v6236_v49, 16 }
 0x1fd   : > { %v3571_v60 = vpop.f32.mrf.mxu3  ;;  %v2635_v20 = vpop.f32.mrf.mxu1 }
 0x1fe   : > { %v3651_v55 = vadd.f32 %v3571_v60, %v2997_v0  ;;  %v2482_v0 = vrot.slane %v2480_v10, 4  ;;  %v3879_v60 = vunpack.c.l.b16 %v3813_v43  ;;  %v2542_v10 = vunpack.c.l.b16 %v2481_v12 }
 0x1ff   : > { %4841 = vmatmul.msk.bf16.gmra.mxu0 %vm656_vm4, %v3901_v4  ;;  %v4895_v4 = vld [vmem:[%s5159_s11 + $0x84] sm:$0xff] }
 0x200   : > { %v4049_v3 = vadd.f32 %v3969_v14, %v3651_v55  ;;  %v2919_v23 = vpop.f32.mrf.mxu2  ;;  %4615 = vmatmul.msk.bf16.gmra.mxu1 %vm656_vm4, %v2563_v48  ;;  %v6221_v14 = vld [vmem:[%s5159_s11 + $0x98] sm:$0x1]  ;;  %v3880_v48 = vunpack.c.l.b16 %v3816_v62  ;;  %v2484_v25 = vsel %vm5345_vm7, %v2482_v0, %v2483_v34  ;;  %v3324_v55 = vor.u32 %v3323_v33, %v3320_v27 }
 0x201   : > { %v2998_v24 = vadd.f32 %v2919_v23, %v2711_v59  ;;  %v3337_v43 = vshll.u32 %v6221_v14, 16  ;;  %v2543_v23 = vunpack.c.l.b16 %v2484_v25  ;;  %v3335_v0 = vrot.slane %v3334_v26, 4 }
 0x202   : > { %v4085_v11 = vadd.f32 %v6198_v7, %v4049_v3  ;;  %v2712_v3 = vadd.f32 %v2635_v20, %v5650_v15  ;;  %v3902_v27 = vpack.c.b16 %v3880_v48, %v3879_v60  ;;  %v3325_v33 = vrot.slane %v3324_v55, 4  ;;  %v4989_v55 = vld [vmem:[%s5159_s11 + $0x94] sm:$0xf] }
 0x203   : > { %v3339_v38 = vrot.slane %v3337_v43, 5  ;;  %v3819_v15 = vrot.slane %v6186_v47, 5  ;;  %v2564_v60 = vpack.c.b16 %v2543_v23, %v2542_v10  ;;  %v3822_v25 = vrot.slane %v6221_v14, 5 }
 0x204   : > { %v4117_v42 = vmax.f32 %v4085_v11, 0.0  ;;  %v3971_v6 = vpop.f32.mrf.mxu0  ;;  %v4810_v11 = vld [vmem:[%s5159_s11 + $0x90] sm:$0xe]  ;;  %v2487_v26 = vrot.slane %v4989_v55, 5  ;;  %v3357_v10 = vrot.slane %v3355_v46, 4 }
 0x205   : > { %v3573_v35 = vpop.f32.mrf.mxu3  ;;  %4728 = vmatmul.msk.bf16.gmra.mxu2 %vm656_vm4, %v4895_v4  ;;  %v2637_v16 = vpop.f32.mrf.mxu1  ;;  %v4768_v4 = vld [vmem:[%s5159_s11 + $0x9c] sm:$0xf]  ;;  %v4826_v12 = vrot.slane %v4810_v11, 9  ;;  %v3821_v43 = vrot.slane %v3819_v15, 4  ;;  %v4990_v11 = vld [vmem:[%s5159_s11 + $0x98] sm:$0x1] }
 0x206   : > { %4149 = vst [vmem:[%s6229_s6] sm:$0xff] %v4117_v42  ;;  %v3652_v56 = vadd.f32 %v3573_v35, %v2998_v24  ;;  %v3342_v20 = vshrl.u32 %v4768_v4, 16  ;;  %v3345_v24 = vshll.u32 %v4768_v4, 16  ;;  %v2713_v4 = vadd.f32 %v2637_v16, %v5663_v13 }
 0x207   : > { %v3823_v13 = vsel %vm5345_vm7, %v3821_v43, %v3822_v25 }
 0x208   : > { %v4050_v62 = vadd.f32 %v3971_v6, %v3652_v56  ;;  %v2922_v59 = vpop.f32.mrf.mxu2  ;;  %v3330_v56 = vsel %vm5171_vm3, %v3325_v33, %v6215_v41  ;;  %v3347_v14 = vrot.slane %v3345_v24, 5  ;;  %v6259_v41 = vld [vmem:[%s5159_s11 + $0xa4] sm:$0x1]  ;;  %v4896_v33 = vld [vmem:[%s5159_s11 + $0x90] sm:$0xff]  ;;  %v3882_v43 = vunpack.c.l.b16 %v3823_v13 }
 0x209   : > { %v2999_v34 = vadd.f32 %v2922_v59, %v2712_v3  ;;  %v3344_v3 = vrot.slane %v3342_v20, 4  ;;  %v6254_v59 = vrot.slane %v3351_v28, 5  ;;  %v3820_v28 = vsel %vm5345_vm7, %v4826_v12, %v3819_v15 }
 0x20a   : > { %v4086_v61 = vadd.f32 %v6198_v7, %v4050_v62  ;;  %4793 = vmatmul.msk.bf16.gmra.mxu3 %vm656_vm4, %v3504_v63  ;;  %v3340_v63 = vsel %vm5171_vm3, %v3335_v0, %v3339_v38  ;;  %v4584_v62 = vld [vmem:[%s5159_s11 + $0x90] sm:$0xe]  ;;  %v3483_v0 = vunpack.c.l.b16 %v3330_v56  ;;  %v2489_v38 = vrot.slane %v2487_v26, 4 }
 0x20b   : > { %v3484_v24 = vunpack.c.l.b16 %v3340_v63  ;;  %v3348_v16 = vor.u32 %v3347_v14, %v3344_v3  ;;  %v3358_v46 = vor.u32 %v3357_v10, %v6254_v59  ;;  %v3881_v63 = vunpack.c.l.b16 %v3820_v28 }
 0x20c   : > { %v4118_v42 = vmax.f32 %v4086_v61, 0.0  ;;  %v3974_v6 = vpop.f32.mrf.mxu0  ;;  %v3826_v10 = vrot.slane %v6236_v49, 5 }
 0x20d   : > { %v3576_v48 = vpop.f32.mrf.mxu3  ;;  %v2640_v35 = vpop.f32.mrf.mxu1  ;;  %v3505_v25 = vpack.c.b16 %v3484_v24, %v3483_v0  ;;  %v3359_v3 = vrot.slane %v3358_v46, 4  ;;  %v3903_v0 = vpack.c.b16 %v3882_v43, %v3881_v63 }
 0x20e   : > { %4150 = vst [vmem:[%s6229_s6 + $0x8] sm:$0xff] %v4118_v42  ;;  %v3653_v47 = vadd.f32 %v3576_v48, %v2999_v34  ;;  %v4600_v34 = vrot.slane %v4584_v62, 9  ;;  %v2490_v42 = vrot.slane %v4990_v11, 5  ;;  %v3349_v62 = vrot.slane %v3348_v16, 4 }
 0x20f   : > { %4842 = vmatmul.msk.bf16.gmra.mxu0 %vm656_vm4, %v3902_v27  ;;  %v3829_v16 = vrot.slane %v6259_v41, 5 }
 0x210   : > { %v4051_v23 = vadd.f32 %v3974_v6, %v3653_v47  ;;  %v2924_v61 = vpop.f32.mrf.mxu2  ;;  %4616 = vmatmul.msk.bf16.gmra.mxu1 %vm656_vm4, %v2564_v60  ;;  %v3361_v6 = vshll.u32 %v6259_v41, 16  ;;  %v2488_v56 = vsel %vm5345_vm7, %v4600_v34, %v2487_v26  ;;  %v2491_v15 = vsel %vm5345_vm7, %v2489_v38, %v2490_v42  ;;  %v4811_v34 = vld [vmem:[%s5159_s11 + $0x9c] sm:$0xe]  ;;  %v4771_v38 = vld [vmem:[%s5159_s11 + $0xa8] sm:$0xf] }
 0x211   : > { %v3000_v20 = vadd.f32 %v2924_v61, %v2713_v4  ;;  %v2714_v4 = vadd.f32 %v2640_v35, %v5676_v57  ;;  %v2544_v61 = vunpack.c.l.b16 %v2488_v56  ;;  %v3354_v49 = vsel %vm5171_vm3, %v3349_v62, %v6254_v59 }
 0x212   : > { %v4087_v27 = vadd.f32 %v6198_v7, %v4051_v23  ;;  %v3363_v14 = vrot.slane %v3361_v6, 5  ;;  %v4827_v35 = vrot.slane %v4811_v34, 9  ;;  %v3366_v46 = vshrl.u32 %v4771_v38, 16  ;;  %v4992_v34 = vld [vmem:[%s5159_s11 + $0xa4] sm:$0x1] }
 0x213   : > { %v3369_v56 = vshll.u32 %v4771_v38, 16  ;;  %v3485_v63 = vunpack.c.l.b16 %v3354_v49  ;;  %v2497_v38 = vrot.slane %v4992_v34, 5 }
 0x214   : > { %v4119_v60 = vmax.f32 %v4087_v27, 0.0  ;;  %v3976_v48 = vpop.f32.mrf.mxu0  ;;  %v3364_v57 = vsel %vm5171_vm3, %v3359_v3, %v3363_v14  ;;  %v3828_v27 = vrot.slane %v3826_v10, 4  ;;  %v3827_v41 = vsel %vm5345_vm7, %v4827_v35, %v3826_v10 }
 0x215   : > { %v3578_v55 = vpop.f32.mrf.mxu3  ;;  %4729 = vmatmul.msk.bf16.gmra.mxu2 %vm656_vm4, %v4896_v33  ;;  %v2642_v47 = vpop.f32.mrf.mxu1  ;;  %v2545_v33 = vunpack.c.l.b16 %v2491_v15  ;;  %v4585_v15 = vld [vmem:[%s5159_s11 + $0x9c] sm:$0xe]  ;;  %v3486_v43 = vunpack.c.l.b16 %v3364_v57  ;;  %v3883_v35 = vunpack.c.l.b16 %v3827_v41 }
 0x216   : > { %4151 = vst [vmem:[%s6229_s6 + $0x10] sm:$0xff] %v4119_v60  ;;  %v3654_v12 = vadd.f32 %v3578_v55, %v3000_v20  ;;  %v6288_v20 = vld [vmem:[%s5159_s11 + $0xac] sm:$0xf]  ;;  %v2715_v3 = vadd.f32 %v2642_v47, %v5689_v54  ;;  %v6309_v47 = vld [vmem:[%s5159_s11 + $0xb0] sm:$0x1] }
 0x217   : > { %v2565_v13 = vpack.c.b16 %v2545_v33, %v2544_v61  ;;  %v4601_v61 = vrot.slane %v4585_v15, 9 }
 0x218   : > { %v4052_v23 = vadd.f32 %v3976_v48, %v3654_v12  ;;  %v2927_v26 = vpop.f32.mrf.mxu2  ;;  %v4991_v48 = vld [vmem:[%s5159_s11 + $0xa0] sm:$0xf]  ;;  %v3375_v12 = vshll.u32 %v6288_v20, 16 }
 0x219   : > { %v3001_v42 = vadd.f32 %v2927_v26, %v2714_v4  ;;  %v2494_v55 = vrot.slane %v4991_v48, 5  ;;  %v3368_v4 = vrot.slane %v3366_v46, 4  ;;  %v4897_v26 = vld [vmem:[%s5159_s11 + $0x9c] sm:$0xff]  ;;  %v3506_v48 = vpack.c.b16 %v3486_v43, %v3485_v63 }
 0x21a   : > { %v4088_v11 = vadd.f32 %v6198_v7, %v4052_v23  ;;  %4794 = vmatmul.msk.bf16.gmra.mxu3 %vm656_vm4, %v3505_v25  ;;  %v3379_v25 = vshrl.u32 %v6288_v20, 16  ;;  %v3830_v23 = vsel %vm5345_vm7, %v3828_v27, %v3829_v16 }
 0x21b   : > { %v2496_v33 = vrot.slane %v2494_v55, 4 }
 0x21c   : > { %v4120_v24 = vmax.f32 %v4088_v11, 0.0  ;;  %v3979_v28 = vpop.f32.mrf.mxu0  ;;  %v3371_v11 = vrot.slane %v3369_v56, 5  ;;  %v3381_v54 = vrot.slane %v3379_v25, 4 }
 0x21d   : > { %v3581_v6 = vpop.f32.mrf.mxu3  ;;  %v2645_v60 = vpop.f32.mrf.mxu1  ;;  %v2498_v16 = vsel %vm5345_vm7, %v2496_v33, %v2497_v38 }
 0x21e   : > { %4152 = vst [vmem:[%s6229_s6 + $0x18] sm:$0xff] %v4120_v24  ;;  %v3655_v59 = vadd.f32 %v3581_v6, %v3001_v42  ;;  %v6306_v42 = vrot.slane %v3375_v12, 5  ;;  %v3884_v24 = vunpack.c.l.b16 %v3830_v23  ;;  %v3372_v46 = vor.u32 %v3371_v11, %v3368_v4 }
 0x21f   : > { %4843 = vmatmul.msk.bf16.gmra.mxu0 %vm656_vm4, %v3903_v0  ;;  %v2716_v12 = vadd.f32 %v2645_v60, %v5701_v31 }
 0x220   : > { %v4053_v62 = vadd.f32 %v3979_v28, %v3655_v59  ;;  %v2929_v14 = vpop.f32.mrf.mxu2  ;;  %4617 = vmatmul.msk.bf16.gmra.mxu1 %vm656_vm4, %v2565_v13  ;;  %v2495_v13 = vsel %vm5345_vm7, %v4601_v61, %v2494_v55  ;;  %v3382_v56 = vor.u32 %v3381_v54, %v6306_v42  ;;  %v3385_v59 = vshll.u32 %v6309_v47, 16  ;;  %v6322_v55 = vld [vmem:[%s5159_s11 + $0xb8] sm:$0xf]  ;;  %v4812_v61 = vld [vmem:[%s5159_s11 + $0xa8] sm:$0xe] }
 0x221   : > { %v3002_v0 = vadd.f32 %v2929_v14, %v2715_v3  ;;  %v2546_v41 = vunpack.c.l.b16 %v2495_v13  ;;  %v4774_v3 = vld [vmem:[%s5159_s11 + $0xb4] sm:$0xf]  ;;  %v3904_v14 = vpack.c.b16 %v3884_v24, %v3883_v35  ;;  %v3373_v23 = vrot.slane %v3372_v46, 4  ;;  %v4586_v46 = vld [vmem:[%s5159_s11 + $0xa8] sm:$0xe] }
 0x222   : > { %v4089_v10 = vadd.f32 %v6198_v7, %v4053_v62  ;;  %v2547_v62 = vunpack.c.l.b16 %v2498_v16  ;;  %v3383_v43 = vrot.slane %v3382_v56, 4  ;;  %v3390_v33 = vshrl.u32 %v4774_v3, 16 }
 0x223   : > { %v3393_v31 = vshll.u32 %v4774_v3, 16  ;;  %v3399_v60 = vshll.u32 %v6322_v55, 16  ;;  %v3403_v34 = vshrl.u32 %v6322_v55, 16  ;;  %v3378_v24 = vsel %vm5171_vm3, %v3373_v23, %v6306_v42 }
 0x224   : > { %v4121_v49 = vmax.f32 %v4089_v10, 0.0  ;;  %v3981_v57 = vpop.f32.mrf.mxu0  ;;  %v2566_v10 = vpack.c.b16 %v2547_v62, %v2546_v41  ;;  %v4828_v16 = vrot.slane %v4812_v61, 9  ;;  %v6345_v41 = vld [vmem:[%s5159_s11 + $0xbc] sm:$0x1]  ;;  %v4898_v62 = vld [vmem:[%s5159_s11 + $0xa8] sm:$0xff]  ;;  %v4602_v3 = vrot.slane %v4586_v46, 9 }
 0x225   : > { %v3583_v27 = vpop.f32.mrf.mxu3  ;;  %4730 = vmatmul.msk.bf16.gmra.mxu2 %vm656_vm4, %v4897_v26  ;;  %v2647_v28 = vpop.f32.mrf.mxu1  ;;  %v3387_v26 = vrot.slane %v3385_v59, 5  ;;  %v3405_v56 = vrot.slane %v3403_v34, 4 }
 0x226   : > { %4153 = vst [vmem:[%s6229_s6 + $0x20] sm:$0xff] %v4121_v49  ;;  %v3656_v6 = vadd.f32 %v3583_v27, %v3002_v0  ;;  %v3833_v0 = vrot.slane %v6288_v20, 5  ;;  %v3392_v20 = vrot.slane %v3390_v33, 4 }
 0x227   : > { %v3388_v13 = vsel %vm5171_vm3, %v3383_v43, %v3387_v26  ;;  %v3487_v26 = vunpack.c.l.b16 %v3378_v24 }
 0x228   : > { %v4054_v15 = vadd.f32 %v3981_v57, %v3656_v6  ;;  %v2932_v25 = vpop.f32.mrf.mxu2  ;;  %v4993_v57 = vld [vmem:[%s5159_s11 + $0xac] sm:$0xf]  ;;  %v3395_v6 = vrot.slane %v3393_v31, 5  ;;  %v3835_v42 = vrot.slane %v3833_v0, 4  ;;  %v3488_v61 = vunpack.c.l.b16 %v3388_v13 }
 0x229   : > { %v3003_v63 = vadd.f32 %v2932_v25, %v2716_v12  ;;  %v2501_v35 = vrot.slane %v4993_v57, 5  ;;  %v3836_v25 = vrot.slane %v6309_v47, 5  ;;  %v3409_v47 = vshll.u32 %v6345_v41, 16 }
 0x22a   : > { %v4090_v4 = vadd.f32 %v6198_v7, %v4054_v15  ;;  %4795 = vmatmul.msk.bf16.gmra.mxu3 %vm656_vm4, %v3506_v48  ;;  %v6339_v48 = vrot.slane %v3399_v60, 5  ;;  %v2717_v15 = vadd.f32 %v2647_v28, %v5714_v44  ;;  %v3834_v44 = vsel %vm5345_vm7, %v4828_v16, %v3833_v0 }
 0x22b   : > { %v2503_v23 = vrot.slane %v2501_v35, 4  ;;  %v3396_v28 = vor.u32 %v3395_v6, %v3392_v20  ;;  %v3837_v34 = vsel %vm5345_vm7, %v3835_v42, %v3836_v25  ;;  %v3507_v57 = vpack.c.b16 %v3488_v61, %v3487_v26 }
 0x22c   : > { %v4122_v38 = vmax.f32 %v4090_v4, 0.0  ;;  %v3984_v11 = vpop.f32.mrf.mxu0  ;;  %v3406_v33 = vor.u32 %v3405_v56, %v6339_v48  ;;  %v3886_v24 = vunpack.c.l.b16 %v3837_v34  ;;  %v3411_v46 = vrot.slane %v3409_v47, 5  ;;  %v4587_v47 = vld [vmem:[%s5159_s11 + $0xb4] sm:$0xe] }
 0x22d   : > { %v3586_v54 = vpop.f32.mrf.mxu3  ;;  %v2650_v49 = vpop.f32.mrf.mxu1  ;;  %v3397_v13 = vrot.slane %v3396_v28, 4 }
 0x22e   : > { %4154 = vst [vmem:[%s6229_s6 + $0x28] sm:$0xff] %v4122_v38  ;;  %v3657_v27 = vadd.f32 %v3586_v54, %v3003_v63  ;;  %v3407_v16 = vrot.slane %v3406_v33, 4  ;;  %v2718_v6 = vadd.f32 %v2650_v49, %v5728_v30  ;;  %v3840_v30 = vrot.slane %v6322_v55, 5  ;;  %v6371_v49 = vld [vmem:[%s5159_s11 + $0xc4] sm:$0xf] }
 0x22f   : > { %4844 = vmatmul.msk.bf16.gmra.mxu0 %vm656_vm4, %v3904_v14  ;;  %v4994_v14 = vld [vmem:[%s5159_s11 + $0xb0] sm:$0x1]  ;;  %v3423_v55 = vshll.u32 %v6371_v49, 16 }
 0x230   : > { %v4055_v59 = vadd.f32 %v3984_v11, %v3657_v27  ;;  %v2934_v12 = vpop.f32.mrf.mxu2  ;;  %4618 = vmatmul.msk.bf16.gmra.mxu1 %vm656_vm4, %v2566_v10  ;;  %v2504_v4 = vrot.slane %v4994_v14, 5  ;;  %v2502_v10 = vsel %vm5345_vm7, %v4602_v3, %v2501_v35  ;;  %v3885_v27 = vunpack.c.l.b16 %v3834_v44  ;;  %v4777_v35 = vld [vmem:[%s5159_s11 + $0xc0] sm:$0xf]  ;;  %v4995_v44 = vld [vmem:[%s5159_s11 + $0xb8] sm:$0xf] }
 0x231   : > { %v3004_v43 = vadd.f32 %v2934_v12, %v2717_v15  ;;  %v2508_v28 = vrot.slane %v4995_v44, 5  ;;  %v3417_v33 = vshll.u32 %v4777_v35, 16 }
 0x232   : > { %v4091_v63 = vadd.f32 %v6198_v7, %v4055_v59  ;;  %v2505_v0 = vsel %vm5345_vm7, %v2503_v23, %v2504_v4  ;;  %v2548_v59 = vunpack.c.l.b16 %v2502_v10  ;;  %v3905_v25 = vpack.c.b16 %v3886_v24, %v3885_v27 }
 0x233   : > { %v2549_v15 = vunpack.c.l.b16 %v2505_v0  ;;  %v3412_v4 = vsel %vm5171_vm3, %v3407_v16, %v3411_v46  ;;  %v3842_v10 = vrot.slane %v3840_v30, 4  ;;  %v3843_v27 = vrot.slane %v6345_v41, 5 }
 0x234   : > { %v4123_v31 = vmax.f32 %v4091_v63, 0.0  ;;  %v3986_v60 = vpop.f32.mrf.mxu0  ;;  %v4813_v63 = vld [vmem:[%s5159_s11 + $0xb4] sm:$0xe]  ;;  %v3490_v34 = vunpack.c.l.b16 %v3412_v4  ;;  %v4603_v16 = vrot.slane %v4587_v47, 9  ;;  %v2510_v46 = vrot.slane %v2508_v28, 4 }
 0x235   : > { %v3588_v38 = vpop.f32.mrf.mxu3  ;;  %4731 = vmatmul.msk.bf16.gmra.mxu2 %vm656_vm4, %v4898_v62  ;;  %v2652_v11 = vpop.f32.mrf.mxu1  ;;  %v3402_v62 = vsel %vm5171_vm3, %v3397_v13, %v6339_v48  ;;  %v2567_v14 = vpack.c.b16 %v2549_v15, %v2548_v59  ;;  %v4899_v13 = vld [vmem:[%s5159_s11 + $0xb4] sm:$0xff] }
 0x236   : > { %4155 = vst [vmem:[%s6229_s6 + $0x30] sm:$0xff] %v4123_v31  ;;  %v3658_v54 = vadd.f32 %v3588_v38, %v3004_v43  ;;  %v3414_v43 = vshrl.u32 %v4777_v35, 16  ;;  %v3427_v31 = vshrl.u32 %v6371_v49, 16  ;;  %v4829_v38 = vrot.slane %v4813_v63, 9 }
 0x237   : > { %v3425_v35 = vrot.slane %v3423_v55, 5 }
 0x238   : > { %v4056_v20 = vadd.f32 %v3986_v60, %v3658_v54  ;;  %v2937_v56 = vpop.f32.mrf.mxu2  ;;  %v3489_v60 = vunpack.c.l.b16 %v3402_v62  ;;  %v2719_v54 = vadd.f32 %v2652_v11, %v5741_v51  ;;  %v3416_v24 = vrot.slane %v3414_v43, 4 }
 0x239   : > { %v3005_v42 = vadd.f32 %v2937_v56, %v2718_v6  ;;  %v3419_v56 = vrot.slane %v3417_v33, 5  ;;  %v3841_v41 = vsel %vm5345_vm7, %v4829_v38, %v3840_v30 }
 0x23a   : > { %v4092_v12 = vadd.f32 %v6198_v7, %v4056_v20  ;;  %4796 = vmatmul.msk.bf16.gmra.mxu3 %vm656_vm4, %v3507_v57  ;;  %v4996_v20 = vld [vmem:[%s5159_s11 + $0xbc] sm:$0x1]  ;;  %v3508_v43 = vpack.c.b16 %v3490_v34, %v3489_v60  ;;  %v3887_v44 = vunpack.c.l.b16 %v3841_v41 }
 0x23b   : > { %v2511_v6 = vrot.slane %v4996_v20, 5  ;;  %v3420_v4 = vor.u32 %v3419_v56, %v3416_v24  ;;  %v3847_v24 = vrot.slane %v6371_v49, 5 }
 0x23c   : > { %v4124_v3 = vmax.f32 %v4092_v12, 0.0  ;;  %v3989_v23 = vpop.f32.mrf.mxu0  ;;  %v3429_v12 = vrot.slane %v3427_v31, 4 }
 0x23d   : > { %v3591_v26 = vpop.f32.mrf.mxu3  ;;  %v2655_v61 = vpop.f32.mrf.mxu1  ;;  %v3421_v38 = vrot.slane %v3420_v4, 4 }
 0x23e   : > { %4156 = vst [vmem:[%s6229_s6 + $0x38] sm:$0xff] %v4124_v3  ;;  %v3659_v48 = vadd.f32 %v3591_v26, %v3005_v42  ;;  %v6389_v42 = vld [vmem:[%s5159_s11 + $0xc8] sm:$0x1]  ;;  %v3430_v26 = vor.u32 %v3429_v12, %v3425_v35  ;;  %v2720_v47 = vadd.f32 %v2655_v61, %v5757_v1 }
 0x23f   : > { %4845 = vmatmul.msk.bf16.gmra.mxu0 %vm656_vm4, %v3905_v25  ;;  %v3844_v25 = vsel %vm5345_vm7, %v3842_v10, %v3843_v27  ;;  %v3433_v30 = vshll.u32 %v6389_v42, 16 }
 0x240   : > { %v4057_v0 = vadd.f32 %v3989_v23, %v3659_v48  ;;  %v2939_v57 = vpop.f32.mrf.mxu2  ;;  %4619 = vmatmul.msk.bf16.gmra.mxu1 %vm656_vm4, %v2567_v14  ;;  %v2509_v23 = vsel %vm5345_vm7, %v4603_v16, %v2508_v28  ;;  %v2512_v14 = vsel %vm5345_vm7, %v2510_v46, %v2511_v6  ;;  %v3888_v33 = vunpack.c.l.b16 %v3844_v25  ;;  %v6409_v16 = vld [vmem:[%s5159_s11 + $0xd0] sm:$0xf]  ;;  %v4997_v6 = vld [vmem:[%s5159_s11 + $0xc4] sm:$0xf] }
 0x241   : > { %v3006_v15 = vadd.f32 %v2939_v57, %v2719_v54  ;;  %v2550_v28 = vunpack.c.l.b16 %v2509_v23  ;;  %v2551_v31 = vunpack.c.l.b16 %v2512_v14  ;;  %v3431_v34 = vrot.slane %v3430_v26, 4  ;;  %v4814_v57 = vld [vmem:[%s5159_s11 + $0xc0] sm:$0xe] }
 0x242   : > { %v4093_v59 = vadd.f32 %v6198_v7, %v4057_v0  ;;  %v3435_v0 = vrot.slane %v3433_v30, 5  ;;  %v3906_v54 = vpack.c.b16 %v3888_v33, %v3887_v44  ;;  %v2515_v56 = vrot.slane %v4997_v6, 5  ;;  %v6569_v14 = vld [vmem:[#allocation5_spill] sm:$0xff] }
 0x243   : > { %v2568_v61 = vpack.c.b16 %v2551_v31, %v2550_v28  ;;  %v3447_v25 = vshll.u32 %v6409_v16, 16  ;;  %v4900_v26 = vld [vmem:[%s5159_s11 + $0xc0] sm:$0xff] }
 0x244   : > { %v4125_v51 = vmax.f32 %v4093_v59, 0.0  ;;  %v3991_v11 = vpop.f32.mrf.mxu0  ;;  %v3436_v12 = vsel %vm5171_vm3, %v3431_v34, %v3435_v0  ;;  %v2517_v33 = vrot.slane %v2515_v56, 4 }
 0x245   : > { %v3593_v62 = vpop.f32.mrf.mxu3  ;;  %4732 = vmatmul.msk.bf16.gmra.mxu2 %vm656_vm4, %v4899_v13  ;;  %v2657_v3 = vpop.f32.mrf.mxu1  ;;  %v4780_v13 = vld [vmem:[%s5159_s11 + $0xcc] sm:$0xf]  ;;  %v3492_v31 = vunpack.c.l.b16 %v3436_v12 }
 0x246   : > { %4157 = vst [vmem:[%s6229_s6 + $0x40] sm:$0xff] %v4125_v51  ;;  %v3660_v63 = vadd.f32 %v3593_v62, %v3006_v15  ;;  %v3426_v15 = vsel %vm5171_vm3, %v3421_v38, %v3425_v35  ;;  %v4830_v51 = vrot.slane %v4814_v57, 9  ;;  %v3438_v49 = vshrl.u32 %v4780_v13, 16  ;;  %v4782_v57 = vld [vmem:[%s5159_s11 + $0xd4] sm:$0x1] }
 0x247   : > { %v3441_v41 = vshll.u32 %v4780_v13, 16  ;;  %v3451_v62 = vshrl.u32 %v6409_v16, 16  ;;  %v2721_v4 = vadd.f32 %v2657_v3, %v6569_v14  ;;  %v3849_v35 = vrot.slane %v3847_v24, 4 }
 0x248   : > { %v4058_v48 = vadd.f32 %v3991_v11, %v3660_v63  ;;  %v2942_v55 = vpop.f32.mrf.mxu2  ;;  %v4588_v11 = vld [vmem:[%s5159_s11 + $0xc0] sm:$0xe]  ;;  %v3491_v30 = vunpack.c.l.b16 %v3426_v15  ;;  %v3848_v3 = vsel %vm5345_vm7, %v4830_v51, %v3847_v24  ;;  %v3440_v38 = vrot.slane %v3438_v49, 4 }
 0x249   : > { %v3007_v60 = vadd.f32 %v2942_v55, %v2720_v47  ;;  %v4604_v44 = vrot.slane %v4588_v11, 9  ;;  %v3453_v34 = vrot.slane %v3451_v62, 4  ;;  %v3889_v6 = vunpack.c.l.b16 %v3848_v3 }
 0x24a   : > { %v4094_v10 = vadd.f32 %v6198_v7, %v4058_v48  ;;  %4797 = vmatmul.msk.bf16.gmra.mxu3 %vm656_vm4, %v3508_v43  ;;  %v3850_v43 = vrot.slane %v6389_v42, 5  ;;  %v4998_v48 = vld [vmem:[%s5159_s11 + $0xc8] sm:$0x1]  ;;  %v3457_v51 = vshll.u32 %v4782_v57, 16 }
 0x24b   : > { %v2518_v47 = vrot.slane %v4998_v48, 5 }
 0x24c   : > { %v4126_v27 = vmax.f32 %v4094_v10, 0.0  ;;  %v3994_v1 = vpop.f32.mrf.mxu0  ;;  %v3443_v10 = vrot.slane %v3441_v41, 5 }
 0x24d   : > { %v3596_v46 = vpop.f32.mrf.mxu3  ;;  %v2660_v20 = vpop.f32.mrf.mxu1  ;;  %v2519_v24 = vsel %vm5345_vm7, %v2517_v33, %v2518_v47 }
 0x24e   : > { %4158 = vst [vmem:[%s6229_s6 + $0x48] sm:$0xff] %v4126_v27  ;;  %v3661_v59 = vadd.f32 %v3596_v46, %v3007_v60  ;;  %v3449_v60 = vrot.slane %v3447_v25, 5  ;;  %v3509_v46 = vpack.c.b16 %v3492_v31, %v3491_v30  ;;  %v3444_v15 = vor.u32 %v3443_v10, %v3440_v38 }
 0x24f   : > { %4846 = vmatmul.msk.bf16.gmra.mxu0 %vm656_vm4, %v3906_v54  ;;  %v3851_v54 = vsel %vm5345_vm7, %v3849_v35, %v3850_v43  ;;  %v2722_v49 = vadd.f32 %v2660_v20, %v5793_v52  ;;  %v2553_v62 = vunpack.c.l.b16 %v2519_v24  ;;  %v3459_v35 = vrot.slane %v3457_v51, 5 }
 0x250   : > { %v4059_v23 = vadd.f32 %v3994_v1, %v3661_v59  ;;  %v2944_v63 = vpop.f32.mrf.mxu2  ;;  %4620 = vmatmul.msk.bf16.gmra.mxu1 %vm656_vm4, %v2568_v61  ;;  %v2516_v61 = vsel %vm5345_vm7, %v4604_v44, %v2515_v56  ;;  %v3890_v59 = vunpack.c.l.b16 %v3851_v54  ;;  %v3454_v12 = vor.u32 %v3453_v34, %v3449_v60  ;;  %v4815_v44 = vld [vmem:[%s5159_s11 + $0xcc] sm:$0xe] }
 0x251   : > { %v3008_v28 = vadd.f32 %v2944_v63, %v2721_v4  ;;  %v2552_v25 = vunpack.c.l.b16 %v2516_v61  ;;  %v3445_v4 = vrot.slane %v3444_v15, 4  ;;  %v3854_v52 = vrot.slane %v6409_v16, 5  ;;  %v4901_v34 = vld [vmem:[%s5159_s11 + $0xcc] sm:$0xff] }
 0x252   : > { %v4095_v55 = vadd.f32 %v6198_v7, %v4059_v23  ;;  %v3907_v14 = vpack.c.b16 %v3890_v59, %v3889_v6  ;;  %v3455_v63 = vrot.slane %v3454_v12, 4  ;;  %v3857_v10 = vrot.slane %v4782_v57, 5 }
 0x253   : > { %v2569_v30 = vpack.c.b16 %v2553_v62, %v2552_v25  ;;  %v3450_v47 = vsel %vm5171_vm3, %v3445_v4, %v3449_v60  ;;  %v3856_v16 = vrot.slane %v3854_v52, 4 }
 0x254   : > { %v4127_v42 = vmax.f32 %v4095_v55, 0.0  ;;  %v3996_v0 = vpop.f32.mrf.mxu0  ;;  %v3460_v55 = vsel %vm5171_vm3, %v3455_v63, %v3459_v35  ;;  %v3493_v54 = vunpack.c.l.b16 %v3450_v47 }
 0x255   : > { %v3598_v27 = vpop.f32.mrf.mxu3  ;;  %4733 = vmatmul.msk.bf16.gmra.mxu2 %vm656_vm4, %v4900_v26  ;;  %v2662_v1 = vpop.f32.mrf.mxu1 }
 0x256   : > { %4159 = vst [vmem:[%s6229_s6 + $0x50] sm:$0xff] %v4127_v42  ;;  %v3662_v13 = vadd.f32 %v3598_v27, %v3008_v28  ;;  %v4831_v28 = vrot.slane %v4815_v44, 9  ;;  %v2723_v3 = vadd.f32 %v2662_v1, %v5813_v21  ;;  %v3494_v27 = vunpack.c.l.b16 %v3460_v55 }
 0x257   : > { %v3858_v21 = vsel %vm5345_vm7, %v3856_v16, %v3857_v10 }
 0x258   : > { %v4060_v11 = vadd.f32 %v3996_v0, %v3662_v13  ;;  %v2947_v41 = vpop.f32.mrf.mxu2  ;;  %v3855_v36 = vsel %vm5345_vm7, %v4831_v28, %v3854_v52  ;;  %v3510_v13 = vpack.c.b16 %v3494_v27, %v3493_v54  ;;  %v3892_v6 = vunpack.c.l.b16 %v3858_v21 }
 0x259   : > { %v3009_v23 = vadd.f32 %v2947_v41, %v2722_v49 }
 0x25a   : > { %v4096_v56 = vadd.f32 %v6198_v7, %v4060_v11  ;;  %4798 = vmatmul.msk.bf16.gmra.mxu3 %vm656_vm4, %v3509_v46  ;;  %v3891_v46 = vunpack.c.l.b16 %v3855_v36 }
 0x25c   : > { %v4128_v43 = vmax.f32 %v4096_v56, 0.0  ;;  %v3999_v26 = vpop.f32.mrf.mxu0  ;;  %v3908_v11 = vpack.c.b16 %v3892_v6, %v3891_v46 }
 0x25d   : > { %v3601_v20 = vpop.f32.mrf.mxu3  ;;  %v2665_v33 = vpop.f32.mrf.mxu1 }
 0x25e   : > { %4160 = vst [vmem:[%s6229_s6 + $0x58] sm:$0xff] %v4128_v43  ;;  %v3663_v48 = vadd.f32 %v3601_v20, %v3009_v23  ;;  %v2724_v15 = vadd.f32 %v2665_v33, %v5832_v29 }
 0x25f   : > { %4847 = vmatmul.msk.bf16.gmra.mxu0 %vm656_vm4, %v3907_v14  ;;  %v6570_v14 = vld [vmem:[#allocation6_spill] sm:$0xff] }
 0x260   : > { %v4061_v31 = vadd.f32 %v3999_v26, %v3663_v48  ;;  %v2949_v38 = vpop.f32.mrf.mxu2  ;;  %4621 = vmatmul.msk.bf16.gmra.mxu1 %vm656_vm4, %v2569_v30 }
 0x261   : > { %v3010_v0 = vadd.f32 %v2949_v38, %v2723_v3 }
 0x262   : > { %v4097_v42 = vadd.f32 %v6198_v7, %v4061_v31 }
 0x264   : > { %v4129_v60 = vmax.f32 %v4097_v42, 0.0  ;;  %v4001_v61 = vpop.f32.mrf.mxu0 }
 0x265   : > { %v3603_v1 = vpop.f32.mrf.mxu3  ;;  %4734 = vmatmul.msk.bf16.gmra.mxu2 %vm656_vm4, %v4901_v34  ;;  %v2667_v24 = vpop.f32.mrf.mxu1 }
 0x266   : > { %4161 = vst [vmem:[%s6229_s6 + $0x60] sm:$0xff] %v4129_v60  ;;  %v3664_v57 = vadd.f32 %v3603_v1, %v3010_v0  ;;  %v2725_v4 = vadd.f32 %v2667_v24, %v6570_v14 }
 0x268   : > { %v4062_v59 = vadd.f32 %v4001_v61, %v3664_v57  ;;  %v2952_v12 = vpop.f32.mrf.mxu2 }
 0x269   : > { %v3011_v18 = vadd.f32 %v2952_v12, %v2724_v15 }
 0x26a   : > { %v4098_v51 = vadd.f32 %v6198_v7, %v4062_v59  ;;  %4799 = vmatmul.msk.bf16.gmra.mxu3 %vm656_vm4, %v3510_v13 }
 0x26c   : > { %v4130_v49 = vmax.f32 %v4098_v51, 0.0  ;;  %v4004_v41 = vpop.f32.mrf.mxu0 }
 0x26d   : > { %v3606_v25 = vpop.f32.mrf.mxu3  ;;  %v2670_v62 = vpop.f32.mrf.mxu1 }
 0x26e   : > { %4162 = vst [vmem:[%s6229_s6 + $0x68] sm:$0xff] %v4130_v49  ;;  %v3665_v56 = vadd.f32 %v3606_v25, %v3011_v18  ;;  %v2726_v33 = vadd.f32 %v2670_v62, %v5875_v5 }
 0x26f   : > { %4848 = vmatmul.msk.bf16.gmra.mxu0 %vm656_vm4, %v3908_v11 }
 0x270   : > { %v4063_v23 = vadd.f32 %v4004_v41, %v3665_v56  ;;  %v2954_v29 = vpop.f32.mrf.mxu2 }
 0x271   : > { %v3012_v35 = vadd.f32 %v2954_v29, %v2725_v4 }
 0x272   : > { %v4099_v63 = vadd.f32 %v6198_v7, %v4063_v23 }
 0x274   : > { %v4131_v43 = vmax.f32 %v4099_v63, 0.0  ;;  %v4006_v26 = vpop.f32.mrf.mxu0 }
 0x275   : > { %v3608_v30 = vpop.f32.mrf.mxu3  ;;  %v2672_v44 = vpop.f32.mrf.mxu1 }
 0x276   : > { %4163 = vst [vmem:[%s6229_s6 + $0x70] sm:$0xff] %v4131_v43  ;;  %v3666_v52 = vadd.f32 %v3608_v30, %v3012_v35  ;;  %v2727_v34 = vadd.f32 %v2672_v44, %v5899_v22 }
 0x278   : > { %v4064_v20 = vadd.f32 %v4006_v26, %v3666_v52  ;;  %v2957_v48 = vpop.f32.mrf.mxu2 }
 0x279   : > { %v3013_v55 = vadd.f32 %v2957_v48, %v2726_v33  ;;  %v6486_v33 = vld [vmem:[%s6558_s2] ss:$0 sm:$0xff] }
 0x27a   : > { %v4100_v47 = vadd.f32 %v6198_v7, %v4064_v20 }
 0x27c   : > { %v4132_v28 = vmax.f32 %v4100_v47, 0.0  ;;  %v4009_v31 = vpop.f32.mrf.mxu0 }
 0x27d   : > { %v3611_v3 = vpop.f32.mrf.mxu3  ;;  %v2675_v38 = vpop.f32.mrf.mxu1 }
 0x27e   : > { %4164 = vst [vmem:[%s6229_s6 + $0x78] sm:$0xff] %v4132_v28  ;;  %v3667_v16 = vadd.f32 %v3611_v3, %v3013_v55  ;;  %v2728_v1 = vadd.f32 %v2675_v38, %v5918_v19 }
 0x280   : > { %v4065_v10 = vadd.f32 %v4009_v31, %v3667_v16  ;;  %v2959_v42 = vpop.f32.mrf.mxu2 }
 0x281   : > { %v3014_v54 = vadd.f32 %v2959_v42, %v2727_v34 }
 0x282   : > { %v4101_v0 = vadd.f32 %v6198_v7, %v4065_v10 }
 0x284   : > { %v4133_v5 = vmax.f32 %v4101_v0, 0.0  ;;  %v4011_v27 = vpop.f32.mrf.mxu0 }
 0x285   : > { %v3613_v60 = vpop.f32.mrf.mxu3  ;;  %v2677_v61 = vpop.f32.mrf.mxu1 }
 0x286   : > { %4165 = vst [vmem:[%s6229_s6 + $0x80] sm:$0xff] %v4133_v5  ;;  %v3668_v36 = vadd.f32 %v3613_v60, %v3014_v54  ;;  %v2729_v51 = vadd.f32 %v2677_v61, %v5942_v53  ;;  %v6571_v60 = vld [vmem:[#allocation7_spill] sm:$0xff] }
 0x288   : > { %v4066_v21 = vadd.f32 %v4011_v27, %v3668_v36  ;;  %v2962_v24 = vpop.f32.mrf.mxu2 }
 0x289   : > { %v3015_v13 = vadd.f32 %v2962_v24, %v2728_v1 }
 0x28a   : > { %v4102_v57 = vadd.f32 %v6198_v7, %v4066_v21 }
 0x28c   : > { %v4134_v22 = vmax.f32 %v4102_v57, 0.0  ;;  %v4014_v46 = vpop.f32.mrf.mxu0 }
 0x28d   : > { %v3616_v6 = vpop.f32.mrf.mxu3  ;;  %v2680_v59 = vpop.f32.mrf.mxu1 }
 0x28e   : > { %4166 = vst [vmem:[%s6229_s6 + $0x88] sm:$0xff] %v4134_v22  ;;  %v3669_v15 = vadd.f32 %v3616_v6, %v3015_v13  ;;  %v2730_v14 = vadd.f32 %v2680_v59, %v5961_v2 }
 0x290   : > { %v4067_v12 = vadd.f32 %v4014_v46, %v3669_v15  ;;  %v2964_v18 = vpop.f32.mrf.mxu2 }
 0x291   : > { %v3016_v49 = vadd.f32 %v2964_v18, %v2729_v51 }
 0x292   : > { %v4103_v11 = vadd.f32 %v6198_v7, %v4067_v12 }
 0x294   : > { %v4135_v19 = vmax.f32 %v4103_v11, 0.0  ;;  %v4016_v41 = vpop.f32.mrf.mxu0 }
 0x295   : > { %v3618_v25 = vpop.f32.mrf.mxu3  ;;  %v2682_v62 = vpop.f32.mrf.mxu1 }
 0x296   : > { %4167 = vst [vmem:[%s6229_s6 + $0x90] sm:$0xff] %v4135_v19  ;;  %v3670_v56 = vadd.f32 %v3618_v25, %v3016_v49  ;;  %v2731_v52 = vadd.f32 %v2682_v62, %v5985_v40 }
 0x298   : > { %v4068_v23 = vadd.f32 %v4016_v41, %v3670_v56  ;;  %v2967_v4 = vpop.f32.mrf.mxu2 }
 0x299   : > { %v3017_v63 = vadd.f32 %v2967_v4, %v2730_v14 }
 0x29a   : > { %v4104_v29 = vadd.f32 %v6198_v7, %v4068_v23 }
 0x29c   : > { %v4136_v35 = vmax.f32 %v4104_v29, 0.0  ;;  %v4019_v53 = vpop.f32.mrf.mxu0 }
 0x29d   : > { %v3621_v43 = vpop.f32.mrf.mxu3  ;;  %v2685_v26 = vpop.f32.mrf.mxu1 }
 0x29e   : > { %4168 = vst [vmem:[%s6229_s6 + $0x98] sm:$0xff] %v4136_v35  ;;  %v3671_v30 = vadd.f32 %v3621_v43, %v3017_v63  ;;  %v2732_v38 = vadd.f32 %v2685_v26, %v6004_v8 }
 0x2a0   : > { %v4069_v44 = vadd.f32 %v4019_v53, %v3671_v30  ;;  %v2969_v20 = vpop.f32.mrf.mxu2 }
 0x2a1   : > { %v3018_v7 = vadd.f32 %v2969_v20, %v2731_v52 }
 0x2a2   : > { %v4105_v2 = vadd.f32 %v6486_v33, %v4069_v44 }
 0x2a4   : > { %v4137_v48 = vmax.f32 %v4105_v2, 0.0  ;;  %v4021_v47 = vpop.f32.mrf.mxu0 }
 0x2a5   : > { %v3623_v55 = vpop.f32.mrf.mxu3  ;;  %v2687_v28 = vpop.f32.mrf.mxu1 }
 0x2a6   : > { %4169 = vst [vmem:[%s6229_s6 + $0xa0] sm:$0xff] %v4137_v48  ;;  %v3672_v31 = vadd.f32 %v3623_v55, %v3018_v7  ;;  %v2733_v61 = vadd.f32 %v2687_v28, %v6571_v60 }
 0x2a8   : > { %v4070_v3 = vadd.f32 %v4021_v47, %v3672_v31  ;;  %v2972_v40 = vpop.f32.mrf.mxu2 }
 0x2a9   : > { %v3019_v10 = vadd.f32 %v2972_v40, %v2732_v38 }
 0x2aa   : > { %v4106_v16 = vadd.f32 %v6486_v33, %v4070_v3 }
 0x2ac   : > { %v4138_v34 = vmax.f32 %v4106_v16, 0.0  ;;  %v4024_v42 = vpop.f32.mrf.mxu0 }
 0x2ad   : > { %v3626_v0 = vpop.f32.mrf.mxu3  ;;  %v2690_v54 = vpop.f32.mrf.mxu1 }
 0x2ae   : > { %4170 = vst [vmem:[%s6229_s6 + $0xa8] sm:$0xff] %v4138_v34  ;;  %v3673_v5 = vadd.f32 %v3626_v0, %v3019_v10  ;;  %v2734_v6 = vadd.f32 %v2690_v54, %v6045_v17 }
 0x2b0   : > { %v4071_v27 = vadd.f32 %v4024_v42, %v3673_v5  ;;  %v2974_v36 = vpop.f32.mrf.mxu2 }
 0x2b1   : > { %v3020_v1 = vadd.f32 %v2974_v36, %v2733_v61 }
 0x2b2   : > { %v4107_v21 = vadd.f32 %v6486_v33, %v4071_v27 }
 0x2b4   : > { %v4139_v8 = vmax.f32 %v4107_v21, 0.0  ;;  %v4026_v24 = vpop.f32.mrf.mxu0 }
 0x2b5   : > { %v3628_v57 = vpop.f32.mrf.mxu3  ;;  %v2692_v13 = vpop.f32.mrf.mxu1 }
 0x2b6   : > { %4171 = vst [vmem:[%s6229_s6 + $0xb0] sm:$0xff] %v4139_v8  ;;  %v3674_v22 = vadd.f32 %v3628_v57, %v3020_v1  ;;  %v2735_v25 = vadd.f32 %v2692_v13, %v6066_v50 }
 0x2b8   : > { %v4072_v46 = vadd.f32 %v4026_v24, %v3674_v22  ;;  %v2977_v59 = vpop.f32.mrf.mxu2 }
 0x2b9   : > { %v3021_v12 = vadd.f32 %v2977_v59, %v2734_v6 }
 0x2ba   : > { %v4108_v15 = vadd.f32 %v6486_v33, %v4072_v46 }
 0x2bc   : > { %v4140_v51 = vmax.f32 %v4108_v15, 0.0  ;;  %v4029_v18 = vpop.f32.mrf.mxu0 }
 0x2bd   : > { %v3631_v11 = vpop.f32.mrf.mxu3  ;;  %v2695_v49 = vpop.f32.mrf.mxu1 }
 0x2be   : > { %4172 = vst [vmem:[%s6229_s6 + $0xb8] sm:$0xff] %v4140_v51  ;;  %v3675_v19 = vadd.f32 %v3631_v11, %v3021_v12  ;;  %v2736_v53 = vadd.f32 %v2695_v49, %v6084_v9 }
 0x2c0   : > { %v4073_v41 = vadd.f32 %v4029_v18, %v3675_v19  ;;  %v2979_v62 = vpop.f32.mrf.mxu2 }
 0x2c1   : > { %v3022_v23 = vadd.f32 %v2979_v62, %v2735_v25 }
 0x2c2   : > { %v4109_v56 = vadd.f32 %v6486_v33, %v4073_v41 }
 0x2c4   : > { %v4141_v17 = vmax.f32 %v4109_v56, 0.0  ;;  %v4031_v14 = vpop.f32.mrf.mxu0 }
 0x2c5   : > { %v3633_v4 = vpop.f32.mrf.mxu3  ;;  %v2697_v29 = vpop.f32.mrf.mxu1 }
 0x2c6   : > { %4173 = vst [vmem:[%s6229_s6 + $0xc0] sm:$0xff] %v4141_v17  ;;  %v3676_v63 = vadd.f32 %v3633_v4, %v3022_v23  ;;  %v2737_v48 = vadd.f32 %v2697_v29, %v6107_v45 }
 0x2c8   : > { %v4074_v35 = vadd.f32 %v4031_v14, %v3676_v63  ;;  %v2982_v43 = vpop.f32.mrf.mxu2 }
 0x2c9   : > { %v3023_v30 = vadd.f32 %v2982_v43, %v2736_v53 }
 0x2ca   : > { %v4110_v26 = vadd.f32 %v6486_v33, %v4074_v35 }
 0x2cc   : > { %v4142_v50 = vmax.f32 %v4110_v26, 0.0  ;;  %v4034_v44 = vpop.f32.mrf.mxu0 }
 0x2cd   : > { %v3636_v52 = vpop.f32.mrf.mxu3  ;;  %v2700_v2 = vpop.f32.mrf.mxu1 }
 0x2ce   : > { %4174 = vst [vmem:[%s6229_s6 + $0xc8] sm:$0xff] %v4142_v50  ;;  %v3677_v20 = vadd.f32 %v3636_v52, %v3023_v30  ;;  %v2738_v16 = vadd.f32 %v2700_v2, %v6127_v37 }
 0x2d0   : > { %v4075_v7 = vadd.f32 %v4034_v44, %v3677_v20  ;;  %v2984_v47 = vpop.f32.mrf.mxu2 }
 0x2d1   : > { %v3024_v28 = vadd.f32 %v2984_v47, %v2737_v48 }
 0x2d2   : > { %v4111_v55 = vadd.f32 %v6486_v33, %v4075_v7 }
 0x2d4   : > { %v4143_v9 = vmax.f32 %v4111_v55, 0.0  ;;  %v4036_v31 = vpop.f32.mrf.mxu0 }
 0x2d5   : > { %v3638_v3 = vpop.f32.mrf.mxu3  ;;  %v2702_v34 = vpop.f32.mrf.mxu1 }
 0x2d6   : > { %4175 = vst [vmem:[%s6229_s6 + $0xd0] sm:$0xff] %v4143_v9  ;;  %v3678_v38 = vadd.f32 %v3638_v3, %v3024_v28  ;;  %v2739_v61 = vadd.f32 %v2702_v34, %v6150_v58 }
 0x2d8   : > { %v4076_v40 = vadd.f32 %v4036_v31, %v3678_v38  ;;  %v2987_v10 = vpop.f32.mrf.mxu2 }
 0x2d9   : > { %v3025_v0 = vadd.f32 %v2987_v10, %v2738_v16 }
 0x2da   : > { %v4112_v42 = vadd.f32 %v6486_v33, %v4076_v40 }
 0x2dc   : > { %v4144_v45 = vmax.f32 %v4112_v42, 0.0  ;;  %v4039_v54 = vpop.f32.mrf.mxu0 }
 0x2dd   : > { %v3641_v5 = vpop.f32.mrf.mxu3  ;;  %v2705_v37 = vpop.f32.mrf.mxu1 }
 0x2de   : > { %4176 = vst [vmem:[%s6229_s6 + $0xd8] sm:$0xff] %v4144_v45  ;;  %v3679_v27 = vadd.f32 %v3641_v5, %v3025_v0  ;;  %v2740_v46 = vadd.f32 %v2705_v37, %v6168_v32 }
 0x2e0   : > { %v4077_v60 = vadd.f32 %v4039_v54, %v3679_v27  ;;  %v2989_v36 = vpop.f32.mrf.mxu2 }
 0x2e1   : > { %v3026_v1 = vadd.f32 %v2989_v36, %v2739_v61 }
 0x2e2   : > { %v4113_v21 = vadd.f32 %v6486_v33, %v4077_v60 }
 0x2e4   : > { %v4145_v8 = vmax.f32 %v4113_v21, 0.0  ;;  %v4041_v24 = vpop.f32.mrf.mxu0 }
 0x2e5   : > { %v3643_v57 = vpop.f32.mrf.mxu3  ;;  %v2707_v12 = vpop.f32.mrf.mxu1 }
 0x2e6   : > { %4177 = vst [vmem:[%s6229_s6 + $0xe0] sm:$0xff] %v4145_v8  ;;  %v3680_v13 = vadd.f32 %v3643_v57, %v3026_v1  ;;  %v2741_v19 = vadd.f32 %v2707_v12, %v6189_v39 }
 0x2e8   : > { %v4078_v22 = vadd.f32 %v4041_v24, %v3680_v13  ;;  %v2992_v6 = vpop.f32.mrf.mxu2 }
 0x2e9   : > { %v3027_v15 = vadd.f32 %v2992_v6, %v2740_v46 }
 0x2ea   : > { %v4114_v59 = vadd.f32 %v6486_v33, %v4078_v22 }
 0x2ec   : > { %v4146_v58 = vmax.f32 %v4114_v59, 0.0  ;;  %v4044_v51 = vpop.f32.mrf.mxu0 }
 0x2ed   : > { %v3646_v18 = vpop.f32.mrf.mxu3 }
 0x2ee   : > { %4178 = vst [vmem:[%s6229_s6 + $0xe8] sm:$0xff] %v4146_v58  ;;  %v3681_v11 = vadd.f32 %v3646_v18, %v3027_v15 }
 0x2f0   : > { %v4079_v49 = vadd.f32 %v4044_v51, %v3681_v11  ;;  %v2994_v41 = vpop.f32.mrf.mxu2 }
 0x2f1   : > { %v3028_v32 = vadd.f32 %v2994_v41, %v2741_v19 }
 0x2f2   : > { %v4115_v25 = vadd.f32 %v6486_v33, %v4079_v49 }
 0x2f4   : > { %v4147_v62 = vmax.f32 %v4115_v25, 0.0  ;;  %v4046_v17 = vpop.f32.mrf.mxu0 }
 0x2f5   : > { %v3648_v56 = vpop.f32.mrf.mxu3 }
 0x2f6   : > { %4179 = vst [vmem:[%s6229_s6 + $0xf0] sm:$0xff] %v4147_v62  ;;  %v3682_v23 = vadd.f32 %v3648_v56, %v3028_v32 }
 0x2f8   : > { %v4080_v14 = vadd.f32 %v4046_v17, %v3682_v23 }
 0x2fa   : > { %v4116_v39 = vadd.f32 %v6486_v33, %v4080_v14 }
 0x2fc   : > { %v4148_v4 = vmax.f32 %v4116_v39, 0.0 }
 0x2fe   : > { %4180 = vst [vmem:[%s6229_s6 + $0xf8] sm:$0xff] %v4148_v4 }
 0x2ff   : > { %5027 = shalt.err (!%p5024_p3)
}
 0x300   : > { %s5064_s29 = smov 128   ;;  %s5065_s5 = smov 8  }
 0x301   : > { %4907 = dma.vmem_to_hbm [thread:$0]  (%p5124_p5), %s4195_s19, 4096, %s4197_s20, %s4182_s16, %s5064_s29, %s5064_s29, %s5065_s5  }
 0x302 PF: > { %p4913_p4 = scmp.ge.s32.totalorder %s5062_s15, 2  ;;  %s4211_s6 = sand.u32 1, %s5050_s12  }
 0x303   : > { %s4212_s7 = scalar_lea.sflag [#allocation3], %s4211_s6 }
 0x304   : > { %p4910_p7 = pnand %p4913_p4, %p5128_p6 }
 0x306   : > { %p4911_p8 = pneg %p4910_p7 }
 0x308   : > { %5045 = dma.done.wait (%p4911_p8), %s4212_s7, 4096  }
 0x309   : > { %5047 = vsyncadd (%p4911_p8), %s4212_s7, 4294963200  ;;  %p13_p9 = scmp.ge.s32.totalorder %s5111_s18, 4   ;;  %s6572_s12 = smov %s5054_s13 }
 0x30a   : > { %s6573_s13 = smov %s5058_s14  ;;  %s6574_s14 = smov %s5122_s21 }
 0x30b   : > { %s6575_s15 = smov %s5111_s18  ;;  %15 = sbr.rel (!%p13_p9) target bundleno = 3 (0x3), region = 77 }
 0x310   :  { %4218 = vsyncpa [#allocation3], 1 }
 0x311   :  { %4220 = vsyncpa [#allocation3 + $0x1], 1 }

</bundles_post_ra>
